<compile_context>
chip_gen: v7x
topology: tpu7x:2x2x1
jax: 0.10.0
libtpu: 0.0.40
codegen_flags: <defaults>
</compile_context>

<pallas_src>
import jax
import jax.numpy as jnp
from jax.experimental import pallas as pl
from jax.experimental.pallas import tpu as pltpu


def _pheno_kernel(gh1_ref, h1_ref, gh2_ref, h2_ref, pp_ref,
                  wsqT_ref, coef_ref, w1aT_ref, lmisc_ref, out_ref):
    # wsqT = (hpar^2).T, shape (H, hid); activations are (bm, H), batch on sublanes.
    wsqT = wsqT_ref[...]

    def gram(p):  # weighted sum over h_len on the MXU: (bm, H) @ (H, hid) -> (bm, hid)
        return jnp.dot(p, wsqT, preferred_element_type=jnp.float32)

    g1 = gh1_ref[...]
    hh1 = h1_ref[...]
    g2 = gh2_ref[...]
    hh2 = h2_ref[...]

    # per-hidden coefficient rows (1, hid), precomputed in the wrapper; broadcast
    # over the batch sublanes.
    asq = coef_ref[0:1, :]      # a^2
    bsq = coef_ref[1:2, :]      # b^2
    ab = coef_ref[2:3, :]       # a*b
    ac = coef_ref[3:4, :]       # a*c
    bc = coef_ref[4:5, :]       # b*c
    ccw = coef_ref[5:6, :]      # c^2 * sum_k hpar^2
    oscale = coef_ref[6:7, :]   # out_scale
    obias = coef_ref[7:8, :]    # bias

    # Gram terms shared between the dot product and the norms
    P_g1 = gram(g1)
    P_h1 = gram(hh1)
    P_g2 = gram(g2)
    P_h2 = gram(hh2)

    dot12 = (asq * gram(g1 * g2)
             + ab * (gram(g1 * hh2) + gram(hh1 * g2))
             + bsq * gram(hh1 * hh2)
             + ac * (P_g1 + P_g2) + bc * (P_h1 + P_h2) + ccw)
    n1sq = (asq * gram(g1 * g1) + bsq * gram(hh1 * hh1)
            + 2.0 * ab * gram(g1 * hh1)
            + 2.0 * (ac * P_g1 + bc * P_h1) + ccw)
    n2sq = (asq * gram(g2 * g2) + bsq * gram(hh2 * hh2)
            + 2.0 * ab * gram(g2 * hh2)
            + 2.0 * (ac * P_g2 + bc * P_h2) + ccw)

    # cosine similarity: clamp the *squared* norms at eps^2 to match
    # max(||x||, eps) semantics of torch.nn.CosineSimilarity (eps = 1e-8).
    eps2 = 1e-16
    inv1 = jax.lax.rsqrt(jnp.maximum(n1sq, eps2))
    inv2 = jax.lax.rsqrt(jnp.maximum(n2sq, eps2))
    feat = (dot12 * inv1 * inv2) * oscale + obias          # (bm, hid)

    # packed linear params: rows = [w1b, b1, w2, b2(broadcast)], each (1, 2*hid)
    w1b = lmisc_ref[0:1, :]
    b1 = lmisc_ref[1:2, :]
    w2r = lmisc_ref[2:3, :]
    b2 = lmisc_ref[3:4, 0:1]                               # (1, 1)
    pp = pp_ref[...]                                       # (bm, 1)

    # linear1 on concat([feat, pp]):  z1 = feat @ W1a.T + pp * w1b + b1
    z1 = (jnp.dot(feat, w1aT_ref[...], preferred_element_type=jnp.float32)
          + pp * w1b + b1)                                 # (bm, 2*hid)
    z1 = jnp.where(z1 >= 0, z1, 0.1 * z1)                  # LeakyReLU(0.1)

    # linear2 (2*hid -> 1) as multiply + lane reduce (XLU), avoiding an N=1 matmul
    z2 = jnp.sum(z1 * w2r, axis=1, keepdims=True) + b2     # (bm, 1)
    out_ref[...] = jax.nn.sigmoid(z2)


def pheno_connect_forward(params, gh1, h1, gh2, h2, phenopy_res, *, g_len, bm=128):
    B, H = gh1.shape
    hid = params["out_scale"].shape[-1]
    f32 = jnp.float32

    # ---- batch tiling / padding (batch stays on the sublane axis, no transposes) ----
    bm = min(bm, ((B + 127) // 128) * 128)   # don't use a tile bigger than padded B
    bm = max(bm, 8)
    Bp = ((B + bm - 1) // bm) * bm
    nblk = Bp // bm

    def prep(x):
        x = x.astype(f32)
        if Bp != B:
            x = jnp.pad(x, ((0, Bp - B), (0, 0)))
        return x

    gh1p, h1p, gh2p, h2p = prep(gh1), prep(h1), prep(gh2), prep(h2)
    ppp = prep(phenopy_res.reshape(B, 1))

    # ---- batch-independent precomputation (plain-JAX glue, hoisted out of the kernel) ----
    hpar = params["hpo_par"].reshape(hid, H).astype(f32)
    s = params["genes_hpo_scale"].reshape(1, hid).astype(f32)
    gbe = jnp.exp(params["gen_bias"].reshape(1, hid).astype(f32))
    hbe = jnp.exp(params["hpo_bias"].reshape(1, hid).astype(f32))
    a = s                                       # coefficient of gh
    b = s * gbe                                 # coefficient of h
    c = g_len * s * hbe * (1.0 + gbe)           # constant term

    wsq = hpar * hpar                           # (hid, H)
    wsqT = wsq.T                                # (H, hid)
    wsum = jnp.sum(wsq, axis=1).reshape(1, hid)
    coef = jnp.concatenate(
        [a * a, b * b, a * b, a * c, b * c, c * c * wsum,
         params["out_scale"].reshape(1, hid).astype(f32),
         params["bias"].reshape(1, hid).astype(f32)],
        axis=0)                                 # (8, hid)

    W1 = params["linear1_w"].astype(f32)        # (2*hid, hid+1)
    w1aT = W1[:, :hid].T                        # (hid, 2*hid)
    lmisc = jnp.concatenate(
        [W1[:, hid:hid + 1].reshape(1, 2 * hid),
         params["linear1_b"].reshape(1, 2 * hid).astype(f32),
         params["linear2_w"].reshape(1, 2 * hid).astype(f32),
         jnp.broadcast_to(params["linear2_b"].reshape(1, 1).astype(f32), (1, 2 * hid))],
        axis=0)                                 # (4, 2*hid)

    act_spec = pl.BlockSpec((bm, H), lambda i: (i, 0))
    col_spec = pl.BlockSpec((bm, 1), lambda i: (i, 0))

    def full(arr):
        return pl.BlockSpec(arr.shape, lambda i: (0, 0))

    out = pl.pallas_call(
        _pheno_kernel,
        out_shape=jax.ShapeDtypeStruct((Bp, 1), f32),
        grid_spec=pltpu.PrefetchScalarGridSpec(
            num_scalar_prefetch=0,
            grid=(nblk,),
            in_specs=[act_spec, act_spec, act_spec, act_spec, col_spec,
                      full(wsqT), full(coef), full(w1aT), full(lmisc)],
            out_specs=col_spec,
        ),
        compiler_params=pltpu.CompilerParams(
            dimension_semantics=("parallel",)),
    )(gh1p, h1p, gh2p, h2p, ppp, wsqT, coef, w1aT, lmisc)

    return out[:B]


def reference_forward(params, gh1, h1, gh2, h2, pp, *, g_len):
    """Plain-JAX mirror of the PyTorch forward (eval mode)."""
    s = params["genes_hpo_scale"]               # (1, hid, 1)
    gb = jnp.exp(params["gen_bias"])
    hb = jnp.exp(params["hpo_bias"])
    g1 = gh1[:, None, :]
    hh1 = h1[:, None, :]
    g2 = gh2[:, None, :]
    hh2 = h2[:, None, :]
    x1 = (g1 * s + hh1 * s * gb + g_len * s * hb * (1.0 + gb))[..., None]
    x2 = (g2 * s + hh2 * s * gb + g_len * s * hb * (1.0 + gb))[..., None]
    hpar = params["hpo_par"]                    # (hid, H, 1)
    x1 = x1 * hpar
    x2 = x2 * hpar
    dot = jnp.sum(x1 * x2, axis=2)              # (B, hid, 1)
    n1 = jnp.sqrt(jnp.sum(x1 * x1, axis=2))
    n2 = jnp.sqrt(jnp.sum(x2 * x2, axis=2))
    eps = 1e-8
    cos = dot / (jnp.maximum(n1, eps) * jnp.maximum(n2, eps))
    out = cos[..., 0] * params["out_scale"] + params["bias"]   # (B, hid)
    out = jnp.concatenate([out, pp], axis=1)                   # (B, hid+1)
    z1 = out @ params["linear1_w"].T + params["linear1_b"]
    z1 = jnp.where(z1 >= 0, z1, 0.1 * z1)
    z2 = z1 @ params["linear2_w"].T + params["linear2_b"]
    return jax.nn.sigmoid(z2)


def init_params(key, g_len, h_len, hidden_len):
    ks = jax.random.split(key, 10)
    n = jax.random.normal
    u = jax.random.uniform

    def lin_init(kw, kb, fan_in, fan_out):
        bound = 1.0 / jnp.sqrt(fan_in)
        w = u(kw, (fan_out, fan_in), jnp.float32, -bound, bound)
        b = u(kb, (fan_out,), jnp.float32, -bound, bound)
        return w, b

    w1, b1 = lin_init(ks[6], ks[7], hidden_len + 1, hidden_len * 2)
    w2, b2 = lin_init(ks[8], ks[9], hidden_len * 2, 1)
    return {
        "hpo_par": 0.1 + 0.02 * n(ks[0], (hidden_len, h_len, 1), jnp.float32),
        "out_scale": 1.0 + 0.1 * n(ks[1], (1, hidden_len), jnp.float32),
        "bias": 0.0 + 0.1 * n(ks[2], (1, hidden_len), jnp.float32),
        "genes_hpo_scale": 0.5 + 0.1 * n(ks[3], (1, hidden_len, 1), jnp.float32),
        "hpo_bias": -1.0 + 0.2 * n(ks[4], (1, hidden_len, 1), jnp.float32),
        "gen_bias": -3.0 + 1.0 * n(ks[5], (1, hidden_len, 1), jnp.float32),
        "linear1_w": w1, "linear1_b": b1,
        "linear2_w": w2, "linear2_b": b2,
    }


if __name__ == "__main__":
    g_len, h_len, hidden_len = 16, 128, 32
    B = 256                                    # 2 blocks of bm=128 (keeps megacore busy)

    key = jax.random.PRNGKey(0)
    kp, k1, k2, k3, k4, k5 = jax.random.split(key, 6)
    params = init_params(kp, g_len, h_len, hidden_len)

    gh1 = jax.random.normal(k1, (B, h_len), jnp.float32)
    h1 = jax.random.normal(k2, (B, h_len), jnp.float32)
    gh2 = jax.random.normal(k3, (B, h_len), jnp.float32)
    h2 = jax.random.normal(k4, (B, h_len), jnp.float32)
    phenopy_res = jax.random.normal(k5, (B, 1), jnp.float32)

    out = pheno_connect_forward(params, gh1, h1, gh2, h2, phenopy_res,
                                g_len=g_len, bm=128)
    jax.block_until_ready(out)
    assert out.shape == (B, 1)

    ref = reference_forward(params, gh1, h1, gh2, h2, phenopy_res, g_len=g_len)
    max_err = float(jnp.max(jnp.abs(out - ref)))
    assert max_err < 1e-3, f"kernel/reference mismatch: {max_err}"
    print("KERNEL_OK")
</pallas_src>

<mosaic_0001>
module attributes {stable_mosaic.version = 11 : i64} {
  func.func @_pheno_kernel(%arg0: i32, %arg1: memref<128x128xf32, #tpu.memory_space<vmem>>, %arg2: memref<128x128xf32, #tpu.memory_space<vmem>>, %arg3: memref<128x128xf32, #tpu.memory_space<vmem>>, %arg4: memref<128x128xf32, #tpu.memory_space<vmem>>, %arg5: memref<128x1xf32, #tpu.memory_space<vmem>>, %arg6: memref<128x32xf32, #tpu.memory_space<vmem>>, %arg7: memref<8x32xf32, #tpu.memory_space<vmem>>, %arg8: memref<32x64xf32, #tpu.memory_space<vmem>>, %arg9: memref<4x64xf32, #tpu.memory_space<vmem>>, %arg10: memref<128x1xf32, #tpu.memory_space<vmem>>) attributes {dimension_semantics = [#tpu.dimension_semantics<parallel>], iteration_bounds = array<i64: 2>, scalar_prefetch = 0 : i64, scratch_operands = 0 : i64, tpu.core_type = #tpu.core_type<tc>, window_params = [{transform_indices = @transform_0, window_bounds = array<i64: 128, 128>}, {transform_indices = @transform_1, window_bounds = array<i64: 128, 128>}, {transform_indices = @transform_2, window_bounds = array<i64: 128, 128>}, {transform_indices = @transform_3, window_bounds = array<i64: 128, 128>}, {transform_indices = @transform_4, window_bounds = array<i64: 128, 1>}, {pipeline_mode = #tpu.pipeline_mode<synchronous>, transform_indices = @transform_5, window_bounds = array<i64: 128, 32>}, {pipeline_mode = #tpu.pipeline_mode<synchronous>, transform_indices = @transform_6, window_bounds = array<i64: 8, 32>}, {pipeline_mode = #tpu.pipeline_mode<synchronous>, transform_indices = @transform_7, window_bounds = array<i64: 32, 64>}, {pipeline_mode = #tpu.pipeline_mode<synchronous>, transform_indices = @transform_8, window_bounds = array<i64: 4, 64>}, {transform_indices = @transform_9, window_bounds = array<i64: 128, 1>}]} {
    %c0 = arith.constant 0 : index
    %c0_0 = arith.constant 0 : index
    %0 = vector.load %arg6[%c0, %c0_0] : memref<128x32xf32, #tpu.memory_space<vmem>>, vector<128x32xf32>
    %c0_1 = arith.constant 0 : index
    %c0_2 = arith.constant 0 : index
    %1 = vector.load %arg1[%c0_1, %c0_2] : memref<128x128xf32, #tpu.memory_space<vmem>>, vector<128x128xf32>
    %c0_3 = arith.constant 0 : index
    %c0_4 = arith.constant 0 : index
    %2 = vector.load %arg2[%c0_3, %c0_4] : memref<128x128xf32, #tpu.memory_space<vmem>>, vector<128x128xf32>
    %c0_5 = arith.constant 0 : index
    %c0_6 = arith.constant 0 : index
    %3 = vector.load %arg3[%c0_5, %c0_6] : memref<128x128xf32, #tpu.memory_space<vmem>>, vector<128x128xf32>
    %c0_7 = arith.constant 0 : index
    %c0_8 = arith.constant 0 : index
    %4 = vector.load %arg4[%c0_7, %c0_8] : memref<128x128xf32, #tpu.memory_space<vmem>>, vector<128x128xf32>
    %c0_9 = arith.constant 0 : index
    %c0_10 = arith.constant 0 : index
    %5 = vector.load %arg7[%c0_9, %c0_10] : memref<8x32xf32, #tpu.memory_space<vmem>>, vector<1x32xf32>
    %c1 = arith.constant 1 : index
    %c0_11 = arith.constant 0 : index
    %6 = vector.load %arg7[%c1, %c0_11] : memref<8x32xf32, #tpu.memory_space<vmem>>, vector<1x32xf32>
    %c2 = arith.constant 2 : index
    %c0_12 = arith.constant 0 : index
    %7 = vector.load %arg7[%c2, %c0_12] : memref<8x32xf32, #tpu.memory_space<vmem>>, vector<1x32xf32>
    %c3 = arith.constant 3 : index
    %c0_13 = arith.constant 0 : index
    %8 = vector.load %arg7[%c3, %c0_13] : memref<8x32xf32, #tpu.memory_space<vmem>>, vector<1x32xf32>
    %c4 = arith.constant 4 : index
    %c0_14 = arith.constant 0 : index
    %9 = vector.load %arg7[%c4, %c0_14] : memref<8x32xf32, #tpu.memory_space<vmem>>, vector<1x32xf32>
    %c5 = arith.constant 5 : index
    %c0_15 = arith.constant 0 : index
    %10 = vector.load %arg7[%c5, %c0_15] : memref<8x32xf32, #tpu.memory_space<vmem>>, vector<1x32xf32>
    %c6 = arith.constant 6 : index
    %c0_16 = arith.constant 0 : index
    %11 = vector.load %arg7[%c6, %c0_16] : memref<8x32xf32, #tpu.memory_space<vmem>>, vector<1x32xf32>
    %c7 = arith.constant 7 : index
    %c0_17 = arith.constant 0 : index
    %12 = vector.load %arg7[%c7, %c0_17] : memref<8x32xf32, #tpu.memory_space<vmem>>, vector<1x32xf32>
    %cst = arith.constant dense<0.000000e+00> : vector<128x32xf32>
    %13 = tpu.matmul %1, %0, %cst {dimension_numbers = #tpu.dot_dimension_numbers<[1], [0], [0], [1], [0, 0, 1, 1], [], []>} : vector<128x128xf32>, vector<128x32xf32>, vector<128x32xf32> -> vector<128x32xf32>
    %cst_18 = arith.constant dense<0.000000e+00> : vector<128x32xf32>
    %14 = tpu.matmul %2, %0, %cst_18 {dimension_numbers = #tpu.dot_dimension_numbers<[1], [0], [0], [1], [0, 0, 1, 1], [], []>} : vector<128x128xf32>, vector<128x32xf32>, vector<128x32xf32> -> vector<128x32xf32>
    %cst_19 = arith.constant dense<0.000000e+00> : vector<128x32xf32>
    %15 = tpu.matmul %3, %0, %cst_19 {dimension_numbers = #tpu.dot_dimension_numbers<[1], [0], [0], [1], [0, 0, 1, 1], [], []>} : vector<128x128xf32>, vector<128x32xf32>, vector<128x32xf32> -> vector<128x32xf32>
    %cst_20 = arith.constant dense<0.000000e+00> : vector<128x32xf32>
    %16 = tpu.matmul %4, %0, %cst_20 {dimension_numbers = #tpu.dot_dimension_numbers<[1], [0], [0], [1], [0, 0, 1, 1], [], []>} : vector<128x128xf32>, vector<128x32xf32>, vector<128x32xf32> -> vector<128x32xf32>
    %17 = arith.mulf %1, %3 : vector<128x128xf32>
    %cst_21 = arith.constant dense<0.000000e+00> : vector<128x32xf32>
    %18 = tpu.matmul %17, %0, %cst_21 {dimension_numbers = #tpu.dot_dimension_numbers<[1], [0], [0], [1], [0, 0, 1, 1], [], []>} : vector<128x128xf32>, vector<128x32xf32>, vector<128x32xf32> -> vector<128x32xf32>
    %19 = vector.broadcast %5 : vector<1x32xf32> to vector<128x32xf32>
    %20 = arith.mulf %19, %18 : vector<128x32xf32>
    %21 = arith.mulf %1, %4 : vector<128x128xf32>
    %cst_22 = arith.constant dense<0.000000e+00> : vector<128x32xf32>
    %22 = tpu.matmul %21, %0, %cst_22 {dimension_numbers = #tpu.dot_dimension_numbers<[1], [0], [0], [1], [0, 0, 1, 1], [], []>} : vector<128x128xf32>, vector<128x32xf32>, vector<128x32xf32> -> vector<128x32xf32>
    %23 = arith.mulf %2, %3 : vector<128x128xf32>
    %cst_23 = arith.constant dense<0.000000e+00> : vector<128x32xf32>
    %24 = tpu.matmul %23, %0, %cst_23 {dimension_numbers = #tpu.dot_dimension_numbers<[1], [0], [0], [1], [0, 0, 1, 1], [], []>} : vector<128x128xf32>, vector<128x32xf32>, vector<128x32xf32> -> vector<128x32xf32>
    %25 = arith.addf %22, %24 : vector<128x32xf32>
    %26 = vector.broadcast %7 : vector<1x32xf32> to vector<128x32xf32>
    %27 = arith.mulf %26, %25 : vector<128x32xf32>
    %28 = arith.addf %20, %27 : vector<128x32xf32>
    %29 = arith.mulf %2, %4 : vector<128x128xf32>
    %cst_24 = arith.constant dense<0.000000e+00> : vector<128x32xf32>
    %30 = tpu.matmul %29, %0, %cst_24 {dimension_numbers = #tpu.dot_dimension_numbers<[1], [0], [0], [1], [0, 0, 1, 1], [], []>} : vector<128x128xf32>, vector<128x32xf32>, vector<128x32xf32> -> vector<128x32xf32>
    %31 = vector.broadcast %6 : vector<1x32xf32> to vector<128x32xf32>
    %32 = arith.mulf %31, %30 : vector<128x32xf32>
    %33 = arith.addf %28, %32 : vector<128x32xf32>
    %34 = arith.addf %13, %15 : vector<128x32xf32>
    %35 = vector.broadcast %8 : vector<1x32xf32> to vector<128x32xf32>
    %36 = arith.mulf %35, %34 : vector<128x32xf32>
    %37 = arith.addf %33, %36 : vector<128x32xf32>
    %38 = arith.addf %14, %16 : vector<128x32xf32>
    %39 = vector.broadcast %9 : vector<1x32xf32> to vector<128x32xf32>
    %40 = arith.mulf %39, %38 : vector<128x32xf32>
    %41 = arith.addf %37, %40 : vector<128x32xf32>
    %42 = vector.broadcast %10 : vector<1x32xf32> to vector<128x32xf32>
    %43 = arith.addf %41, %42 : vector<128x32xf32>
    %44 = arith.mulf %1, %1 : vector<128x128xf32>
    %cst_25 = arith.constant dense<0.000000e+00> : vector<128x32xf32>
    %45 = tpu.matmul %44, %0, %cst_25 {dimension_numbers = #tpu.dot_dimension_numbers<[1], [0], [0], [1], [0, 0, 1, 1], [], []>} : vector<128x128xf32>, vector<128x32xf32>, vector<128x32xf32> -> vector<128x32xf32>
    %46 = vector.broadcast %5 : vector<1x32xf32> to vector<128x32xf32>
    %47 = arith.mulf %46, %45 : vector<128x32xf32>
    %48 = arith.mulf %2, %2 : vector<128x128xf32>
    %cst_26 = arith.constant dense<0.000000e+00> : vector<128x32xf32>
    %49 = tpu.matmul %48, %0, %cst_26 {dimension_numbers = #tpu.dot_dimension_numbers<[1], [0], [0], [1], [0, 0, 1, 1], [], []>} : vector<128x128xf32>, vector<128x32xf32>, vector<128x32xf32> -> vector<128x32xf32>
    %50 = vector.broadcast %6 : vector<1x32xf32> to vector<128x32xf32>
    %51 = arith.mulf %50, %49 : vector<128x32xf32>
    %52 = arith.addf %47, %51 : vector<128x32xf32>
    %cst_27 = arith.constant 2.000000e+00 : f32
    %53 = vector.broadcast %cst_27 : f32 to vector<1x32xf32>
    %54 = arith.mulf %53, %7 : vector<1x32xf32>
    %55 = arith.mulf %1, %2 : vector<128x128xf32>
    %cst_28 = arith.constant dense<0.000000e+00> : vector<128x32xf32>
    %56 = tpu.matmul %55, %0, %cst_28 {dimension_numbers = #tpu.dot_dimension_numbers<[1], [0], [0], [1], [0, 0, 1, 1], [], []>} : vector<128x128xf32>, vector<128x32xf32>, vector<128x32xf32> -> vector<128x32xf32>
    %57 = vector.broadcast %54 : vector<1x32xf32> to vector<128x32xf32>
    %58 = arith.mulf %57, %56 : vector<128x32xf32>
    %59 = arith.addf %52, %58 : vector<128x32xf32>
    %60 = vector.broadcast %8 : vector<1x32xf32> to vector<128x32xf32>
    %61 = arith.mulf %60, %13 : vector<128x32xf32>
    %62 = vector.broadcast %9 : vector<1x32xf32> to vector<128x32xf32>
    %63 = arith.mulf %62, %14 : vector<128x32xf32>
    %64 = arith.addf %61, %63 : vector<128x32xf32>
    %cst_29 = arith.constant 2.000000e+00 : f32
    %65 = vector.broadcast %cst_29 : f32 to vector<128x32xf32>
    %66 = arith.mulf %65, %64 : vector<128x32xf32>
    %67 = arith.addf %59, %66 : vector<128x32xf32>
    %68 = vector.broadcast %10 : vector<1x32xf32> to vector<128x32xf32>
    %69 = arith.addf %67, %68 : vector<128x32xf32>
    %70 = arith.mulf %3, %3 : vector<128x128xf32>
    %cst_30 = arith.constant dense<0.000000e+00> : vector<128x32xf32>
    %71 = tpu.matmul %70, %0, %cst_30 {dimension_numbers = #tpu.dot_dimension_numbers<[1], [0], [0], [1], [0, 0, 1, 1], [], []>} : vector<128x128xf32>, vector<128x32xf32>, vector<128x32xf32> -> vector<128x32xf32>
    %72 = vector.broadcast %5 : vector<1x32xf32> to vector<128x32xf32>
    %73 = arith.mulf %72, %71 : vector<128x32xf32>
    %74 = arith.mulf %4, %4 : vector<128x128xf32>
    %cst_31 = arith.constant dense<0.000000e+00> : vector<128x32xf32>
    %75 = tpu.matmul %74, %0, %cst_31 {dimension_numbers = #tpu.dot_dimension_numbers<[1], [0], [0], [1], [0, 0, 1, 1], [], []>} : vector<128x128xf32>, vector<128x32xf32>, vector<128x32xf32> -> vector<128x32xf32>
    %76 = vector.broadcast %6 : vector<1x32xf32> to vector<128x32xf32>
    %77 = arith.mulf %76, %75 : vector<128x32xf32>
    %78 = arith.addf %73, %77 : vector<128x32xf32>
    %cst_32 = arith.constant 2.000000e+00 : f32
    %79 = vector.broadcast %cst_32 : f32 to vector<1x32xf32>
    %80 = arith.mulf %79, %7 : vector<1x32xf32>
    %81 = arith.mulf %3, %4 : vector<128x128xf32>
    %cst_33 = arith.constant dense<0.000000e+00> : vector<128x32xf32>
    %82 = tpu.matmul %81, %0, %cst_33 {dimension_numbers = #tpu.dot_dimension_numbers<[1], [0], [0], [1], [0, 0, 1, 1], [], []>} : vector<128x128xf32>, vector<128x32xf32>, vector<128x32xf32> -> vector<128x32xf32>
    %83 = vector.broadcast %80 : vector<1x32xf32> to vector<128x32xf32>
    %84 = arith.mulf %83, %82 : vector<128x32xf32>
    %85 = arith.addf %78, %84 : vector<128x32xf32>
    %86 = vector.broadcast %8 : vector<1x32xf32> to vector<128x32xf32>
    %87 = arith.mulf %86, %15 : vector<128x32xf32>
    %88 = vector.broadcast %9 : vector<1x32xf32> to vector<128x32xf32>
    %89 = arith.mulf %88, %16 : vector<128x32xf32>
    %90 = arith.addf %87, %89 : vector<128x32xf32>
    %cst_34 = arith.constant 2.000000e+00 : f32
    %91 = vector.broadcast %cst_34 : f32 to vector<128x32xf32>
    %92 = arith.mulf %91, %90 : vector<128x32xf32>
    %93 = arith.addf %85, %92 : vector<128x32xf32>
    %94 = vector.broadcast %10 : vector<1x32xf32> to vector<128x32xf32>
    %95 = arith.addf %93, %94 : vector<128x32xf32>
    %cst_35 = arith.constant 1.000000e-16 : f32
    %96 = vector.broadcast %cst_35 : f32 to vector<128x32xf32>
    %97 = arith.maximumf %69, %96 : vector<128x32xf32>
    %98 = math.rsqrt %97 : vector<128x32xf32>
    %cst_36 = arith.constant 1.000000e-16 : f32
    %99 = vector.broadcast %cst_36 : f32 to vector<128x32xf32>
    %100 = arith.maximumf %95, %99 : vector<128x32xf32>
    %101 = math.rsqrt %100 : vector<128x32xf32>
    %102 = arith.mulf %43, %98 : vector<128x32xf32>
    %103 = arith.mulf %102, %101 : vector<128x32xf32>
    %104 = vector.broadcast %11 : vector<1x32xf32> to vector<128x32xf32>
    %105 = arith.mulf %103, %104 : vector<128x32xf32>
    %106 = vector.broadcast %12 : vector<1x32xf32> to vector<128x32xf32>
    %107 = arith.addf %105, %106 : vector<128x32xf32>
    %c0_37 = arith.constant 0 : index
    %c0_38 = arith.constant 0 : index
    %108 = vector.load %arg9[%c0_37, %c0_38] : memref<4x64xf32, #tpu.memory_space<vmem>>, vector<1x64xf32>
    %c1_39 = arith.constant 1 : index
    %c0_40 = arith.constant 0 : index
    %109 = vector.load %arg9[%c1_39, %c0_40] : memref<4x64xf32, #tpu.memory_space<vmem>>, vector<1x64xf32>
    %c2_41 = arith.constant 2 : index
    %c0_42 = arith.constant 0 : index
    %110 = vector.load %arg9[%c2_41, %c0_42] : memref<4x64xf32, #tpu.memory_space<vmem>>, vector<1x64xf32>
    %c3_43 = arith.constant 3 : index
    %c0_44 = arith.constant 0 : index
    %111 = vector.load %arg9[%c3_43, %c0_44] : memref<4x64xf32, #tpu.memory_space<vmem>>, vector<1x1xf32>
    %c0_45 = arith.constant 0 : index
    %c0_46 = arith.constant 0 : index
    %112 = vector.load %arg5[%c0_45, %c0_46] : memref<128x1xf32, #tpu.memory_space<vmem>>, vector<128x1xf32>
    %c0_47 = arith.constant 0 : index
    %c0_48 = arith.constant 0 : index
    %113 = vector.load %arg8[%c0_47, %c0_48] : memref<32x64xf32, #tpu.memory_space<vmem>>, vector<32x64xf32>
    %cst_49 = arith.constant dense<0.000000e+00> : vector<128x64xf32>
    %114 = tpu.matmul %107, %113, %cst_49 {dimension_numbers = #tpu.dot_dimension_numbers<[1], [0], [0], [1], [0, 0, 1, 1], [], []>} : vector<128x32xf32>, vector<32x64xf32>, vector<128x64xf32> -> vector<128x64xf32>
    %115 = vector.broadcast %112 : vector<128x1xf32> to vector<128x64xf32>
    %116 = vector.broadcast %108 : vector<1x64xf32> to vector<128x64xf32>
    %117 = arith.mulf %115, %116 : vector<128x64xf32>
    %118 = arith.addf %114, %117 : vector<128x64xf32>
    %119 = vector.broadcast %109 : vector<1x64xf32> to vector<128x64xf32>
    %120 = arith.addf %118, %119 : vector<128x64xf32>
    %cst_50 = arith.constant 0.000000e+00 : f32
    %121 = vector.broadcast %cst_50 : f32 to vector<128x64xf32>
    %122 = arith.cmpf oge, %120, %121 : vector<128x64xf32>
    %cst_51 = arith.constant 1.000000e-01 : f32
    %123 = vector.broadcast %cst_51 : f32 to vector<128x64xf32>
    %124 = arith.mulf %123, %120 : vector<128x64xf32>
    %125 = arith.select %122, %120, %124 : vector<128x64xi1>, vector<128x64xf32>
    %126 = vector.broadcast %110 : vector<1x64xf32> to vector<128x64xf32>
    %127 = arith.mulf %125, %126 : vector<128x64xf32>
    %cst_52 = arith.constant dense<0.000000e+00> : vector<128xf32>
    %128 = vector.multi_reduction <add>, %127, %cst_52 [1] : vector<128x64xf32> to vector<128xf32>
    %129 = vector.shape_cast %128 : vector<128xf32> to vector<128x1xf32>
    %130 = vector.broadcast %111 : vector<1x1xf32> to vector<128x1xf32>
    %131 = arith.addf %129, %130 : vector<128x1xf32>
    %132 = arith.negf %131 : vector<128x1xf32>
    %133 = math.exp %132 : vector<128x1xf32>
    %cst_53 = arith.constant 1.000000e+00 : f32
    %134 = vector.broadcast %cst_53 : f32 to vector<128x1xf32>
    %135 = arith.addf %134, %133 : vector<128x1xf32>
    %136 = arith.divf %134, %135 : vector<128x1xf32>
    %c0_54 = arith.constant 0 : index
    %c0_55 = arith.constant 0 : index
    %137 = vector.load %arg10[%c0_54, %c0_55] : memref<128x1xf32, #tpu.memory_space<vmem>>, vector<128x1xf32>
    tpu.vector_store %arg10[%c0_54, %c0_55], %136 {strides = array<i32>} : memref<128x1xf32, #tpu.memory_space<vmem>>, vector<128x1xf32>,
    return
  }
  func.func @transform_0(%arg0: i32) -> (i32, i32) {
    %c0_i32 = arith.constant 0 : i32
    %c0_i32_0 = arith.constant 0 : i32
    return %arg0, %c0_i32 : i32, i32
  }
  func.func @transform_1(%arg0: i32) -> (i32, i32) {
    %c0_i32 = arith.constant 0 : i32
    %c0_i32_0 = arith.constant 0 : i32
    return %arg0, %c0_i32 : i32, i32
  }
  func.func @transform_2(%arg0: i32) -> (i32, i32) {
    %c0_i32 = arith.constant 0 : i32
    %c0_i32_0 = arith.constant 0 : i32
    return %arg0, %c0_i32 : i32, i32
  }
  func.func @transform_3(%arg0: i32) -> (i32, i32) {
    %c0_i32 = arith.constant 0 : i32
    %c0_i32_0 = arith.constant 0 : i32
    return %arg0, %c0_i32 : i32, i32
  }
  func.func @transform_4(%arg0: i32) -> (i32, i32) {
    %c0_i32 = arith.constant 0 : i32
    %c0_i32_0 = arith.constant 0 : i32
    return %arg0, %c0_i32 : i32, i32
  }
  func.func @transform_5(%arg0: i32) -> (i32, i32) {
    %c0_i32 = arith.constant 0 : i32
    %c0_i32_0 = arith.constant 0 : i32
    %c0_i32_1 = arith.constant 0 : i32
    return %c0_i32, %c0_i32_0 : i32, i32
  }
  func.func @transform_6(%arg0: i32) -> (i32, i32) {
    %c0_i32 = arith.constant 0 : i32
    %c0_i32_0 = arith.constant 0 : i32
    %c0_i32_1 = arith.constant 0 : i32
    return %c0_i32, %c0_i32_0 : i32, i32
  }
  func.func @transform_7(%arg0: i32) -> (i32, i32) {
    %c0_i32 = arith.constant 0 : i32
    %c0_i32_0 = arith.constant 0 : i32
    %c0_i32_1 = arith.constant 0 : i32
    return %c0_i32, %c0_i32_0 : i32, i32
  }
  func.func @transform_8(%arg0: i32) -> (i32, i32) {
    %c0_i32 = arith.constant 0 : i32
    %c0_i32_0 = arith.constant 0 : i32
    %c0_i32_1 = arith.constant 0 : i32
    return %c0_i32, %c0_i32_0 : i32, i32
  }
  func.func @transform_9(%arg0: i32) -> (i32, i32) {
    %c0_i32 = arith.constant 0 : i32
    %c0_i32_0 = arith.constant 0 : i32
    return %arg0, %c0_i32 : i32, i32
  }
}

</mosaic_0001>

<bundles_post_ra>
// kernel: tpu_custom_call.1
= control target key start
LH: loop header
LB: loop body
LE: loop exit
PB: predicated region body
PF: predicated region fallthrough
CT: control target
= control target key end

     0   :  { %s8838_s0 = inlined_call_operand.vmem [shape: f32[256,128], index: 0, kind: input, shape index: {}]   ;;  %s8839_s1 = inlined_call_operand.hbm [shape: f32[256,128], index: 1, kind: input, shape index: {}]   ;;  %s8840_s2 = inlined_call_operand.hbm [shape: f32[256,128], index: 2, kind: input, shape index: {}]   ;;  %s8841_s3 = inlined_call_operand.hbm [shape: f32[256,128], index: 3, kind: input, shape index: {}]   ;;  %s8842_s4 = inlined_call_operand.vmem [shape: f32[256,1], index: 4, kind: input, shape index: {}]   ;;  %s8843_s5 = inlined_call_operand.vmem [shape: f32[128,32], index: 5, kind: input, shape index: {}]   ;;  %s8844_s6 = inlined_call_operand.vmem [shape: f32[8,32], index: 6, kind: input, shape index: {}]   ;;  %s8845_s7 = inlined_call_operand.vmem [shape: f32[32,64], index: 7, kind: input, shape index: {}]   ;;  %s8846_s8 = inlined_call_operand.vmem [shape: f32[4,64], index: 8, kind: input, shape index: {}]   ;;  %s8847_s9 = inlined_call_operand.vmem [shape: f32[256,1], index: 9, kind: output, shape index: {}]  }
   0x1   :  { %8909 = sst [smem:[#allocation51_spill]] %s8840_s2 }
   0x2   :  { %8910 = sst [smem:[#allocation52_spill]] %s8847_s9 }
   0x3   :  { %14 = vsyncpa [#allocation3], 0 }
   0x4   :  { %16 = vsyncpa [#allocation3 + $0x1], 0 }
   0x5   :  { %17 = vsyncpa [#allocation5], 0 }
   0x6   :  { %19 = vsyncpa [#allocation5 + $0x1], 0  ;;  %s6387_s30 = smov 0   ;;  %s6389_s10 = smov 0  }
   0x7   :  { %s6391_s11 = smov 0   ;;  %s6393_s12 = smov 0  }
   0x8 LB: > { %s6406_s13 = sadd.s32 4294967295, %s6329_s12   ;;  %s6409_s14 = sadd.s32 1, %s6329_s12   ;;  %s6329_s12 = sphi %s6393_s12, %s9117_s12   ;;  %s6325_s11 = sphi %s6391_s11, %s9121_s11   ;;  %s6321_s10 = sphi %s6389_s10, %s9120_s10   ;;  %s6317_s30 = sphi %s6387_s30, %s9119_s30  }
   0x9   : > { %8911 = sst [smem:[#allocation9_spill]] %s6409_s14  ;;  %s55_s15 = ssub.s32 %s6329_s12, %s6409_s14 }
   0xa   : > { %s58_s16 = sadd.s32 1, %s6325_s11  ;;  %p56_p0 = scmp.eq.s32.totalorder %s55_s15, 0 }
   0xb   : > { %p65_p1 = scmp.ne.s32.totalorder %s6325_s11, %s6321_s10  ;;  %p66_p2 = scmp.eq.s32.totalorder %s6329_s12, 0 }
   0xc   : > { %p71_p3 = scmp.ne.s32.totalorder %s6321_s10, %s6317_s30  ;;  %p72_p5 = scmp.eq.s32.totalorder %s6406_s13, 0 }
   0xd   : > { %s6419_s17 = scalar_select %p56_p0, %s6325_s11, %s58_s16  }
   0xe   : > { %p67_p4 = por %p66_p2, %p65_p1  ;;  %p6034_p6 = scmp.lt.s32.totalorder %s6329_s12, 2 }
   0xf   : > { %8912 = sst [smem:[#allocation10_spill]] %s6419_s17  ;;  %p6423_p7 = por %p72_p5, %p71_p3 }
  0x10   : > { %s8848_s19 = sand.u32 1, %s6325_s11   ;;  %s6433_s21 = sshll.u32 %s6329_s12, 11 }
  0x11   : > { %s8913_s18 = scalar_select %p6423_p7, 1, 0 }
  0x12   : > { %s6430_s20 = sshll.u32 %s8848_s19, 7  ;;  %p6435_p8 = pnand %p6034_p6, %p67_p4 }
  0x13   : > { %s325_s23 = sand.u32 1, %s6329_s12   ;;  %s8915_s2 = sld [smem:[#allocation51_spill]] }
  0x14   : > { %s329_s27 = scalar_lea.vmem [#allocation4], %s6430_s20  ;;  %s6451_s29 = scalar_lea.sflag [#allocation5], %s325_s23 }
  0x15   : > { %s336_s28 = sshll.u32 %s329_s27, 4  ;;  %p6457_p12 = pneg %p6435_p8  ;;  %s6448_s28 = int_to_ptr.vmem [resolvable:$true] %s336_s28 }
  0x19   : > { %s6444_s26 = scalar_lea.hbm %s8915_s2, %s6433_s21  ;;  %s6206_s25 = scalar_lea.hbm %s8915_s2, 4096 }
  0x1a   : > { %s6201_s30 = scalar_lea.hbm %s6444_s26, 2048  ;;  %p6207_p1 = scmp.lt.u32.totalorder %s6444_s26, %s8915_s2 }
  0x1b   : > { %p6202_p11 = scmp.ne.s32.totalorder %s6444_s26, %s6201_s30  ;;  %p6208_p2 = scmp.lt.u32.totalorder %s6206_s25, %s6201_s30 }
  0x1c   : > { %p6210_p4 = scmp.lt.u32.totalorder %s6201_s30, %s6444_s26 }
  0x1d   : > { %p6204_p13 = pnand %p6457_p12, %p6202_p11  ;;  %p6209_p3 = por %p6208_p2, %p6207_p1 }
  0x1f   : > { %p6205_p0 = pneg %p6204_p13  ;;  %p6211_p5 = por %p6210_p4, %p6209_p3 }
  0x21   : > { %p6212_p6 = pnand %p6211_p5, %p6205_p0 }
  0x23   : > { %6215 = shalt.err (!%p6212_p6)
}
  0x24   : > { %s6216_s23 = scalar_lea.vmem %s6448_s28, 2048  ;;  %s6331_s16 = smov [#allocation4]  }
  0x25   : > { %p6217_p11 = scmp.ne.s32.totalorder %s6448_s28, %s6216_s23  ;;  %s6221_s24 = sshll.u32 %s6331_s16, 4  ;;  %s6222_s24 = int_to_ptr.vmem [resolvable:$false] %s6221_s24 }
  0x26   : > { %s6223_s19 = scalar_lea.vmem %s6222_s24, 4096  ;;  %p6224_p10 = scmp.lt.s32.totalorder %s6448_s28, %s6222_s24 }
  0x27   : > { %p6219_p13 = pnand %p6217_p11, %p6457_p12  ;;  %p6225_p7 = scmp.lt.s32.totalorder %s6223_s19, %s6216_s23 }
  0x29   : > { %p6220_p9 = pneg %p6219_p13  ;;  %p6226_p1 = por %p6225_p7, %p6224_p10 }
  0x2b   : > { %p6227_p2 = pnand %p6226_p1, %p6220_p9 }
  0x2d   : > { %6230 = shalt.err (!%p6227_p2)
}
  0x2e   : > { %s8850_s30 = smov 128   ;;  %s8852_s25 = smov 8  }
  0x2f   : > { %6030 = dma.hbm_to_vmem [thread:$0]  (!%p6435_p8), %s6444_s26, 2048, %s6448_s28, %s6451_s29, %s8850_s30, %s8850_s30, %s8852_s25  }
  0x30   : > { %p8917_p7 = scmp.lt.s32.totalorder %s6329_s12, 3  ;;  %p8918_p9 = scmp.ge.s32.totalorder %s6329_s12, 1 }
  0x31   : > { %s6496_s24 = scalar_lea.hbm %s8839_s1, %s6433_s21  ;;  %s308_s19 = scalar_lea.vmem [#allocation2], %s6430_s20 }
  0x32   : > { %p6488_p10 = pnand %p8918_p9, %p8917_p7  ;;  %s315_s2 = sshll.u32 %s308_s19, 4  ;;  %s6499_s2 = int_to_ptr.vmem [resolvable:$true] %s315_s2 }
  0x33   : > { %s6505_s12 = scalar_lea.hbm %s8841_s3, %s6433_s21  ;;  %s8920_s30 = sand.u32 1, %s6325_s11  }
  0x34   : > { %s8919_s27 = scalar_select %p6488_p10, 1, 0 }
  0x35   : > { %s6509_s25 = scalar_lea.sflag [#allocation3], %s8920_s30  ;;  %s6231_s17 = scalar_lea.hbm %s6496_s24, 2048 }
  0x36   : > { %p6232_p0 = scmp.ne.s32.totalorder %s6496_s24, %s6231_s17  ;;  %s6236_s14 = scalar_lea.hbm %s8839_s1, 4096 }
  0x37   : > { %p6237_p5 = scmp.lt.u32.totalorder %s6496_s24, %s8839_s1  ;;  %p6238_p6 = scmp.lt.u32.totalorder %s6236_s14, %s6231_s17 }
  0x38   : > { %p6234_p3 = pnand %p6232_p0, %p6457_p12  ;;  %p6240_p13 = scmp.lt.u32.totalorder %s6231_s17, %s6496_s24 }
  0x39   : > { %p6239_p11 = por %p6238_p6, %p6237_p5 }
  0x3a   : > { %p6235_p4 = pneg %p6234_p3 }
  0x3b   : > { %p6241_p1 = por %p6240_p13, %p6239_p11 }
  0x3d   : > { %p6242_p2 = pnand %p6241_p1, %p6235_p4 }
  0x3f   : > { %6245 = shalt.err (!%p6242_p2)
}
  0x40   : > { %s6246_s21 = scalar_lea.vmem %s6499_s2, 2048  ;;  %s6334_s30 = smov [#allocation2]  }
  0x41   : > { %p6247_p7 = scmp.ne.s32.totalorder %s6499_s2, %s6246_s21  ;;  %s6251_s26 = sshll.u32 %s6334_s30, 4  ;;  %s6252_s26 = int_to_ptr.vmem [resolvable:$false] %s6251_s26 }
  0x42   : > { %s6253_s9 = scalar_lea.vmem %s6252_s26, 4096  ;;  %p6254_p3 = scmp.lt.s32.totalorder %s6499_s2, %s6252_s26 }
  0x43   : > { %p6249_p9 = pnand %p6247_p7, %p6457_p12  ;;  %p6255_p10 = scmp.lt.s32.totalorder %s6253_s9, %s6246_s21 }
  0x45   : > { %p6250_p0 = pneg %p6249_p9  ;;  %p6256_p5 = por %p6255_p10, %p6254_p3 }
  0x47   : > { %p6257_p6 = pnand %p6256_p5, %p6250_p0 }
  0x49   : > { %6260 = shalt.err (!%p6257_p6)
}
  0x4a   : > { %s8921_s14 = smov 8   ;;  %s8922_s17 = smov 128  }
  0x4b   : > { %6027 = dma.hbm_to_vmem [thread:$0]  (!%p6435_p8), %s6496_s24, 2048, %s6499_s2, %s6509_s25, %s8922_s17, %s8922_s17, %s8921_s14  }
  0x4c   : > { %s350_s28 = scalar_lea.vmem [#allocation6], %s6430_s20  ;;  %s6261_s16 = scalar_lea.hbm %s6505_s12, 2048 }
  0x4d   : > { %s357_s23 = sshll.u32 %s350_s28, 4  ;;  %p6262_p10 = scmp.ne.s32.totalorder %s6505_s12, %s6261_s16  ;;  %s6537_s23 = int_to_ptr.vmem [resolvable:$true] %s357_s23 }
  0x4e   : > { %s6266_s30 = scalar_lea.hbm %s8841_s3, 4096  ;;  %p6267_p13 = scmp.lt.u32.totalorder %s6505_s12, %s8841_s3 }
  0x4f   : > { %p6264_p4 = pnand %p6262_p10, %p6457_p12  ;;  %p6268_p1 = scmp.lt.u32.totalorder %s6266_s30, %s6261_s16 }
  0x50   : > { %p6270_p7 = scmp.lt.u32.totalorder %s6261_s16, %s6505_s12 }
  0x51   : > { %p6265_p11 = pneg %p6264_p4  ;;  %p6269_p2 = por %p6268_p1, %p6267_p13 }
  0x53   : > { %p6271_p9 = por %p6270_p7, %p6269_p2 }
  0x55   : > { %p6272_p0 = pnand %p6271_p9, %p6265_p11 }
  0x57   : > { %6275 = shalt.err (!%p6272_p0)
}
  0x58   : > { %s6276_s2 = scalar_lea.vmem %s6537_s23, 2048  ;;  %s6335_s20 = smov [#allocation6]  }
  0x59   : > { %p6277_p3 = scmp.ne.s32.totalorder %s6537_s23, %s6276_s2  ;;  %s6281_s25 = sshll.u32 %s6335_s20, 4  ;;  %s6282_s25 = int_to_ptr.vmem [resolvable:$false] %s6281_s25 }
  0x5a   : > { %s6283_s24 = scalar_lea.vmem %s6282_s25, 4096  ;;  %p6284_p10 = scmp.lt.s32.totalorder %s6537_s23, %s6282_s25 }
  0x5b   : > { %p6279_p5 = pnand %p6277_p3, %p6457_p12  ;;  %p6285_p4 = scmp.lt.s32.totalorder %s6283_s24, %s6276_s2 }
  0x5d   : > { %p6280_p6 = pneg %p6279_p5  ;;  %p6286_p13 = por %p6285_p4, %p6284_p10 }
  0x5f   : > { %p6287_p1 = pnand %p6286_p13, %p6280_p6 }
  0x61   : > { %6290 = shalt.err (!%p6287_p1)
}
  0x62   : > { %6033 = dma.hbm_to_vmem [thread:$0]  (!%p6435_p8), %s6505_s12, 2048, %s6537_s23, %s6451_s29, %s8922_s17, %s8922_s17, %s8921_s14  }
  0x63   : > { %p8923_p12 = scmp.ne.s32.totalorder %s8919_s27, 0 }
  0x65   : > { %378 = sbr.rel (%p8923_p12) target bundleno = 1022 (0x3fe), region = 56 }
  0x6c   : > { %s380_s15 = sand.u32 1, %s6321_s10   ;;  %p8924_p11 = scmp.ne.s32.totalorder %s8913_s18, 0 }
  0x6d   : > { %s6567_s28 = sshll.u32 %s380_s15, 7  ;;  %s381_s16 = scalar_lea.sflag [#allocation3], %s380_s15 }
  0x6e   : > { %s6570_s19 = scalar_lea.vmem [#allocation2], %s6567_s28 }
  0x6f   : > { %6308 = dma.done.wait (%p8924_p11), %s381_s16, 2048  }
  0x70   : > { %6310 = vsyncadd (%p8924_p11), %s381_s16, 4294965248  ;;  %s389_s22 = sand.u32 1, %s6406_s13   ;;  %s6578_s27 = scalar_lea.vmem [#allocation4], %s6567_s28 }
  0x71   : > { %s390_s29 = scalar_lea.sflag [#allocation5], %s389_s22 }
  0x72   : > { %6312 = dma.done.wait (%p8924_p11), %s390_s29, 4096  }
  0x73   : > { %6314 = vsyncadd (%p8924_p11), %s390_s29, 4294963200  ;;  %s4204_s12 = sshll.u32 %s6406_s13, 4  ;;  %v478_v0 = vld [vmem:[%s8843_s5] sm:$0xff]  ;;  %v479_v1 = vld [vmem:[%s8843_s5 + $0x8] sm:$0xff]  ;;  %s6849_s21 = scalar_lea.vmem [#allocation6], %s6567_s28  ;;  %vm3589_vm0 = vcmask 261120  }
  0x74   : > { %p458_p8 = scmp.lt.s32.totalorder %s4204_s12, 31  ;;  %v480_v2 = vld [vmem:[%s8843_s5 + $0x10] sm:$0xff]  ;;  %v6596_v3 = vpack.c.bf16 %v479_v1, %v478_v0  ;;  %v481_v4 = vld [vmem:[%s8843_s5 + $0x18] sm:$0xff]  ;;  %v482_v6 = vld [vmem:[%s8843_s5 + $0x20] sm:$0xff]  ;;  %vm3871_vm3 = vcmask 523264  }
  0x75   : > { %v6601_v5 = vpack.c.bf16 %v481_v4, %v480_v2  ;;  %v483_v7 = vld [vmem:[%s8843_s5 + $0x28] sm:$0xff]  ;;  %v6627_v10 = vld [vmem:[%s6570_s19] sm:$0xff]  ;;  %v484_v11 = vld [vmem:[%s8843_s5 + $0x30] sm:$0xff] }
  0x76   : > { %s9123_s12 = smov (!%p458_p8, %s4204_s12), 31  ;;  %5543 = vmatprep.subr.bf16.mxu0 %v6596_v3  ;;  %5575 = vmatprep.subr.bf16.mxu1 %v6596_v3  ;;  %v6621_v8 = vpack.c.bf16 %v483_v7, %v482_v6  ;;  %v485_v12 = vld [vmem:[%s8843_s5 + $0x38] sm:$0xff]  ;;  %v486_v14 = vld [vmem:[%s8843_s5 + $0x40] sm:$0xff]  ;;  %v487_v15 = vld [vmem:[%s8843_s5 + $0x48] sm:$0xff] }
  0x77   : > { %s6585_s14 = sshll.u32 %s9123_s12, 3  ;;  %5545 = vmatpush3.bf16.msra.mxu0 %v6596_v3  ;;  %5577 = vmatpush3.bf16.msra.mxu1 %v6596_v3  ;;  %v6641_v13 = vpack.c.bf16 %v485_v12, %v484_v11  ;;  %v6653_v16 = vpack.c.bf16 %v487_v15, %v486_v14  ;;  %v488_v17 = vld [vmem:[%s8843_s5 + $0x50] sm:$0xff]  ;;  %v489_v18 = vld [vmem:[%s8843_s5 + $0x58] sm:$0xff]  ;;  %v490_v20 = vld [vmem:[%s8843_s5 + $0x60] sm:$0xff] }
  0x78   : > { %s6613_s22 = scalar_lea.vmem %s8838_s0, %s6585_s14  ;;  %5547 = vmatprep.subr.bf16.mxu0 %v6601_v5  ;;  %5579 = vmatprep.subr.bf16.mxu1 %v6601_v5  ;;  %v6665_v19 = vpack.c.bf16 %v489_v18, %v488_v17  ;;  %v491_v21 = vld [vmem:[%s8843_s5 + $0x68] sm:$0xff]  ;;  %v492_v23 = vld [vmem:[%s8843_s5 + $0x70] sm:$0xff]  ;;  %v493_v24 = vld [vmem:[%s8843_s5 + $0x78] sm:$0xff]  ;;  %s8093_s28 = scalar_lea.vmem %s8842_s4, %s6585_s14 }
  0x79   : > { %v6624_v9 = vld [vmem:[%s6613_s22] sm:$0xff]  ;;  %4814 = vmatprep.mubr.f32.mxu1 %v6627_v10  ;;  %v6677_v22 = vpack.c.bf16 %v491_v21, %v490_v20  ;;  %v6689_v25 = vpack.c.bf16 %v493_v24, %v492_v23  ;;  %v6698_v26 = vld [vmem:[%s6613_s22 + $0x8] sm:$0xff]  ;;  %v6706_v28 = vld [vmem:[%s6613_s22 + $0x10] sm:$0xff] }
  0x7a   : > { %4758 = vmatprep.mubr.f32.mxu0 %v6624_v9  ;;  %v6701_v27 = vld [vmem:[%s6570_s19 + $0x8] sm:$0xff]  ;;  %v6709_v29 = vld [vmem:[%s6570_s19 + $0x10] sm:$0xff]  ;;  %v6716_v30 = vld [vmem:[%s6613_s22 + $0x18] sm:$0xff]  ;;  %v6866_v60 = vmul.f32 %v6627_v10, %v6624_v9 }
  0x7b   : > { %5549 = vmatpush3.bf16.msra.mxu0 %v6601_v5  ;;  %5581 = vmatpush3.bf16.msra.mxu1 %v6601_v5  ;;  %v6719_v31 = vld [vmem:[%s6570_s19 + $0x18] sm:$0xff]  ;;  %v6726_v32 = vld [vmem:[%s6613_s22 + $0x20] sm:$0xff]  ;;  %v6736_v34 = vld [vmem:[%s6613_s22 + $0x28] sm:$0xff]  ;;  %v6872_v61 = vmul.f32 %v6701_v27, %v6698_v26  ;;  %v6894_v2 = vmul.f32 %v6709_v29, %v6706_v28 }
  0x7c   : > { %5551 = vmatprep.subr.bf16.mxu0 %v6621_v8  ;;  %5583 = vmatprep.subr.bf16.mxu1 %v6621_v8  ;;  %v6729_v33 = vld [vmem:[%s6570_s19 + $0x20] sm:$0xff]  ;;  %v6739_v35 = vld [vmem:[%s6570_s19 + $0x28] sm:$0xff]  ;;  %v6746_v36 = vld [vmem:[%s6613_s22 + $0x30] sm:$0xff]  ;;  %8929 = vst [vmem:[#allocation15_spill] sm:$0xff] %v6866_v60  ;;  %v6900_v4 = vmul.f32 %v6719_v31, %v6716_v30 }
  0x7d   : > { %v6749_v37 = vld [vmem:[%s6570_s19 + $0x30] sm:$0xff]  ;;  %v6756_v38 = vld [vmem:[%s6613_s22 + $0x38] sm:$0xff]  ;;  %v6766_v40 = vld [vmem:[%s6613_s22 + $0x40] sm:$0xff]  ;;  %8930 = vst [vmem:[#allocation16_spill] sm:$0xff] %v6872_v61  ;;  %v6922_v14 = vmul.f32 %v6729_v33, %v6726_v32  ;;  %v6928_v15 = vmul.f32 %v6739_v35, %v6736_v34 }
  0x7e   : > { %v6759_v39 = vld [vmem:[%s6570_s19 + $0x38] sm:$0xff]  ;;  %v6769_v41 = vld [vmem:[%s6570_s19 + $0x40] sm:$0xff]  ;;  %v6776_v42 = vld [vmem:[%s6613_s22 + $0x48] sm:$0xff]  ;;  %8933 = vst [vmem:[#allocation19_spill] sm:$0xff] %v6894_v2  ;;  %v6950_v23 = vmul.f32 %v6749_v37, %v6746_v36 }
  0x7f   : > { %5553 = vmatpush3.bf16.msra.mxu0 %v6621_v8  ;;  %5585 = vmatpush3.bf16.msra.mxu1 %v6621_v8  ;;  %v6779_v43 = vld [vmem:[%s6570_s19 + $0x48] sm:$0xff]  ;;  %v6786_v44 = vld [vmem:[%s6613_s22 + $0x50] sm:$0xff]  ;;  %v6796_v46 = vld [vmem:[%s6613_s22 + $0x58] sm:$0xff]  ;;  %8934 = vst [vmem:[#allocation20_spill] sm:$0xff] %v6900_v4  ;;  %v6956_v24 = vmul.f32 %v6759_v39, %v6756_v38  ;;  %v6978_v4 = vmul.f32 %v6769_v41, %v6766_v40 }
  0x80   : > { %5555 = vmatprep.subr.bf16.mxu0 %v6641_v13  ;;  %5587 = vmatprep.subr.bf16.mxu1 %v6641_v13  ;;  %v6789_v45 = vld [vmem:[%s6570_s19 + $0x50] sm:$0xff]  ;;  %v6799_v47 = vld [vmem:[%s6570_s19 + $0x58] sm:$0xff]  ;;  %v6806_v48 = vld [vmem:[%s6613_s22 + $0x60] sm:$0xff]  ;;  %8937 = vst [vmem:[#allocation23_spill] sm:$0xff] %v6922_v14  ;;  %v6984_v2 = vmul.f32 %v6779_v43, %v6776_v42 }
  0x81   : > { %v6809_v49 = vld [vmem:[%s6570_s19 + $0x60] sm:$0xff]  ;;  %v6816_v50 = vld [vmem:[%s6613_s22 + $0x68] sm:$0xff]  ;;  %v6826_v52 = vld [vmem:[%s6613_s22 + $0x70] sm:$0xff]  ;;  %8938 = vst [vmem:[#allocation24_spill] sm:$0xff] %v6928_v15 }
  0x82   : > { %v6819_v51 = vld [vmem:[%s6570_s19 + $0x68] sm:$0xff]  ;;  %v6829_v53 = vld [vmem:[%s6570_s19 + $0x70] sm:$0xff]  ;;  %v6836_v54 = vld [vmem:[%s6613_s22 + $0x78] sm:$0xff]  ;;  %8941 = vst [vmem:[#allocation27_spill] sm:$0xff] %v6950_v23 }
  0x83   : > { %5557 = vmatpush3.bf16.msra.mxu0 %v6641_v13  ;;  %5589 = vmatpush3.bf16.msra.mxu1 %v6641_v13  ;;  %v6839_v55 = vld [vmem:[%s6570_s19 + $0x78] sm:$0xff]  ;;  %v6846_v56 = vld [vmem:[%s6578_s27] sm:$0xff]  ;;  %v6859_v58 = vld [vmem:[%s6578_s27 + $0x8] sm:$0xff]  ;;  %8942 = vst [vmem:[#allocation28_spill] sm:$0xff] %v6956_v24 }
  0x84   : > { %5559 = vmatprep.subr.bf16.mxu0 %v6653_v16  ;;  %5591 = vmatprep.subr.bf16.mxu1 %v6653_v16  ;;  %8925 = vst [vmem:[#allocation11_spill] sm:$0xff] %v6846_v56  ;;  %v6852_v57 = vld [vmem:[%s6849_s21] sm:$0xff]  ;;  %8927 = vst [vmem:[#allocation13_spill] sm:$0xff] %v6859_v58  ;;  %v6862_v59 = vld [vmem:[%s6849_s21 + $0x8] sm:$0xff] }
  0x85   : > { %8926 = vst [vmem:[#allocation12_spill] sm:$0xff] %v6852_v57  ;;  %8928 = vst [vmem:[#allocation14_spill] sm:$0xff] %v6862_v59  ;;  %v6877_v62 = vld [vmem:[%s6578_s27 + $0x10] sm:$0xff]  ;;  %v6887_v0 = vld [vmem:[%s6578_s27 + $0x18] sm:$0xff] }
  0x86   : > { %v6880_v63 = vld [vmem:[%s6849_s21 + $0x10] sm:$0xff]  ;;  %v6890_v1 = vld [vmem:[%s6849_s21 + $0x18] sm:$0xff]  ;;  %v6905_v6 = vld [vmem:[%s6578_s27 + $0x20] sm:$0xff]  ;;  %8945 = vst [vmem:[#allocation31_spill] sm:$0xff] %v6978_v4 }
  0x87   : > { %5561 = vmatpush3.bf16.msra.mxu0 %v6653_v16  ;;  %5593 = vmatpush3.bf16.msra.mxu1 %v6653_v16  ;;  %8931 = vst [vmem:[#allocation17_spill] sm:$0xff] %v6880_v63  ;;  %8932 = vst [vmem:[#allocation18_spill] sm:$0xff] %v6890_v1  ;;  %v6908_v7 = vld [vmem:[%s6849_s21 + $0x20] sm:$0xff]  ;;  %v6915_v11 = vld [vmem:[%s6578_s27 + $0x28] sm:$0xff] }
  0x88   : > { %5563 = vmatprep.subr.bf16.mxu0 %v6665_v19  ;;  %5595 = vmatprep.subr.bf16.mxu1 %v6665_v19  ;;  %8935 = vst [vmem:[#allocation21_spill] sm:$0xff] %v6908_v7  ;;  %v6918_v12 = vld [vmem:[%s6849_s21 + $0x28] sm:$0xff]  ;;  %v6933_v17 = vld [vmem:[%s6578_s27 + $0x30] sm:$0xff]  ;;  %v6943_v20 = vld [vmem:[%s6578_s27 + $0x38] sm:$0xff] }
  0x89   : > { %8936 = vst [vmem:[#allocation22_spill] sm:$0xff] %v6918_v12  ;;  %v6936_v18 = vld [vmem:[%s6849_s21 + $0x30] sm:$0xff]  ;;  %v6946_v21 = vld [vmem:[%s6849_s21 + $0x38] sm:$0xff]  ;;  %v6961_v15 = vld [vmem:[%s6578_s27 + $0x40] sm:$0xff] }
  0x8a   : > { %8939 = vst [vmem:[#allocation25_spill] sm:$0xff] %v6936_v18  ;;  %8940 = vst [vmem:[#allocation26_spill] sm:$0xff] %v6946_v21  ;;  %v6964_v14 = vld [vmem:[%s6849_s21 + $0x40] sm:$0xff]  ;;  %v6971_v24 = vld [vmem:[%s6578_s27 + $0x48] sm:$0xff] }
  0x8b   : > { %5565 = vmatpush3.bf16.msra.mxu0 %v6665_v19  ;;  %5597 = vmatpush3.bf16.msra.mxu1 %v6665_v19  ;;  %8943 = vst [vmem:[#allocation29_spill] sm:$0xff] %v6964_v14  ;;  %v6974_v23 = vld [vmem:[%s6849_s21 + $0x48] sm:$0xff]  ;;  %8946 = vst [vmem:[#allocation32_spill] sm:$0xff] %v6984_v2  ;;  %v6989_v61 = vld [vmem:[%s6578_s27 + $0x50] sm:$0xff] }
  0x8c   : > { %5567 = vmatprep.subr.bf16.mxu0 %v6677_v22  ;;  %5599 = vmatprep.subr.bf16.mxu1 %v6677_v22  ;;  %8944 = vst [vmem:[#allocation30_spill] sm:$0xff] %v6974_v23  ;;  %v6992_v60 = vld [vmem:[%s6849_s21 + $0x50] sm:$0xff]  ;;  %v6999_v2 = vld [vmem:[%s6578_s27 + $0x58] sm:$0xff] }
  0x8d   : > { %8947 = vst [vmem:[#allocation33_spill] sm:$0xff] %v6992_v60  ;;  %v7002_v4 = vld [vmem:[%s6849_s21 + $0x58] sm:$0xff] }
  0x8e   : > { %8948 = vst [vmem:[#allocation34_spill] sm:$0xff] %v7002_v4 }
  0x8f   : > { %5569 = vmatpush3.bf16.msra.mxu0 %v6677_v22  ;;  %5601 = vmatpush3.bf16.msra.mxu1 %v6677_v22 }
  0x90   : > { %5571 = vmatprep.subr.bf16.mxu0 %v6689_v25  ;;  %5603 = vmatprep.subr.bf16.mxu1 %v6689_v25 }
  0x93   : > { %5573 = vmatpush3.bf16.msra.mxu0 %v6689_v25  ;;  %5605 = vmatpush3.bf16.msra.mxu1 %v6689_v25 }
  0x94   : > { %5607 = vmatprep.subr.bf16.mxu0 %v6596_v3  ;;  %5639 = vmatprep.subr.bf16.mxu1 %v6596_v3 }
  0x96   : > { %4759 = vmatmul.mubr.f32.vlgmr.msra.gmra.mrb[0].mxu0 %v6698_v26  ;;  %4815 = vmatmul.mubr.f32.vlgmr.msra.gmra.mrb[0].mxu1 %v6701_v27 }
  0x97   : > { %5609 = vmatpush3.bf16.msra.mxu0 %v6596_v3  ;;  %5641 = vmatpush3.bf16.msra.mxu1 %v6596_v3 }
  0x98   : > { %4761 = vmatprep.mubr.f32.mxu0 %v6706_v28  ;;  %4817 = vmatprep.mubr.f32.mxu1 %v6709_v29 }
  0x99   : > { %5611 = vmatprep.subr.bf16.mxu0 %v6601_v5  ;;  %5643 = vmatprep.subr.bf16.mxu1 %v6601_v5 }
  0x9a   : > { %4762 = vmatmul.mubr.f32.gmra.mrb[2].mxu0 %v6716_v30  ;;  %4818 = vmatmul.mubr.f32.gmra.mrb[2].mxu1 %v6719_v31 }
  0x9b   : > { %5613 = vmatpush3.bf16.msra.mxu0 %v6601_v5  ;;  %5645 = vmatpush3.bf16.msra.mxu1 %v6601_v5 }
  0x9c   : > { %4764 = vmatprep.mubr.f32.mxu0 %v6726_v32  ;;  %4820 = vmatprep.mubr.f32.mxu1 %v6729_v33 }
  0x9d   : > { %5615 = vmatprep.subr.bf16.mxu0 %v6621_v8  ;;  %5647 = vmatprep.subr.bf16.mxu1 %v6621_v8 }
  0x9e   : > { %4765 = vmatmul.mubr.f32.gmra.mrb[4].mxu0 %v6736_v34  ;;  %4821 = vmatmul.mubr.f32.gmra.mrb[4].mxu1 %v6739_v35 }
  0x9f   : > { %5617 = vmatpush3.bf16.msra.mxu0 %v6621_v8  ;;  %5649 = vmatpush3.bf16.msra.mxu1 %v6621_v8 }
  0xa0   : > { %4767 = vmatprep.mubr.f32.mxu0 %v6746_v36  ;;  %4823 = vmatprep.mubr.f32.mxu1 %v6749_v37 }
  0xa1   : > { %5619 = vmatprep.subr.bf16.mxu0 %v6641_v13  ;;  %5651 = vmatprep.subr.bf16.mxu1 %v6641_v13 }
  0xa2   : > { %4768 = vmatmul.mubr.f32.gmra.mrb[6].mxu0 %v6756_v38  ;;  %4824 = vmatmul.mubr.f32.gmra.mrb[6].mxu1 %v6759_v39 }
  0xa3   : > { %5621 = vmatpush3.bf16.msra.mxu0 %v6641_v13  ;;  %5653 = vmatpush3.bf16.msra.mxu1 %v6641_v13 }
  0xa4   : > { %4770 = vmatprep.mubr.f32.mxu0 %v6766_v40  ;;  %4826 = vmatprep.mubr.f32.mxu1 %v6769_v41 }
  0xa5   : > { %5623 = vmatprep.subr.bf16.mxu0 %v6653_v16  ;;  %5655 = vmatprep.subr.bf16.mxu1 %v6653_v16 }
  0xa6   : > { %4771 = vmatmul.mubr.f32.gmra.mrb[8].mxu0 %v6776_v42  ;;  %4827 = vmatmul.mubr.f32.gmra.mrb[8].mxu1 %v6779_v43 }
  0xa7   : > { %5625 = vmatpush3.bf16.msra.mxu0 %v6653_v16  ;;  %5657 = vmatpush3.bf16.msra.mxu1 %v6653_v16 }
  0xa8   : > { %4773 = vmatprep.mubr.f32.mxu0 %v6786_v44  ;;  %4829 = vmatprep.mubr.f32.mxu1 %v6789_v45 }
  0xa9   : > { %5627 = vmatprep.subr.bf16.mxu0 %v6665_v19  ;;  %5659 = vmatprep.subr.bf16.mxu1 %v6665_v19 }
  0xaa   : > { %4774 = vmatmul.mubr.f32.gmra.mrb[10].mxu0 %v6796_v46  ;;  %4830 = vmatmul.mubr.f32.gmra.mrb[10].mxu1 %v6799_v47 }
  0xab   : > { %5629 = vmatpush3.bf16.msra.mxu0 %v6665_v19  ;;  %5661 = vmatpush3.bf16.msra.mxu1 %v6665_v19 }
  0xac   : > { %4776 = vmatprep.mubr.f32.mxu0 %v6806_v48  ;;  %4832 = vmatprep.mubr.f32.mxu1 %v6809_v49 }
  0xad   : > { %5631 = vmatprep.subr.bf16.mxu0 %v6677_v22  ;;  %5663 = vmatprep.subr.bf16.mxu1 %v6677_v22 }
  0xae   : > { %4777 = vmatmul.mubr.f32.gmra.mrb[12].mxu0 %v6816_v50  ;;  %4833 = vmatmul.mubr.f32.gmra.mrb[12].mxu1 %v6819_v51 }
  0xaf   : > { %5633 = vmatpush3.bf16.msra.mxu0 %v6677_v22  ;;  %5665 = vmatpush3.bf16.msra.mxu1 %v6677_v22 }
  0xb0   : > { %4779 = vmatprep.mubr.f32.mxu0 %v6826_v52  ;;  %4835 = vmatprep.mubr.f32.mxu1 %v6829_v53 }
  0xb1   : > { %5635 = vmatprep.subr.bf16.mxu0 %v6689_v25  ;;  %5667 = vmatprep.subr.bf16.mxu1 %v6689_v25 }
  0xb2   : > { %4780 = vmatmul.mubr.f32.gmra.mrb[14].mxu0 %v6836_v54  ;;  %4836 = vmatmul.mubr.f32.gmra.mrb[14].mxu1 %v6839_v55 }
  0xb3   : > { %5637 = vmatpush3.bf16.msra.mxu0 %v6689_v25  ;;  %5669 = vmatpush3.bf16.msra.mxu1 %v6689_v25 }
  0xb4   : > { %4870 = vmatprep.mubr.f32.mxu0 %v6846_v56  ;;  %4926 = vmatprep.mubr.f32.mxu1 %v6852_v57 }
  0xb5   : > { %5671 = vmatprep.subr.bf16.mxu0 %v6596_v3  ;;  %5703 = vmatprep.subr.bf16.mxu1 %v6596_v3 }
  0xb6   : > { %4871 = vmatmul.mubr.f32.vlgmr.msra.gmra.mrb[16].mxu0 %v6859_v58  ;;  %4927 = vmatmul.mubr.f32.vlgmr.msra.gmra.mrb[16].mxu1 %v6862_v59 }
  0xb7   : > { %5673 = vmatpush3.bf16.msra.mxu0 %v6596_v3  ;;  %5705 = vmatpush3.bf16.msra.mxu1 %v6596_v3 }
  0xb8   : > { %4873 = vmatprep.mubr.f32.mxu0 %v6877_v62  ;;  %4929 = vmatprep.mubr.f32.mxu1 %v6880_v63  ;;  %v1345_v63 = vmul.f32 %v6877_v62, %v6709_v29 }
  0xb9   : > { %5675 = vmatprep.subr.bf16.mxu0 %v6601_v5  ;;  %5707 = vmatprep.subr.bf16.mxu1 %v6601_v5 }
  0xba   : > { %4874 = vmatmul.mubr.f32.gmra.mrb[18].mxu0 %v6887_v0  ;;  %4930 = vmatmul.mubr.f32.gmra.mrb[18].mxu1 %v6890_v1  ;;  %v1343_v1 = vmul.f32 %v6846_v56, %v6627_v10 }
  0xbb   : > { %5677 = vmatpush3.bf16.msra.mxu0 %v6601_v5  ;;  %5709 = vmatpush3.bf16.msra.mxu1 %v6601_v5 }
  0xbc   : > { %4876 = vmatprep.mubr.f32.mxu0 %v6905_v6  ;;  %4932 = vmatprep.mubr.f32.mxu1 %v6908_v7  ;;  %v7048_v7 = vld [vmem:[%s6849_s21 + $0x70] sm:$0xff] }
  0xbd   : > { %5679 = vmatprep.subr.bf16.mxu0 %v6621_v8  ;;  %5711 = vmatprep.subr.bf16.mxu1 %v6621_v8  ;;  %8955 = vst [vmem:[#allocation41_spill] sm:$0xff] %v7048_v7 }
  0xbe   : > { %4877 = vmatmul.mubr.f32.gmra.mrb[20].mxu0 %v6915_v11  ;;  %4933 = vmatmul.mubr.f32.gmra.mrb[20].mxu1 %v6918_v12  ;;  %v7045_v12 = vld [vmem:[%s6578_s27 + $0x70] sm:$0xff] }
  0xbf   : > { %5681 = vmatpush3.bf16.msra.mxu0 %v6621_v8  ;;  %5713 = vmatpush3.bf16.msra.mxu1 %v6621_v8 }
  0xc0   : > { %4879 = vmatprep.mubr.f32.mxu0 %v6933_v17  ;;  %4935 = vmatprep.mubr.f32.mxu1 %v6936_v18  ;;  %v7020_v18 = vld [vmem:[%s6849_s21 + $0x60] sm:$0xff] }
  0xc1   : > { %5683 = vmatprep.subr.bf16.mxu0 %v6641_v13  ;;  %5715 = vmatprep.subr.bf16.mxu1 %v6641_v13  ;;  %8951 = vst [vmem:[#allocation37_spill] sm:$0xff] %v7020_v18 }
  0xc2   : > { %4880 = vmatmul.mubr.f32.gmra.mrb[22].mxu0 %v6943_v20  ;;  %4936 = vmatmul.mubr.f32.gmra.mrb[22].mxu1 %v6946_v21  ;;  %v7017_v21 = vld [vmem:[%s6578_s27 + $0x60] sm:$0xff] }
  0xc3   : > { %5685 = vmatpush3.bf16.msra.mxu0 %v6641_v13  ;;  %5717 = vmatpush3.bf16.msra.mxu1 %v6641_v13 }
  0xc4   : > { %4882 = vmatprep.mubr.f32.mxu0 %v6961_v15  ;;  %4938 = vmatprep.mubr.f32.mxu1 %v6964_v14  ;;  %v7006_v14 = vmul.f32 %v6789_v45, %v6786_v44 }
  0xc5   : > { %5687 = vmatprep.subr.bf16.mxu0 %v6653_v16  ;;  %5719 = vmatprep.subr.bf16.mxu1 %v6653_v16 }
  0xc6   : > { %4883 = vmatmul.mubr.f32.gmra.mrb[24].mxu0 %v6971_v24  ;;  %4939 = vmatmul.mubr.f32.gmra.mrb[24].mxu1 %v6974_v23  ;;  %8949 = vst [vmem:[#allocation35_spill] sm:$0xff] %v7006_v14  ;;  %v7012_v23 = vmul.f32 %v6799_v47, %v6796_v46  ;;  %v7030_v14 = vld [vmem:[%s6849_s21 + $0x68] sm:$0xff] }
  0xc7   : > { %5689 = vmatpush3.bf16.msra.mxu0 %v6653_v16  ;;  %5721 = vmatpush3.bf16.msra.mxu1 %v6653_v16  ;;  %8952 = vst [vmem:[#allocation38_spill] sm:$0xff] %v7030_v14 }
  0xc8   : > { %4885 = vmatprep.mubr.f32.mxu0 %v6989_v61  ;;  %4941 = vmatprep.mubr.f32.mxu1 %v6992_v60  ;;  %8950 = vst [vmem:[#allocation36_spill] sm:$0xff] %v7012_v23  ;;  %v7027_v23 = vld [vmem:[%s6578_s27 + $0x68] sm:$0xff]  ;;  %v7034_v60 = vmul.f32 %v6809_v49, %v6806_v48 }
  0xc9   : > { %5691 = vmatprep.subr.bf16.mxu0 %v6665_v19  ;;  %5723 = vmatprep.subr.bf16.mxu1 %v6665_v19 }
  0xca   : > { %4886 = vmatmul.mubr.f32.gmra.mrb[26].mxu0 %v6999_v2  ;;  %4942 = vmatmul.mubr.f32.gmra.mrb[26].mxu1 %v7002_v4  ;;  %8953 = vst [vmem:[#allocation39_spill] sm:$0xff] %v7034_v60  ;;  %v7040_v4 = vmul.f32 %v6819_v51, %v6816_v50  ;;  %v7055_v60 = vld [vmem:[%s6578_s27 + $0x78] sm:$0xff] }
  0xcb   : > { %5693 = vmatpush3.bf16.msra.mxu0 %v6665_v19  ;;  %5725 = vmatpush3.bf16.msra.mxu1 %v6665_v19 }
  0xcc   : > { %4888 = vmatprep.mubr.f32.mxu0 %v7017_v21  ;;  %4944 = vmatprep.mubr.f32.mxu1 %v7020_v18  ;;  %8954 = vst [vmem:[#allocation40_spill] sm:$0xff] %v7040_v4  ;;  %v7058_v18 = vld [vmem:[%s6849_s21 + $0x78] sm:$0xff]  ;;  %v1146_v4 = vmul.f32 %v6846_v56, %v6624_v9  ;;  %v1148_v56 = vmul.f32 %v6877_v62, %v6706_v28  ;;  %s9116_s21 = sld [smem:[#allocation52_spill]] }
  0xcd   : > { %5695 = vmatprep.subr.bf16.mxu0 %v6677_v22  ;;  %5727 = vmatprep.subr.bf16.mxu1 %v6677_v22  ;;  %8956 = vst [vmem:[#allocation42_spill] sm:$0xff] %v7058_v18 }
  0xce   : > { %4889 = vmatmul.mubr.f32.gmra.mrb[28].mxu0 %v7027_v23  ;;  %4945 = vmatmul.mubr.f32.gmra.mrb[28].mxu1 %v7030_v14  ;;  %v1147_v14 = vmul.f32 %v6859_v58, %v6698_v26 }
  0xcf   : > { %5697 = vmatpush3.bf16.msra.mxu0 %v6677_v22  ;;  %5729 = vmatpush3.bf16.msra.mxu1 %v6677_v22 }
  0xd0   : > { %4891 = vmatprep.mubr.f32.mxu0 %v7045_v12  ;;  %4947 = vmatprep.mubr.f32.mxu1 %v7048_v7  ;;  %v1344_v7 = vmul.f32 %v6859_v58, %v6701_v27  ;;  %v1149_v58 = vmul.f32 %v6887_v0, %v6716_v30 }
  0xd1   : > { %5699 = vmatprep.subr.bf16.mxu0 %v6689_v25  ;;  %5731 = vmatprep.subr.bf16.mxu1 %v6689_v25 }
  0xd2   : > { %4892 = vmatmul.mubr.f32.gmra.mrb[30].mxu0 %v7055_v60  ;;  %4948 = vmatmul.mubr.f32.gmra.mrb[30].mxu1 %v7058_v18  ;;  %v1346_v18 = vmul.f32 %v6887_v0, %v6719_v31 }
  0xd3   : > { %5701 = vmatpush3.bf16.msra.mxu0 %v6689_v25  ;;  %5733 = vmatpush3.bf16.msra.mxu1 %v6689_v25 }
  0xd4   : > { %4982 = vmatprep.mubr.f32.mxu0 %v1146_v4  ;;  %5038 = vmatprep.mubr.f32.mxu1 %v1343_v1  ;;  %v1150_v1 = vmul.f32 %v6905_v6, %v6726_v32  ;;  %v1347_v4 = vmul.f32 %v6905_v6, %v6729_v33 }
  0xd5   : > { %5735 = vmatprep.subr.bf16.mxu1 %v6596_v3  ;;  %5767 = vmatprep.subr.bf16.mxu0 %v6596_v3 }
  0xd6   : > { %4983 = vmatmul.mubr.f32.vlgmr.msra.gmra.mrb[32].mxu0 %v1147_v14  ;;  %5039 = vmatmul.mubr.f32.vlgmr.msra.gmra.mrb[32].mxu1 %v1344_v7  ;;  %v1151_v7 = vmul.f32 %v6915_v11, %v6736_v34  ;;  %v1348_v14 = vmul.f32 %v6915_v11, %v6739_v35 }
  0xd7   : > { %5737 = vmatpush3.bf16.msra.mxu1 %v6596_v3  ;;  %5769 = vmatpush3.bf16.msra.mxu0 %v6596_v3 }
  0xd8   : > { %4985 = vmatprep.mubr.f32.mxu0 %v1148_v56  ;;  %5041 = vmatprep.mubr.f32.mxu1 %v1345_v63  ;;  %v1152_v56 = vmul.f32 %v6933_v17, %v6746_v36  ;;  %v1349_v63 = vmul.f32 %v6933_v17, %v6749_v37 }
  0xd9   : > { %5739 = vmatprep.subr.bf16.mxu1 %v6601_v5  ;;  %5771 = vmatprep.subr.bf16.mxu0 %v6601_v5 }
  0xda   : > { %4986 = vmatmul.mubr.f32.gmra.mrb[34].mxu0 %v1149_v58  ;;  %5042 = vmatmul.mubr.f32.gmra.mrb[34].mxu1 %v1346_v18  ;;  %v1153_v58 = vmul.f32 %v6943_v20, %v6756_v38  ;;  %v1350_v18 = vmul.f32 %v6943_v20, %v6759_v39 }
  0xdb   : > { %5741 = vmatpush3.bf16.msra.mxu1 %v6601_v5  ;;  %5773 = vmatpush3.bf16.msra.mxu0 %v6601_v5 }
  0xdc   : > { %4988 = vmatprep.mubr.f32.mxu0 %v1150_v1  ;;  %5044 = vmatprep.mubr.f32.mxu1 %v1347_v4  ;;  %v1154_v1 = vmul.f32 %v6961_v15, %v6766_v40  ;;  %v1351_v4 = vmul.f32 %v6961_v15, %v6769_v41 }
  0xdd   : > { %5743 = vmatprep.subr.bf16.mxu1 %v6621_v8  ;;  %5775 = vmatprep.subr.bf16.mxu0 %v6621_v8 }
  0xde   : > { %4989 = vmatmul.mubr.f32.gmra.mrb[36].mxu0 %v1151_v7  ;;  %5045 = vmatmul.mubr.f32.gmra.mrb[36].mxu1 %v1348_v14  ;;  %v1155_v7 = vmul.f32 %v6971_v24, %v6776_v42  ;;  %v1352_v14 = vmul.f32 %v6971_v24, %v6779_v43 }
  0xdf   : > { %5745 = vmatpush3.bf16.msra.mxu1 %v6621_v8  ;;  %5777 = vmatpush3.bf16.msra.mxu0 %v6621_v8 }
  0xe0   : > { %4991 = vmatprep.mubr.f32.mxu0 %v1152_v56  ;;  %5047 = vmatprep.mubr.f32.mxu1 %v1349_v63  ;;  %v1156_v56 = vmul.f32 %v6989_v61, %v6786_v44  ;;  %v1353_v63 = vmul.f32 %v6989_v61, %v6789_v45 }
  0xe1   : > { %5747 = vmatprep.subr.bf16.mxu1 %v6641_v13  ;;  %5779 = vmatprep.subr.bf16.mxu0 %v6641_v13 }
  0xe2   : > { %4992 = vmatmul.mubr.f32.gmra.mrb[38].mxu0 %v1153_v58  ;;  %5048 = vmatmul.mubr.f32.gmra.mrb[38].mxu1 %v1350_v18  ;;  %v1157_v58 = vmul.f32 %v6999_v2, %v6796_v46  ;;  %v1354_v18 = vmul.f32 %v6999_v2, %v6799_v47 }
  0xe3   : > { %5749 = vmatpush3.bf16.msra.mxu1 %v6641_v13  ;;  %5781 = vmatpush3.bf16.msra.mxu0 %v6641_v13 }
  0xe4   : > { %4994 = vmatprep.mubr.f32.mxu0 %v1154_v1  ;;  %5050 = vmatprep.mubr.f32.mxu1 %v1351_v4  ;;  %v1158_v1 = vmul.f32 %v7017_v21, %v6806_v48  ;;  %v1355_v4 = vmul.f32 %v7017_v21, %v6809_v49 }
  0xe5   : > { %5751 = vmatprep.subr.bf16.mxu1 %v6653_v16  ;;  %5783 = vmatprep.subr.bf16.mxu0 %v6653_v16 }
  0xe6   : > { %4995 = vmatmul.mubr.f32.gmra.mrb[40].mxu0 %v1155_v7  ;;  %5051 = vmatmul.mubr.f32.gmra.mrb[40].mxu1 %v1352_v14  ;;  %v1159_v7 = vmul.f32 %v7027_v23, %v6816_v50  ;;  %v1356_v14 = vmul.f32 %v7027_v23, %v6819_v51 }
  0xe7   : > { %5753 = vmatpush3.bf16.msra.mxu1 %v6653_v16  ;;  %5785 = vmatpush3.bf16.msra.mxu0 %v6653_v16 }
  0xe8   : > { %4997 = vmatprep.mubr.f32.mxu0 %v1156_v56  ;;  %5053 = vmatprep.mubr.f32.mxu1 %v1353_v63  ;;  %v1160_v56 = vmul.f32 %v7045_v12, %v6826_v52  ;;  %v1357_v63 = vmul.f32 %v7045_v12, %v6829_v53 }
  0xe9   : > { %5755 = vmatprep.subr.bf16.mxu1 %v6665_v19  ;;  %5787 = vmatprep.subr.bf16.mxu0 %v6665_v19 }
  0xea   : > { %4998 = vmatmul.mubr.f32.gmra.mrb[42].mxu0 %v1157_v58  ;;  %5054 = vmatmul.mubr.f32.gmra.mrb[42].mxu1 %v1354_v18  ;;  %v1161_v58 = vmul.f32 %v7055_v60, %v6836_v54  ;;  %v1358_v18 = vmul.f32 %v7055_v60, %v6839_v55 }
  0xeb   : > { %5757 = vmatpush3.bf16.msra.mxu1 %v6665_v19  ;;  %5789 = vmatpush3.bf16.msra.mxu0 %v6665_v19 }
  0xec   : > { %5000 = vmatprep.mubr.f32.mxu0 %v1158_v1  ;;  %5056 = vmatprep.mubr.f32.mxu1 %v1355_v4  ;;  %v1327_v1 = vmul.f32 %v6852_v57, %v6624_v9  ;;  %v1685_v4 = vmul.f32 %v6852_v57, %v6627_v10 }
  0xed   : > { %5759 = vmatprep.subr.bf16.mxu1 %v6677_v22  ;;  %5791 = vmatprep.subr.bf16.mxu0 %v6677_v22 }
  0xee   : > { %5001 = vmatmul.mubr.f32.gmra.mrb[44].mxu0 %v1159_v7  ;;  %5057 = vmatmul.mubr.f32.gmra.mrb[44].mxu1 %v1356_v14  ;;  %v1328_v7 = vmul.f32 %v6862_v59, %v6698_v26  ;;  %v1686_v14 = vmul.f32 %v6862_v59, %v6701_v27 }
  0xef   : > { %5761 = vmatpush3.bf16.msra.mxu1 %v6677_v22  ;;  %5793 = vmatpush3.bf16.msra.mxu0 %v6677_v22 }
  0xf0   : > { %5003 = vmatprep.mubr.f32.mxu0 %v1160_v56  ;;  %5059 = vmatprep.mubr.f32.mxu1 %v1357_v63  ;;  %v8957_v56 = vld [vmem:[#allocation17_spill] sm:$0xff] }
  0xf1   : > { %5763 = vmatprep.subr.bf16.mxu1 %v6689_v25  ;;  %5795 = vmatprep.subr.bf16.mxu0 %v6689_v25  ;;  %v1329_v63 = vmul.f32 %v8957_v56, %v6706_v28  ;;  %v1687_v57 = vmul.f32 %v8957_v56, %v6709_v29 }
  0xf2   : > { %5004 = vmatmul.mubr.f32.gmra.mrb[46].mxu0 %v1161_v58  ;;  %5060 = vmatmul.mubr.f32.gmra.mrb[46].mxu1 %v1358_v18  ;;  %v8958_v58 = vld [vmem:[#allocation18_spill] sm:$0xff] }
  0xf3   : > { %5765 = vmatpush3.bf16.msra.mxu1 %v6689_v25  ;;  %5797 = vmatpush3.bf16.msra.mxu0 %v6689_v25  ;;  %v1330_v18 = vmul.f32 %v8958_v58, %v6716_v30  ;;  %v1688_v59 = vmul.f32 %v8958_v58, %v6719_v31 }
  0xf4   : > { %5094 = vmatprep.mubr.f32.mxu1 %v1327_v1  ;;  %5150 = vmatprep.mubr.f32.mxu0 %v1685_v4  ;;  %v8959_v1 = vld [vmem:[#allocation21_spill] sm:$0xff] }
  0xf5   : > { %5799 = vmatprep.subr.bf16.mxu0 %v6596_v3  ;;  %5831 = vmatprep.subr.bf16.mxu1 %v6596_v3  ;;  %v1331_v4 = vmul.f32 %v8959_v1, %v6726_v32  ;;  %v1689_v56 = vmul.f32 %v8959_v1, %v6729_v33 }
  0xf6   : > { %5095 = vmatmul.mubr.f32.vlgmr.msra.gmra.mrb[32].mxu1 %v1328_v7  ;;  %5151 = vmatmul.mubr.f32.vlgmr.msra.gmra.mrb[48].mxu0 %v1686_v14  ;;  %v8960_v7 = vld [vmem:[#allocation22_spill] sm:$0xff] }
  0xf7   : > { %5801 = vmatpush3.bf16.msra.mxu0 %v6596_v3  ;;  %5833 = vmatpush3.bf16.msra.mxu1 %v6596_v3  ;;  %v1332_v14 = vmul.f32 %v8960_v7, %v6736_v34  ;;  %v1690_v58 = vmul.f32 %v8960_v7, %v6739_v35 }
  0xf8   : > { %5097 = vmatprep.mubr.f32.mxu1 %v1329_v63  ;;  %5153 = vmatprep.mubr.f32.mxu0 %v1687_v57  ;;  %v8961_v57 = vld [vmem:[#allocation25_spill] sm:$0xff] }
  0xf9   : > { %5803 = vmatprep.subr.bf16.mxu0 %v6601_v5  ;;  %5835 = vmatprep.subr.bf16.mxu1 %v6601_v5  ;;  %v1333_v63 = vmul.f32 %v8961_v57, %v6746_v36  ;;  %v1691_v1 = vmul.f32 %v8961_v57, %v6749_v37 }
  0xfa   : > { %5098 = vmatmul.mubr.f32.gmra.mrb[34].mxu1 %v1330_v18  ;;  %5154 = vmatmul.mubr.f32.gmra.mrb[50].mxu0 %v1688_v59  ;;  %v8962_v59 = vld [vmem:[#allocation26_spill] sm:$0xff] }
  0xfb   : > { %5805 = vmatpush3.bf16.msra.mxu0 %v6601_v5  ;;  %5837 = vmatpush3.bf16.msra.mxu1 %v6601_v5  ;;  %v1334_v18 = vmul.f32 %v8962_v59, %v6756_v38  ;;  %v1692_v7 = vmul.f32 %v8962_v59, %v6759_v39 }
  0xfc   : > { %5100 = vmatprep.mubr.f32.mxu1 %v1331_v4  ;;  %5156 = vmatprep.mubr.f32.mxu0 %v1689_v56  ;;  %v8963_v56 = vld [vmem:[#allocation29_spill] sm:$0xff] }
  0xfd   : > { %5807 = vmatprep.subr.bf16.mxu0 %v6621_v8  ;;  %5839 = vmatprep.subr.bf16.mxu1 %v6621_v8  ;;  %v1335_v4 = vmul.f32 %v8963_v56, %v6766_v40  ;;  %v1693_v57 = vmul.f32 %v8963_v56, %v6769_v41 }
  0xfe   : > { %5101 = vmatmul.mubr.f32.gmra.mrb[36].mxu1 %v1332_v14  ;;  %5157 = vmatmul.mubr.f32.gmra.mrb[52].mxu0 %v1690_v58  ;;  %v8964_v58 = vld [vmem:[#allocation30_spill] sm:$0xff] }
  0xff   : > { %5809 = vmatpush3.bf16.msra.mxu0 %v6621_v8  ;;  %5841 = vmatpush3.bf16.msra.mxu1 %v6621_v8  ;;  %v1336_v14 = vmul.f32 %v8964_v58, %v6776_v42  ;;  %v1694_v59 = vmul.f32 %v8964_v58, %v6779_v43 }
 0x100   : > { %5103 = vmatprep.mubr.f32.mxu1 %v1333_v63  ;;  %5159 = vmatprep.mubr.f32.mxu0 %v1691_v1  ;;  %v8965_v1 = vld [vmem:[#allocation33_spill] sm:$0xff] }
 0x101   : > { %5811 = vmatprep.subr.bf16.mxu0 %v6641_v13  ;;  %5843 = vmatprep.subr.bf16.mxu1 %v6641_v13  ;;  %v1337_v63 = vmul.f32 %v8965_v1, %v6786_v44  ;;  %v1695_v56 = vmul.f32 %v8965_v1, %v6789_v45 }
 0x102   : > { %5104 = vmatmul.mubr.f32.gmra.mrb[38].mxu1 %v1334_v18  ;;  %5160 = vmatmul.mubr.f32.gmra.mrb[54].mxu0 %v1692_v7  ;;  %v8966_v7 = vld [vmem:[#allocation34_spill] sm:$0xff] }
 0x103   : > { %5813 = vmatpush3.bf16.msra.mxu0 %v6641_v13  ;;  %5845 = vmatpush3.bf16.msra.mxu1 %v6641_v13  ;;  %v1338_v18 = vmul.f32 %v8966_v7, %v6796_v46  ;;  %v1696_v58 = vmul.f32 %v8966_v7, %v6799_v47 }
 0x104   : > { %5106 = vmatprep.mubr.f32.mxu1 %v1335_v4  ;;  %5162 = vmatprep.mubr.f32.mxu0 %v1693_v57  ;;  %v8967_v57 = vld [vmem:[#allocation37_spill] sm:$0xff] }
 0x105   : > { %5815 = vmatprep.subr.bf16.mxu0 %v6653_v16  ;;  %5847 = vmatprep.subr.bf16.mxu1 %v6653_v16  ;;  %v1339_v4 = vmul.f32 %v8967_v57, %v6806_v48  ;;  %v1697_v1 = vmul.f32 %v8967_v57, %v6809_v49 }
 0x106   : > { %5107 = vmatmul.mubr.f32.gmra.mrb[40].mxu1 %v1336_v14  ;;  %5163 = vmatmul.mubr.f32.gmra.mrb[56].mxu0 %v1694_v59  ;;  %v8968_v59 = vld [vmem:[#allocation38_spill] sm:$0xff] }
 0x107   : > { %5817 = vmatpush3.bf16.msra.mxu0 %v6653_v16  ;;  %5849 = vmatpush3.bf16.msra.mxu1 %v6653_v16  ;;  %v1340_v14 = vmul.f32 %v8968_v59, %v6816_v50  ;;  %v1698_v7 = vmul.f32 %v8968_v59, %v6819_v51 }
 0x108   : > { %5109 = vmatprep.mubr.f32.mxu1 %v1337_v63  ;;  %5165 = vmatprep.mubr.f32.mxu0 %v1695_v56  ;;  %v8969_v56 = vld [vmem:[#allocation41_spill] sm:$0xff] }
 0x109   : > { %5819 = vmatprep.subr.bf16.mxu0 %v6665_v19  ;;  %5851 = vmatprep.subr.bf16.mxu1 %v6665_v19  ;;  %v1341_v63 = vmul.f32 %v8969_v56, %v6826_v52  ;;  %v1699_v57 = vmul.f32 %v8969_v56, %v6829_v53 }
 0x10a   : > { %5110 = vmatmul.mubr.f32.gmra.mrb[42].mxu1 %v1338_v18  ;;  %5166 = vmatmul.mubr.f32.gmra.mrb[58].mxu0 %v1696_v58  ;;  %v8970_v58 = vld [vmem:[#allocation42_spill] sm:$0xff] }
 0x10b   : > { %5821 = vmatpush3.bf16.msra.mxu0 %v6665_v19  ;;  %5853 = vmatpush3.bf16.msra.mxu1 %v6665_v19  ;;  %v1342_v18 = vmul.f32 %v8970_v58, %v6836_v54  ;;  %v1700_v59 = vmul.f32 %v8970_v58, %v6839_v55 }
 0x10c   : > { %5112 = vmatprep.mubr.f32.mxu1 %v1339_v4  ;;  %5168 = vmatprep.mubr.f32.mxu0 %v1697_v1  ;;  %v2006_v1 = vmul.f32 %v6624_v9, %v6624_v9  ;;  %v2183_v4 = vmul.f32 %v6627_v10, %v6627_v10  ;;  %v2008_v9 = vmul.f32 %v6706_v28, %v6706_v28 }
 0x10d   : > { %5823 = vmatprep.subr.bf16.mxu0 %v6677_v22  ;;  %5855 = vmatprep.subr.bf16.mxu1 %v6677_v22  ;;  %v2185_v10 = vmul.f32 %v6709_v29, %v6709_v29  ;;  %v2010_v28 = vmul.f32 %v6726_v32, %v6726_v32  ;;  %v2187_v29 = vmul.f32 %v6729_v33, %v6729_v33 }
 0x10e   : > { %5113 = vmatmul.mubr.f32.gmra.mrb[44].mxu1 %v1340_v14  ;;  %5169 = vmatmul.mubr.f32.gmra.mrb[60].mxu0 %v1698_v7  ;;  %v2007_v7 = vmul.f32 %v6698_v26, %v6698_v26  ;;  %v2184_v14 = vmul.f32 %v6701_v27, %v6701_v27  ;;  %v2009_v26 = vmul.f32 %v6716_v30, %v6716_v30 }
 0x10f   : > { %5825 = vmatpush3.bf16.msra.mxu0 %v6677_v22  ;;  %5857 = vmatpush3.bf16.msra.mxu1 %v6677_v22  ;;  %v2186_v27 = vmul.f32 %v6719_v31, %v6719_v31  ;;  %v2011_v30 = vmul.f32 %v6736_v34, %v6736_v34  ;;  %v2188_v31 = vmul.f32 %v6739_v35, %v6739_v35 }
 0x110   : > { %5115 = vmatprep.mubr.f32.mxu1 %v1341_v63  ;;  %5171 = vmatprep.mubr.f32.mxu0 %v1699_v57  ;;  %v2012_v32 = vmul.f32 %v6746_v36, %v6746_v36  ;;  %v2189_v33 = vmul.f32 %v6749_v37, %v6749_v37  ;;  %v2013_v34 = vmul.f32 %v6756_v38, %v6756_v38  ;;  %v8971_v57 = vld [vmem:[#allocation11_spill] sm:$0xff] }
 0x111   : > { %5827 = vmatprep.subr.bf16.mxu0 %v6689_v25  ;;  %5859 = vmatprep.subr.bf16.mxu1 %v6689_v25  ;;  %v2190_v35 = vmul.f32 %v6759_v39, %v6759_v39  ;;  %v2014_v36 = vmul.f32 %v6766_v40, %v6766_v40  ;;  %v2191_v37 = vmul.f32 %v6769_v41, %v6769_v41  ;;  %v8972_v63 = vld [vmem:[#allocation15_spill] sm:$0xff] }
 0x112   : > { %5116 = vmatmul.mubr.f32.gmra.mrb[46].mxu1 %v1342_v18  ;;  %5172 = vmatmul.mubr.f32.gmra.mrb[62].mxu0 %v1700_v59  ;;  %v2015_v38 = vmul.f32 %v6776_v42, %v6776_v42  ;;  %v2192_v39 = vmul.f32 %v6779_v43, %v6779_v43  ;;  %v2016_v40 = vmul.f32 %v6786_v44, %v6786_v44  ;;  %v8973_v18 = vld [vmem:[#allocation13_spill] sm:$0xff] }
 0x113   : > { %5829 = vmatpush3.bf16.msra.mxu0 %v6689_v25  ;;  %5861 = vmatpush3.bf16.msra.mxu1 %v6689_v25  ;;  %v2193_v41 = vmul.f32 %v6789_v45, %v6789_v45  ;;  %v2017_v42 = vmul.f32 %v6796_v46, %v6796_v46  ;;  %v2194_v43 = vmul.f32 %v6799_v47, %v6799_v47 }
 0x114   : > { %5206 = vmatprep.mubr.f32.mxu0 %v2006_v1  ;;  %5262 = vmatprep.mubr.f32.mxu1 %v2183_v4  ;;  %v2018_v44 = vmul.f32 %v6806_v48, %v6806_v48  ;;  %v2195_v45 = vmul.f32 %v6809_v49, %v6809_v49  ;;  %v2019_v46 = vmul.f32 %v6816_v50, %v6816_v50 }
 0x115   : > { %5863 = vmatprep.subr.bf16.mxu0 %v6596_v3  ;;  %5895 = vmatprep.subr.bf16.mxu1 %v6596_v3  ;;  %v2196_v47 = vmul.f32 %v6819_v51, %v6819_v51  ;;  %v2020_v48 = vmul.f32 %v6826_v52, %v6826_v52  ;;  %v2197_v49 = vmul.f32 %v6829_v53, %v6829_v53 }
 0x116   : > { %5207 = vmatmul.mubr.f32.vlgmr.msra.gmra.mrb[64].mxu0 %v2007_v7  ;;  %5263 = vmatmul.mubr.f32.vlgmr.msra.gmra.mrb[48].mxu1 %v2184_v14  ;;  %v2021_v50 = vmul.f32 %v6836_v54, %v6836_v54  ;;  %v2198_v51 = vmul.f32 %v6839_v55, %v6839_v55  ;;  %v2670_v59 = vmul.f32 %v8971_v57, %v8971_v57  ;;  %v8974_v7 = vld [vmem:[#allocation16_spill] sm:$0xff] }
 0x117   : > { %5865 = vmatpush3.bf16.msra.mxu0 %v6596_v3  ;;  %5209 = vmatprep.mubr.f32.mxu0 %v2008_v9  ;;  %v2671_v1 = vmul.f32 %v8973_v18, %v8973_v18  ;;  %v2672_v4 = vmul.f32 %v6877_v62, %v6877_v62  ;;  %v2673_v14 = vmul.f32 %v6887_v0, %v6887_v0  ;;  %v8975_v9 = vld [vmem:[#allocation19_spill] sm:$0xff] }
 0x118   : > { %5265 = vmatprep.mubr.f32.mxu1 %v2185_v10  ;;  %5897 = vmatpush3.bf16.msra.mxu1 %v6596_v3  ;;  %v2674_v10 = vmul.f32 %v6905_v6, %v6905_v6 }
 0x119   : > { %5867 = vmatprep.subr.bf16.mxu0 %v6601_v5  ;;  %5899 = vmatprep.subr.bf16.mxu1 %v6601_v5 }
 0x11a   : > { %5210 = vmatmul.mubr.f32.gmra.mrb[66].mxu0 %v2009_v26  ;;  %5266 = vmatmul.mubr.f32.gmra.mrb[50].mxu1 %v2186_v27  ;;  %v8976_v26 = vld [vmem:[#allocation20_spill] sm:$0xff]  ;;  %v2675_v27 = vmul.f32 %v6915_v11, %v6915_v11 }
 0x11b   : > { %5869 = vmatpush3.bf16.msra.mxu0 %v6601_v5  ;;  %5212 = vmatprep.mubr.f32.mxu0 %v2010_v28  ;;  %v8977_v28 = vld [vmem:[#allocation23_spill] sm:$0xff] }
 0x11c   : > { %5268 = vmatprep.mubr.f32.mxu1 %v2187_v29  ;;  %5901 = vmatpush3.bf16.msra.mxu1 %v6601_v5  ;;  %v8978_v29 = vld [vmem:[#allocation24_spill] sm:$0xff] }
 0x11d   : > { %5871 = vmatprep.subr.bf16.mxu0 %v6621_v8  ;;  %5903 = vmatprep.subr.bf16.mxu1 %v6621_v8 }
 0x11e   : > { %5213 = vmatmul.mubr.f32.gmra.mrb[68].mxu0 %v2011_v30  ;;  %5269 = vmatmul.mubr.f32.gmra.mrb[52].mxu1 %v2188_v31  ;;  %v2677_v30 = vmul.f32 %v6943_v20, %v6943_v20  ;;  %v8979_v31 = vld [vmem:[#allocation27_spill] sm:$0xff] }
 0x11f   : > { %5873 = vmatpush3.bf16.msra.mxu0 %v6621_v8  ;;  %5215 = vmatprep.mubr.f32.mxu0 %v2012_v32  ;;  %v8980_v32 = vld [vmem:[#allocation28_spill] sm:$0xff] }
 0x120   : > { %5271 = vmatprep.mubr.f32.mxu1 %v2189_v33  ;;  %5905 = vmatpush3.bf16.msra.mxu1 %v6621_v8  ;;  %v2679_v33 = vmul.f32 %v6971_v24, %v6971_v24 }
 0x121   : > { %5875 = vmatprep.subr.bf16.mxu0 %v6641_v13  ;;  %5907 = vmatprep.subr.bf16.mxu1 %v6641_v13 }
 0x122   : > { %5216 = vmatmul.mubr.f32.gmra.mrb[70].mxu0 %v2013_v34  ;;  %5272 = vmatmul.mubr.f32.gmra.mrb[54].mxu1 %v2190_v35  ;;  %v8981_v34 = vld [vmem:[#allocation31_spill] sm:$0xff]  ;;  %v8982_v35 = vld [vmem:[#allocation32_spill] sm:$0xff] }
 0x123   : > { %5877 = vmatpush3.bf16.msra.mxu0 %v6641_v13  ;;  %5218 = vmatprep.mubr.f32.mxu0 %v2014_v36  ;;  %v2681_v36 = vmul.f32 %v6999_v2, %v6999_v2 }
 0x124   : > { %5274 = vmatprep.mubr.f32.mxu1 %v2191_v37  ;;  %5909 = vmatpush3.bf16.msra.mxu1 %v6641_v13  ;;  %v8983_v37 = vld [vmem:[#allocation35_spill] sm:$0xff] }
 0x125   : > { %5879 = vmatprep.subr.bf16.mxu0 %v6653_v16  ;;  %5911 = vmatprep.subr.bf16.mxu1 %v6653_v16 }
 0x126   : > { %5219 = vmatmul.mubr.f32.gmra.mrb[72].mxu0 %v2015_v38  ;;  %5275 = vmatmul.mubr.f32.gmra.mrb[56].mxu1 %v2192_v39  ;;  %v8984_v38 = vld [vmem:[#allocation36_spill] sm:$0xff]  ;;  %v2683_v39 = vmul.f32 %v7027_v23, %v7027_v23 }
 0x127   : > { %5881 = vmatpush3.bf16.msra.mxu0 %v6653_v16  ;;  %5221 = vmatprep.mubr.f32.mxu0 %v2016_v40  ;;  %v8985_v40 = vld [vmem:[#allocation39_spill] sm:$0xff] }
 0x128   : > { %5277 = vmatprep.mubr.f32.mxu1 %v2193_v41  ;;  %5913 = vmatpush3.bf16.msra.mxu1 %v6653_v16  ;;  %v2684_v41 = vmul.f32 %v7045_v12, %v7045_v12 }
 0x129   : > { %5883 = vmatprep.subr.bf16.mxu0 %v6665_v19  ;;  %5915 = vmatprep.subr.bf16.mxu1 %v6665_v19 }
 0x12a   : > { %5222 = vmatmul.mubr.f32.gmra.mrb[74].mxu0 %v2017_v42  ;;  %5278 = vmatmul.mubr.f32.gmra.mrb[58].mxu1 %v2194_v43  ;;  %v8986_v42 = vld [vmem:[#allocation40_spill] sm:$0xff]  ;;  %v2392_v43 = vmul.f32 %v6839_v55, %v6836_v54  ;;  %v8988_v54 = vld [vmem:[#allocation14_spill] sm:$0xff] }
 0x12b   : > { %5885 = vmatpush3.bf16.msra.mxu0 %v6665_v19  ;;  %5224 = vmatprep.mubr.f32.mxu0 %v2018_v44  ;;  %v2848_v55 = vmul.f32 %v8988_v54, %v8988_v54 }
 0x12c   : > { %5280 = vmatprep.mubr.f32.mxu1 %v2195_v45  ;;  %5917 = vmatpush3.bf16.msra.mxu1 %v6665_v19  ;;  %v8989_v45 = vld [vmem:[#allocation17_spill] sm:$0xff] }
 0x12d   : > { %5887 = vmatprep.subr.bf16.mxu0 %v6677_v22  ;;  %5919 = vmatprep.subr.bf16.mxu1 %v6677_v22 }
 0x12e   : > { %5225 = vmatmul.mubr.f32.gmra.mrb[76].mxu0 %v2019_v46  ;;  %5281 = vmatmul.mubr.f32.gmra.mrb[60].mxu1 %v2196_v47  ;;  %v2849_v46 = vmul.f32 %v8989_v45, %v8989_v45  ;;  %v3042_v47 = vmul.f32 %v8989_v45, %v6877_v62 }
 0x12f   : > { %5889 = vmatpush3.bf16.msra.mxu0 %v6677_v22  ;;  %5227 = vmatprep.mubr.f32.mxu0 %v2020_v48  ;;  %v8990_v48 = vld [vmem:[#allocation18_spill] sm:$0xff] }
 0x130   : > { %5283 = vmatprep.mubr.f32.mxu1 %v2197_v49  ;;  %5921 = vmatpush3.bf16.msra.mxu1 %v6677_v22  ;;  %v2850_v49 = vmul.f32 %v8990_v48, %v8990_v48 }
 0x131   : > { %5891 = vmatprep.subr.bf16.mxu0 %v6689_v25  ;;  %5923 = vmatprep.subr.bf16.mxu1 %v6689_v25 }
 0x132   : > { %5228 = vmatmul.mubr.f32.gmra.mrb[78].mxu0 %v2021_v50  ;;  %5284 = vmatmul.mubr.f32.gmra.mrb[62].mxu1 %v2198_v51  ;;  %v3043_v50 = vmul.f32 %v8990_v48, %v6887_v0  ;;  %v8991_v51 = vld [vmem:[#allocation21_spill] sm:$0xff] }
 0x133   : > { %5893 = vmatpush3.bf16.msra.mxu0 %v6689_v25  ;;  %5318 = vmatprep.mubr.f32.mxu0 %v8972_v63 }
 0x134   : > { %5925 = vmatpush3.bf16.msra.mxu1 %v6689_v25  ;;  %5927 = vmatprep.subr.bf16.mxu0 %v6596_v3 }
 0x135   : > { %5374 = vmatprep.mubr.f32.mxu1 %v2670_v59  ;;  %5959 = vmatprep.subr.bf16.mxu1 %v6596_v3  ;;  %v8992_v59 = vld [vmem:[#allocation22_spill] sm:$0xff] }
 0x136   : > { %5319 = vmatmul.mubr.f32.vlgmr.msra.gmra.mrb[80].mxu0 %v8974_v7  ;;  %v2852_v62 = vmul.f32 %v8992_v59, %v8992_v59  ;;  %v3045_v63 = vmul.f32 %v8992_v59, %v6915_v11 }
 0x137   : > { %5929 = vmatpush3.bf16.msra.mxu0 %v6596_v3  ;;  %5375 = vmatmul.mubr.f32.vlgmr.msra.gmra.mrb[64].mxu1 %v2671_v1 }
 0x138   : > { %5321 = vmatprep.mubr.f32.mxu0 %v8975_v9  ;;  %5961 = vmatpush3.bf16.msra.mxu1 %v6596_v3  ;;  %v2676_v3 = vmul.f32 %v6933_v17, %v6933_v17 }
 0x139   : > { %5931 = vmatprep.subr.bf16.mxu0 %v6601_v5  ;;  %5377 = vmatprep.mubr.f32.mxu1 %v2672_v4  ;;  %v8994_v4 = vld [vmem:[#allocation26_spill] sm:$0xff] }
 0x13a   : > { %5322 = vmatmul.mubr.f32.gmra.mrb[82].mxu0 %v8976_v26  ;;  %5963 = vmatprep.subr.bf16.mxu1 %v6601_v5  ;;  %v3047_v7 = vmul.f32 %v8994_v4, %v6943_v20 }
 0x13b   : > { %5933 = vmatpush3.bf16.msra.mxu0 %v6601_v5  ;;  %5378 = vmatmul.mubr.f32.gmra.mrb[66].mxu1 %v2673_v14  ;;  %v8995_v14 = vld [vmem:[#allocation29_spill] sm:$0xff] }
 0x13c   : > { %5324 = vmatprep.mubr.f32.mxu0 %v8977_v28  ;;  %5965 = vmatpush3.bf16.msra.mxu1 %v6601_v5  ;;  %v2678_v5 = vmul.f32 %v6961_v15, %v6961_v15  ;;  %v2855_v9 = vmul.f32 %v8995_v14, %v8995_v14  ;;  %v3048_v11 = vmul.f32 %v8995_v14, %v6961_v15 }
 0x13d   : > { %5935 = vmatprep.subr.bf16.mxu0 %v6621_v8  ;;  %5380 = vmatprep.mubr.f32.mxu1 %v2674_v10  ;;  %v8996_v10 = vld [vmem:[#allocation30_spill] sm:$0xff] }
 0x13e   : > { %5325 = vmatmul.mubr.f32.gmra.mrb[84].mxu0 %v8978_v29  ;;  %5967 = vmatprep.subr.bf16.mxu1 %v6621_v8  ;;  %v3049_v26 = vmul.f32 %v8996_v10, %v6971_v24  ;;  %v7487_v29 = vld [vmem:[%s8844_s6 + $0x3] ss:$0 sm:$0xff]  ;;  %v7492_v24 = vld [vmem:[%s8844_s6 + $0x4] ss:$0 sm:$0xff] }
 0x13f   : > { %5937 = vmatpush3.bf16.msra.mxu0 %v6621_v8  ;;  %5381 = vmatmul.mubr.f32.gmra.mrb[68].mxu1 %v2675_v27  ;;  %v8997_v27 = vld [vmem:[#allocation33_spill] sm:$0xff] }
 0x140   : > { %5327 = vmatprep.mubr.f32.mxu0 %v8979_v31  ;;  %5969 = vmatpush3.bf16.msra.mxu1 %v6621_v8  ;;  %v2680_v8 = vmul.f32 %v6989_v61, %v6989_v61  ;;  %v2857_v28 = vmul.f32 %v8997_v27, %v8997_v27  ;;  %v3050_v20 = vmul.f32 %v8997_v27, %v6989_v61  ;;  %v8999_v61 = vld [vmem:[#allocation37_spill] sm:$0xff] }
 0x141   : > { %5939 = vmatprep.subr.bf16.mxu0 %v6641_v13  ;;  %5383 = vmatprep.mubr.f32.mxu1 %v2676_v3  ;;  %v8998_v3 = vld [vmem:[#allocation34_spill] sm:$0xff]  ;;  %v2859_v31 = vmul.f32 %v8999_v61, %v8999_v61 }
 0x142   : > { %5328 = vmatmul.mubr.f32.gmra.mrb[86].mxu0 %v8980_v32  ;;  %5971 = vmatprep.subr.bf16.mxu1 %v6641_v13  ;;  %v2858_v15 = vmul.f32 %v8998_v3, %v8998_v3 }
 0x143   : > { %5941 = vmatpush3.bf16.msra.mxu0 %v6641_v13  ;;  %5384 = vmatmul.mubr.f32.gmra.mrb[70].mxu1 %v2677_v30  ;;  %v3051_v30 = vmul.f32 %v8998_v3, %v6999_v2 }
 0x144   : > { %5330 = vmatprep.mubr.f32.mxu0 %v8981_v34  ;;  %5973 = vmatpush3.bf16.msra.mxu1 %v6641_v13  ;;  %v2682_v13 = vmul.f32 %v7017_v21, %v7017_v21 }
 0x145   : > { %5943 = vmatprep.subr.bf16.mxu0 %v6653_v16  ;;  %5386 = vmatprep.mubr.f32.mxu1 %v2678_v5  ;;  %v3052_v5 = vmul.f32 %v8999_v61, %v7017_v21 }
 0x146   : > { %5331 = vmatmul.mubr.f32.gmra.mrb[88].mxu0 %v8982_v35  ;;  %5975 = vmatprep.subr.bf16.mxu1 %v6653_v16 }
 0x147   : > { %5945 = vmatpush3.bf16.msra.mxu0 %v6653_v16  ;;  %5387 = vmatmul.mubr.f32.gmra.mrb[72].mxu1 %v2679_v33 }
 0x148   : > { %5333 = vmatprep.mubr.f32.mxu0 %v8983_v37  ;;  %5977 = vmatpush3.bf16.msra.mxu1 %v6653_v16  ;;  %v2391_v16 = vmul.f32 %v6829_v53, %v6826_v52  ;;  %v8987_v52 = vld [vmem:[#allocation12_spill] sm:$0xff] }
 0x149   : > { %5947 = vmatprep.subr.bf16.mxu0 %v6665_v19  ;;  %5389 = vmatprep.mubr.f32.mxu1 %v2680_v8  ;;  %v2847_v53 = vmul.f32 %v8987_v52, %v8987_v52  ;;  %v3040_v44 = vmul.f32 %v8987_v52, %v8971_v57  ;;  %v2851_v57 = vmul.f32 %v8991_v51, %v8991_v51 }
 0x14a   : > { %5334 = vmatmul.mubr.f32.gmra.mrb[90].mxu0 %v8984_v38  ;;  %5979 = vmatprep.subr.bf16.mxu1 %v6665_v19 }
 0x14b   : > { %5949 = vmatpush3.bf16.msra.mxu0 %v6665_v19  ;;  %5390 = vmatmul.mubr.f32.gmra.mrb[74].mxu1 %v2681_v36  ;;  %v9000_v36 = vld [vmem:[#allocation38_spill] sm:$0xff] }
 0x14c   : > { %5336 = vmatprep.mubr.f32.mxu0 %v8985_v40  ;;  %5981 = vmatpush3.bf16.msra.mxu1 %v6665_v19  ;;  %v2685_v19 = vmul.f32 %v7055_v60, %v7055_v60  ;;  %v2860_v37 = vmul.f32 %v9000_v36, %v9000_v36  ;;  %v3053_v21 = vmul.f32 %v9000_v36, %v7027_v23 }
 0x14d   : > { %5951 = vmatprep.subr.bf16.mxu0 %v6677_v22  ;;  %5392 = vmatprep.mubr.f32.mxu1 %v2682_v13 }
 0x14e   : > { %5337 = vmatmul.mubr.f32.gmra.mrb[92].mxu0 %v8986_v42  ;;  %5983 = vmatprep.subr.bf16.mxu1 %v6677_v22 }
 0x14f   : > { %5953 = vmatpush3.bf16.msra.mxu0 %v6677_v22  ;;  %5393 = vmatmul.mubr.f32.gmra.mrb[76].mxu1 %v2683_v39  ;;  %v2861_v39 = vmul.f32 %v8969_v56, %v8969_v56 }
 0x150   : > { %5339 = vmatprep.mubr.f32.mxu0 %v2391_v16  ;;  %5985 = vmatpush3.bf16.msra.mxu1 %v6677_v22  ;;  %v3041_v22 = vmul.f32 %v8988_v54, %v8973_v18  ;;  %v8993_v18 = vld [vmem:[#allocation25_spill] sm:$0xff]  ;;  %v3054_v16 = vmul.f32 %v8969_v56, %v7045_v12  ;;  %v2862_v12 = vmul.f32 %v8970_v58, %v8970_v58 }
 0x151   : > { %5955 = vmatprep.subr.bf16.mxu0 %v6689_v25  ;;  %5395 = vmatprep.mubr.f32.mxu1 %v2684_v41  ;;  %v2853_v1 = vmul.f32 %v8993_v18, %v8993_v18  ;;  %v3046_v0 = vmul.f32 %v8993_v18, %v6933_v17  ;;  %v2856_v17 = vmul.f32 %v8996_v10, %v8996_v10 }
 0x152   : > { %5340 = vmatmul.mubr.f32.gmra.mrb[94].mxu0 %v2392_v43  ;;  %5987 = vmatprep.subr.bf16.mxu1 %v6689_v25  ;;  %v3055_v54 = vmul.f32 %v8970_v58, %v7055_v60 }
 0x153   : > { %5957 = vmatpush3.bf16.msra.mxu0 %v6689_v25  ;;  %5396 = vmatmul.mubr.f32.gmra.mrb[78].mxu1 %v2685_v19 }
 0x154   : > { %5430 = vmatprep.mubr.f32.mxu0 %v2847_v53  ;;  %5989 = vmatpush3.bf16.msra.mxu1 %v6689_v25  ;;  %v3044_v25 = vmul.f32 %v8991_v51, %v6905_v6  ;;  %v2854_v6 = vmul.f32 %v8994_v4, %v8994_v4 }
 0x155   : > { %5486 = vmatprep.mubr.f32.mxu1 %v3040_v44 }
 0x156   : > { %5431 = vmatmul.mubr.f32.vlgmr.msra.gmra.mrb[96].mxu0 %v2848_v55 }
 0x157   : > { %5487 = vmatmul.mubr.f32.vlgmr.msra.gmra.mrb[80].mxu1 %v3041_v22  ;;  %5433 = vmatprep.mubr.f32.mxu0 %v2849_v46 }
 0x158   : > { %5489 = vmatprep.mubr.f32.mxu1 %v3042_v47 }
 0x15a   : > { %5434 = vmatmul.mubr.f32.gmra.mrb[98].mxu0 %v2850_v49 }
 0x15b   : > { %5490 = vmatmul.mubr.f32.gmra.mrb[82].mxu1 %v3043_v50  ;;  %5436 = vmatprep.mubr.f32.mxu0 %v2851_v57 }
 0x15c   : > { %5492 = vmatprep.mubr.f32.mxu1 %v3044_v25 }
 0x15e   : > { %5437 = vmatmul.mubr.f32.gmra.mrb[100].mxu0 %v2852_v62 }
 0x15f   : > { %5493 = vmatmul.mubr.f32.gmra.mrb[84].mxu1 %v3045_v63  ;;  %5439 = vmatprep.mubr.f32.mxu0 %v2853_v1 }
 0x160   : > { %5495 = vmatprep.mubr.f32.mxu1 %v3046_v0 }
 0x162   : > { %5440 = vmatmul.mubr.f32.gmra.mrb[102].mxu0 %v2854_v6 }
 0x163   : > { %5496 = vmatmul.mubr.f32.gmra.mrb[86].mxu1 %v3047_v7  ;;  %5442 = vmatprep.mubr.f32.mxu0 %v2855_v9 }
 0x164   : > { %5498 = vmatprep.mubr.f32.mxu1 %v3048_v11 }
 0x166   : > { %5443 = vmatmul.mubr.f32.gmra.mrb[104].mxu0 %v2856_v17 }
 0x167   : > { %5499 = vmatmul.mubr.f32.gmra.mrb[88].mxu1 %v3049_v26  ;;  %5445 = vmatprep.mubr.f32.mxu0 %v2857_v28 }
 0x168   : > { %5501 = vmatprep.mubr.f32.mxu1 %v3050_v20 }
 0x169   : > { %v7500_v32 = vpop.f32.mrb[0].mxu0  ;;  %v7502_v33 = vpop.f32.mrb[0].mxu1 }
 0x16a   : > { %v2575_v34 = vmul.f32 %v7500_v32, %v7487_v29  ;;  %v2591_v8 = vmul.f32 %v7502_v33, %v7492_v24  ;;  %v7508_v35 = vpop.f32.mrb[1].mxu0  ;;  %v7510_v2 = vpop.f32.mrb[1].mxu1  ;;  %5446 = vmatmul.mubr.f32.gmra.mrb[106].mxu0 %v2858_v15 }
 0x16b   : > { %v2574_v13 = vmul.f32 %v7487_v29, %v7508_v35  ;;  %v2590_v38 = vmul.f32 %v7492_v24, %v7510_v2  ;;  %5502 = vmatmul.mubr.f32.gmra.mrb[90].mxu1 %v3051_v30  ;;  %5448 = vmatprep.mubr.f32.mxu0 %v2859_v31 }
 0x16c   : > { %v7522_v40 = vadd.f32 %v2591_v8, %v2575_v34  ;;  %5504 = vmatprep.mubr.f32.mxu1 %v3052_v5 }
 0x16d   : > { %v7526_v41 = vadd.f32 %v2590_v38, %v2574_v13  ;;  %v7528_v23 = vpop.f32.mrb[2].mxu0  ;;  %v7530_v42 = vpop.f32.mrb[2].mxu1 }
 0x16e   : > { %9001 = vst [vmem:[#allocation41_spill] sm:$0xff] %v7522_v40  ;;  %v2577_v43 = vmul.f32 %v7528_v23, %v7487_v29  ;;  %v2593_v19 = vmul.f32 %v7530_v42, %v7492_v24  ;;  %v7536_v52 = vpop.f32.mrb[3].mxu0  ;;  %v7538_v53 = vpop.f32.mrb[3].mxu1  ;;  %5449 = vmatmul.mubr.f32.gmra.mrb[108].mxu0 %v2860_v37 }
 0x16f   : > { %9002 = vst [vmem:[#allocation42_spill] sm:$0xff] %v7526_v41  ;;  %v2576_v56 = vmul.f32 %v7487_v29, %v7536_v52  ;;  %v2592_v44 = vmul.f32 %v7492_v24, %v7538_v53  ;;  %5505 = vmatmul.mubr.f32.gmra.mrb[92].mxu1 %v3053_v21  ;;  %5451 = vmatprep.mubr.f32.mxu0 %v2861_v39 }
 0x170   : > { %v7548_v55 = vadd.f32 %v2593_v19, %v2577_v43  ;;  %5507 = vmatprep.mubr.f32.mxu1 %v3054_v16 }
 0x171   : > { %v7550_v22 = vadd.f32 %v2592_v44, %v2576_v56  ;;  %v7552_v45 = vpop.f32.mrb[4].mxu0  ;;  %v7554_v46 = vpop.f32.mrb[4].mxu1 }
 0x172   : > { %9003 = vst [vmem:[#allocation11_spill] sm:$0xff] %v7548_v55  ;;  %v2579_v47 = vmul.f32 %v7552_v45, %v7487_v29  ;;  %v2595_v48 = vmul.f32 %v7554_v46, %v7492_v24  ;;  %v7560_v49 = vpop.f32.mrb[5].mxu0  ;;  %v7562_v50 = vpop.f32.mrb[5].mxu1  ;;  %5452 = vmatmul.mubr.f32.gmra.mrb[110].mxu0 %v2862_v12 }
 0x173   : > { %9004 = vst [vmem:[#allocation15_spill] sm:$0xff] %v7550_v22  ;;  %v2578_v60 = vmul.f32 %v7487_v29, %v7560_v49  ;;  %v2594_v58 = vmul.f32 %v7492_v24, %v7562_v50  ;;  %5508 = vmatmul.mubr.f32.gmra.mrb[94].mxu1 %v3055_v54 }
 0x174   : > { %v7568_v51 = vadd.f32 %v2595_v48, %v2579_v47 }
 0x175   : > { %v7570_v57 = vadd.f32 %v2594_v58, %v2578_v60  ;;  %v7572_v25 = vpop.f32.mrb[6].mxu0  ;;  %v7574_v59 = vpop.f32.mrb[6].mxu1 }
 0x176   : > { %9005 = vst [vmem:[#allocation13_spill] sm:$0xff] %v7568_v51  ;;  %v2581_v62 = vmul.f32 %v7572_v25, %v7487_v29  ;;  %v2597_v63 = vmul.f32 %v7574_v59, %v7492_v24  ;;  %v7580_v18 = vpop.f32.mrb[7].mxu0  ;;  %v7582_v1 = vpop.f32.mrb[7].mxu1 }
 0x177   : > { %9006 = vst [vmem:[#allocation16_spill] sm:$0xff] %v7570_v57  ;;  %v2580_v0 = vmul.f32 %v7487_v29, %v7580_v18  ;;  %v2596_v4 = vmul.f32 %v7492_v24, %v7582_v1 }
 0x178   : > { %v7588_v6 = vadd.f32 %v2597_v63, %v2581_v62 }
 0x179   : > { %v7590_v7 = vadd.f32 %v2596_v4, %v2580_v0  ;;  %v7592_v14 = vpop.f32.mrb[8].mxu0  ;;  %v7594_v9 = vpop.f32.mrb[8].mxu1 }
 0x17a   : > { %9007 = vst [vmem:[#allocation19_spill] sm:$0xff] %v7588_v6  ;;  %v2583_v11 = vmul.f32 %v7592_v14, %v7487_v29  ;;  %v2599_v10 = vmul.f32 %v7594_v9, %v7492_v24  ;;  %v7600_v17 = vpop.f32.mrb[9].mxu0  ;;  %v7602_v26 = vpop.f32.mrb[9].mxu1  ;;  %v7888_v6 = vld [vmem:[%s8844_s6] ss:$0 sm:$0xff] }
 0x17b   : > { %9008 = vst [vmem:[#allocation20_spill] sm:$0xff] %v7590_v7  ;;  %v2582_v27 = vmul.f32 %v7487_v29, %v7600_v17  ;;  %v2598_v28 = vmul.f32 %v7492_v24, %v7602_v26 }
 0x17c   : > { %v7608_v20 = vadd.f32 %v2599_v10, %v2583_v11 }
 0x17d   : > { %v7610_v3 = vadd.f32 %v2598_v28, %v2582_v27  ;;  %v7612_v15 = vpop.f32.mrb[10].mxu0  ;;  %v7614_v30 = vpop.f32.mrb[10].mxu1 }
 0x17e   : > { %9009 = vst [vmem:[#allocation23_spill] sm:$0xff] %v7608_v20  ;;  %v2585_v61 = vmul.f32 %v7612_v15, %v7487_v29  ;;  %v2601_v31 = vmul.f32 %v7614_v30, %v7492_v24  ;;  %v7620_v5 = vpop.f32.mrb[11].mxu0  ;;  %v7622_v34 = vpop.f32.mrb[11].mxu1 }
 0x17f   : > { %9010 = vst [vmem:[#allocation24_spill] sm:$0xff] %v7610_v3  ;;  %v2584_v8 = vmul.f32 %v7487_v29, %v7620_v5  ;;  %v2600_v36 = vmul.f32 %v7492_v24, %v7622_v34 }
 0x180   : > { %v7628_v37 = vadd.f32 %v2601_v31, %v2585_v61 }
 0x181   : > { %v7630_v21 = vadd.f32 %v2600_v36, %v2584_v8  ;;  %v7632_v13 = vpop.f32.mrb[12].mxu0  ;;  %v7634_v38 = vpop.f32.mrb[12].mxu1 }
 0x182   : > { %9011 = vst [vmem:[#allocation27_spill] sm:$0xff] %v7628_v37  ;;  %v2587_v39 = vmul.f32 %v7632_v13, %v7487_v29  ;;  %v2603_v16 = vmul.f32 %v7634_v38, %v7492_v24  ;;  %v7640_v43 = vpop.f32.mrb[13].mxu0  ;;  %v7642_v19 = vpop.f32.mrb[13].mxu1 }
 0x183   : > { %9012 = vst [vmem:[#allocation28_spill] sm:$0xff] %v7630_v21  ;;  %v2586_v12 = vmul.f32 %v7487_v29, %v7640_v43  ;;  %v2602_v56 = vmul.f32 %v7492_v24, %v7642_v19  ;;  %v3487_v21 = vld [vmem:[%s8845_s7 + $0x10] sm:$0xff] }
 0x184   : > { %v7648_v44 = vadd.f32 %v2603_v16, %v2587_v39 }
 0x185   : > { %v7650_v54 = vadd.f32 %v2602_v56, %v2586_v12  ;;  %v7652_v47 = vpop.f32.mrb[14].mxu0  ;;  %v7654_v48 = vpop.f32.mrb[14].mxu1 }
 0x186   : > { %9013 = vst [vmem:[#allocation31_spill] sm:$0xff] %v7648_v44  ;;  %v2589_v60 = vmul.f32 %v7652_v47, %v7487_v29  ;;  %v2605_v58 = vmul.f32 %v7654_v48, %v7492_v24  ;;  %v7660_v62 = vpop.f32.mrb[15].mxu0  ;;  %v7662_v63 = vpop.f32.mrb[15].mxu1 }
 0x187   : > { %9014 = vst [vmem:[#allocation32_spill] sm:$0xff] %v7650_v54  ;;  %v2588_v0 = vmul.f32 %v7487_v29, %v7660_v62  ;;  %v2604_v4 = vmul.f32 %v7492_v24, %v7662_v63 }
 0x188   : > { %v7668_v11 = vadd.f32 %v2605_v58, %v2589_v60 }
 0x189   : > { %v7670_v10 = vadd.f32 %v2604_v4, %v2588_v0  ;;  %v4872_v27 = vpop.f32.mrb[16].mxu0  ;;  %v4928_v28 = vpop.f32.mrb[16].mxu1 }
 0x18a   : > { %9015 = vst [vmem:[#allocation35_spill] sm:$0xff] %v7668_v11  ;;  %v7673_v61 = vadd.f32 %v4872_v27, %v7500_v32  ;;  %v3234_v31 = vmul.f32 %v4872_v27, %v7487_v29  ;;  %v7677_v8 = vadd.f32 %v4928_v28, %v7502_v33  ;;  %v922_v36 = vpop.f32.mrb[17].mxu0  ;;  %v1067_v39 = vpop.f32.mrb[17].mxu1  ;;  %v3250_v16 = vmul.f32 %v4928_v28, %v7492_v24 }
 0x18b   : > { %9016 = vst [vmem:[#allocation36_spill] sm:$0xff] %v7670_v10  ;;  %v7681_v12 = vadd.f32 %v922_v36, %v7508_v35  ;;  %v3233_v56 = vmul.f32 %v7487_v29, %v922_v36  ;;  %v7685_v60 = vadd.f32 %v1067_v39, %v7510_v2  ;;  %v3249_v32 = vmul.f32 %v7492_v24, %v1067_v39 }
 0x18c   : > { %v7688_v58 = vadd.f32 %v3250_v16, %v3234_v31 }
 0x18d   : > { %v4875_v0 = vpop.f32.mrb[18].mxu0  ;;  %v4931_v4 = vpop.f32.mrb[18].mxu1  ;;  %v7690_v33 = vadd.f32 %v3249_v32, %v3233_v56  ;;  %v1902_v57 = vmul.f32 %v7487_v29, %v7681_v12  ;;  %v7913_v12 = vld [vmem:[%s8844_s6 + $0x1] ss:$0 sm:$0xff] }
 0x18e   : > { %9017 = vst [vmem:[#allocation39_spill] sm:$0xff] %v7688_v58  ;;  %v7693_v27 = vadd.f32 %v4875_v0, %v7528_v23  ;;  %v3236_v28 = vmul.f32 %v4875_v0, %v7487_v29  ;;  %v932_v35 = vpop.f32.mrb[19].mxu0  ;;  %v1077_v10 = vpop.f32.mrb[19].mxu1  ;;  %v7697_v36 = vadd.f32 %v4931_v4, %v7530_v42  ;;  %v3252_v2 = vmul.f32 %v4931_v4, %v7492_v24 }
 0x18f   : > { %9018 = vst [vmem:[#allocation40_spill] sm:$0xff] %v7690_v33  ;;  %v7701_v39 = vadd.f32 %v932_v35, %v7536_v52  ;;  %v3235_v31 = vmul.f32 %v7487_v29, %v932_v35  ;;  %v7705_v16 = vadd.f32 %v1077_v10, %v7538_v53  ;;  %v3251_v23 = vmul.f32 %v7492_v24, %v1077_v10 }
 0x190   : > { %v7707_v56 = vadd.f32 %v3252_v2, %v3236_v28  ;;  %v1905_v51 = vmul.f32 %v7487_v29, %v7693_v27  ;;  %v7902_v22 = vmul.f32 %v7492_v24, %v7697_v36  ;;  %9040 = vst [vmem:[#allocation50_spill] sm:$0xff] %v7913_v12 }
 0x191   : > { %v4878_v32 = vpop.f32.mrb[20].mxu0  ;;  %v4934_v0 = vpop.f32.mrb[20].mxu1  ;;  %v7717_v35 = vadd.f32 %v3251_v23, %v3235_v31 }
 0x192   : > { %9019 = vst [vmem:[#allocation12_spill] sm:$0xff] %v7707_v56  ;;  %v7711_v33 = vadd.f32 %v4878_v32, %v7552_v45  ;;  %v3238_v42 = vmul.f32 %v4878_v32, %v7487_v29  ;;  %v7715_v4 = vadd.f32 %v4934_v0, %v7554_v46  ;;  %v942_v52 = vpop.f32.mrb[21].mxu0  ;;  %v1087_v58 = vpop.f32.mrb[21].mxu1  ;;  %v3254_v53 = vmul.f32 %v4934_v0, %v7492_v24 }
 0x193   : > { %9020 = vst [vmem:[#allocation14_spill] sm:$0xff] %v7717_v35  ;;  %v7721_v28 = vadd.f32 %v942_v52, %v7560_v49  ;;  %v3237_v10 = vmul.f32 %v7487_v29, %v942_v52  ;;  %v7725_v2 = vadd.f32 %v1087_v58, %v7562_v50  ;;  %v3253_v32 = vmul.f32 %v7492_v24, %v1087_v58 }
 0x194   : > { %v7727_v45 = vadd.f32 %v3254_v53, %v3238_v42  ;;  %v7917_v27 = vmul.f32 %v7487_v29, %v7711_v33  ;;  %v7921_v36 = vmul.f32 %v7492_v24, %v7715_v4 }
 0x195   : > { %v4881_v46 = vpop.f32.mrb[22].mxu0  ;;  %v4937_v56 = vpop.f32.mrb[22].mxu1  ;;  %v7737_v52 = vadd.f32 %v3253_v32, %v3237_v10  ;;  %v7927_v40 = vmul.f32 %v7487_v29, %v7721_v28 }
 0x196   : > { %9021 = vst [vmem:[#allocation17_spill] sm:$0xff] %v7727_v45  ;;  %v7731_v11 = vadd.f32 %v4881_v46, %v7572_v25  ;;  %v3240_v31 = vmul.f32 %v4881_v46, %v7487_v29  ;;  %v7735_v23 = vadd.f32 %v4937_v56, %v7574_v59  ;;  %v952_v49 = vpop.f32.mrb[23].mxu0  ;;  %v1097_v0 = vpop.f32.mrb[23].mxu1  ;;  %v3256_v50 = vmul.f32 %v4937_v56, %v7492_v24 }
 0x197   : > { %9022 = vst [vmem:[#allocation18_spill] sm:$0xff] %v7737_v52  ;;  %v7741_v42 = vadd.f32 %v952_v49, %v7580_v18  ;;  %v3239_v58 = vmul.f32 %v7487_v29, %v952_v49  ;;  %v7745_v53 = vadd.f32 %v1097_v0, %v7582_v1  ;;  %v3255_v46 = vmul.f32 %v7492_v24, %v1097_v0 }
 0x198   : > { %v7747_v25 = vadd.f32 %v3256_v50, %v3240_v31  ;;  %v7937_v4 = vmul.f32 %v7487_v29, %v7731_v11 }
 0x199   : > { %v4884_v59 = vpop.f32.mrb[24].mxu0  ;;  %v4940_v45 = vpop.f32.mrb[24].mxu1  ;;  %v7757_v49 = vadd.f32 %v3255_v46, %v3239_v58 }
 0x19a   : > { %9023 = vst [vmem:[#allocation21_spill] sm:$0xff] %v7747_v25  ;;  %v7751_v35 = vadd.f32 %v4884_v59, %v7592_v14  ;;  %v3242_v10 = vmul.f32 %v4884_v59, %v7487_v29  ;;  %v7755_v56 = vadd.f32 %v4940_v45, %v7594_v9  ;;  %v962_v18 = vpop.f32.mrb[25].mxu0  ;;  %v1107_v32 = vpop.f32.mrb[25].mxu1  ;;  %v3258_v1 = vmul.f32 %v4940_v45, %v7492_v24 }
 0x19b   : > { %9024 = vst [vmem:[#allocation22_spill] sm:$0xff] %v7757_v49  ;;  %v7761_v31 = vadd.f32 %v962_v18, %v7600_v17  ;;  %v3241_v0 = vmul.f32 %v7487_v29, %v962_v18  ;;  %v7765_v50 = vadd.f32 %v1107_v32, %v7602_v26  ;;  %v3257_v59 = vmul.f32 %v7492_v24, %v1107_v32 }
 0x19c   : > { %v7767_v14 = vadd.f32 %v3258_v1, %v3242_v10 }
 0x19d   : > { %v4887_v9 = vpop.f32.mrb[26].mxu0  ;;  %v4943_v25 = vpop.f32.mrb[26].mxu1  ;;  %v7777_v18 = vadd.f32 %v3257_v59, %v3241_v0 }
 0x19e   : > { %9025 = vst [vmem:[#allocation25_spill] sm:$0xff] %v7767_v14  ;;  %v7771_v52 = vadd.f32 %v4887_v9, %v7612_v15  ;;  %v3244_v58 = vmul.f32 %v4887_v9, %v7487_v29  ;;  %v7775_v45 = vadd.f32 %v4943_v25, %v7614_v30  ;;  %v972_v17 = vpop.f32.mrb[27].mxu0  ;;  %v1117_v46 = vpop.f32.mrb[27].mxu1  ;;  %v3260_v26 = vmul.f32 %v4943_v25, %v7492_v24 }
 0x19f   : > { %9026 = vst [vmem:[#allocation26_spill] sm:$0xff] %v7777_v18  ;;  %v7781_v10 = vadd.f32 %v972_v17, %v7620_v5  ;;  %v3243_v32 = vmul.f32 %v7487_v29, %v972_v17  ;;  %v7785_v1 = vadd.f32 %v1117_v46, %v7622_v34  ;;  %v3259_v9 = vmul.f32 %v7492_v24, %v1117_v46 }
 0x1a0   : > { %v7787_v15 = vadd.f32 %v3260_v26, %v3244_v58 }
 0x1a1   : > { %v4890_v30 = vpop.f32.mrb[28].mxu0  ;;  %v4946_v14 = vpop.f32.mrb[28].mxu1  ;;  %v7797_v17 = vadd.f32 %v3259_v9, %v3243_v32 }
 0x1a2   : > { %9027 = vst [vmem:[#allocation29_spill] sm:$0xff] %v7787_v15  ;;  %v7791_v49 = vadd.f32 %v4890_v30, %v7632_v13  ;;  %v3246_v0 = vmul.f32 %v4890_v30, %v7487_v29  ;;  %v7795_v25 = vadd.f32 %v4946_v14, %v7634_v38  ;;  %v982_v5 = vpop.f32.mrb[29].mxu0  ;;  %v1127_v59 = vpop.f32.mrb[29].mxu1  ;;  %v3262_v34 = vmul.f32 %v4946_v14, %v7492_v24 }
 0x1a3   : > { %9028 = vst [vmem:[#allocation30_spill] sm:$0xff] %v7797_v17  ;;  %v7801_v58 = vadd.f32 %v982_v5, %v7640_v43  ;;  %v3245_v46 = vmul.f32 %v7487_v29, %v982_v5  ;;  %v7805_v26 = vadd.f32 %v1127_v59, %v7642_v19  ;;  %v3261_v30 = vmul.f32 %v7492_v24, %v1127_v59 }
 0x1a4   : > { %v7807_v13 = vadd.f32 %v3262_v34, %v3246_v0 }
 0x1a5   : > { %v4893_v38 = vpop.f32.mrb[30].mxu0  ;;  %v4949_v15 = vpop.f32.mrb[30].mxu1  ;;  %v7817_v5 = vadd.f32 %v3261_v30, %v3245_v46 }
 0x1a6   : > { %9029 = vst [vmem:[#allocation33_spill] sm:$0xff] %v7807_v13  ;;  %v7811_v18 = vadd.f32 %v4893_v38, %v7652_v47  ;;  %v3248_v32 = vmul.f32 %v4893_v38, %v7487_v29  ;;  %v7815_v14 = vadd.f32 %v4949_v15, %v7654_v48  ;;  %v992_v43 = vpop.f32.mrb[31].mxu0  ;;  %v1137_v9 = vpop.f32.mrb[31].mxu1  ;;  %v3264_v19 = vmul.f32 %v4949_v15, %v7492_v24 }
 0x1a7   : > { %9031 = vst [vmem:[#allocation37_spill] sm:$0xff] %v7817_v5  ;;  %v7821_v0 = vadd.f32 %v992_v43, %v7660_v62  ;;  %v3247_v59 = vmul.f32 %v7487_v29, %v992_v43  ;;  %v7825_v34 = vadd.f32 %v1137_v9, %v7662_v63  ;;  %v3263_v38 = vmul.f32 %v7492_v24, %v1137_v9  ;;  %v3485_v62 = vld [vmem:[%s8845_s7] sm:$0xff]  ;;  %v3486_v63 = vld [vmem:[%s8845_s7 + $0x8] sm:$0xff] }
 0x1a8   : > { %9030 = vst [vmem:[#allocation34_spill] sm:$0xff] %v7815_v14  ;;  %v7827_v47 = vadd.f32 %v3264_v19, %v3248_v32  ;;  %v5990_v43 = vpack.c.bf16 %v3486_v63, %v3485_v62 }
 0x1a9   : > { %9032 = vst [vmem:[#allocation38_spill] sm:$0xff] %v7821_v0  ;;  %9033 = vst [vmem:[#allocation43_spill] sm:$0xff] %v7825_v34  ;;  %v4984_v48 = vpop.f32.mrb[32].mxu0  ;;  %v7830_v17 = vadd.f32 %v3263_v38, %v3247_v59  ;;  %v7946_v34 = vmul.f32 %v7487_v29, %v7741_v42 }
 0x1aa   : > { %9034 = vst [vmem:[#allocation44_spill] sm:$0xff] %v7827_v47  ;;  %v1228_v13 = vpop.f32.mrb[33].mxu0  ;;  %5991 = vmatprep.subr.bf16.mxu0 %v5990_v43  ;;  %5998 = vmatprep.subr.bf16.mxu1 %v5990_v43 }
 0x1ab   : > { %9035 = vst [vmem:[#allocation45_spill] sm:$0xff] %v7830_v17  ;;  %5993 = vmatpush3.bf16.msra.mxu0 %v5990_v43  ;;  %6000 = vmatpush3.bf16.msra.mxu1 %v5990_v43  ;;  %v1649_v17 = vlaneseq  ;;  %v7868_v43 = vld [vmem:[%s8844_s6 + $0x2] sm:$0x1]  ;;  %v1311_v33 = vmul.f32 %v7888_v6, %v1228_v13 }
 0x1ac   : > { %9037 = vst [vmem:[#allocation47_spill] sm:$0xff] %v7868_v43 }
 0x1ad   : > { %v7832_v46 = vpop.f32.mrb[34].mxu0  ;;  %v7858_v54 = vshrl.u32 %v1649_v17, 7  ;;  %v3488_v17 = vld [vmem:[%s8845_s7 + $0x18] sm:$0xff] }
 0x1ae   : > { %v7834_v30 = vpop.f32.mrb[35].mxu0  ;;  %v5994_v37 = vpack.c.bf16 %v3488_v17, %v3487_v21  ;;  %v1903_v21 = vmul.f32 %v7487_v29, %v7673_v61  ;;  %v1955_v17 = vmul.f32 %v7492_v24, %v7677_v8  ;;  %v7908_v61 = vmul.f32 %v7492_v24, %v7705_v16 }
 0x1af   : > { %9036 = vst [vmem:[#allocation46_spill] sm:$0xff] %v7858_v54  ;;  %v8904_v44 = vsub.s32 0, %v7858_v54  ;;  %v7931_v54 = vmul.f32 %v7492_v24, %v7725_v2  ;;  %v7950_v2 = vmul.f32 %v7492_v24, %v7745_v53  ;;  %v7962_v53 = vmul.f32 %v7492_v24, %v7755_v56 }
 0x1b0   : > { %5995 = vmatprep.subr.bf16.mxu0 %v5994_v37  ;;  %5999 = vmatprep.subr.bf16.mxu1 %v5994_v37 }
 0x1b1   : > { %v7836_v15 = vpop.f32.mrb[36].mxu0  ;;  %v7883_v7 = vrot.slane %v7868_v43, %v8904_v44  ;;  %5997 = vmatpush3.bf16.msra.mxu0 %v5994_v37  ;;  %6001 = vmatpush3.bf16.msra.mxu1 %v5994_v37  ;;  %v1954_v44 = vmul.f32 %v7492_v24, %v7685_v60  ;;  %v1904_v37 = vmul.f32 %v7487_v29, %v7701_v39 }
 0x1b2   : > { %v7844_v32 = vpop.f32.mrb[37].mxu0  ;;  %v1312_v39 = vmul.f32 %v4984_v48, %v7888_v6  ;;  %v7941_v48 = vmul.f32 %v7492_v24, %v7735_v23  ;;  %v7955_v23 = vmul.f32 %v7487_v29, %v7751_v35  ;;  %v7969_v35 = vmul.f32 %v7487_v29, %v7761_v31 }
 0x1b5   : > { %v7846_v9 = vpop.f32.mrb[38].mxu0 }
 0x1b6   : > { %v7848_v19 = vpop.f32.mrb[39].mxu0 }
 0x1b9   : > { %v7850_v59 = vpop.f32.mrb[40].mxu0 }
 0x1ba   : > { %v7852_v38 = vpop.f32.mrb[41].mxu0 }
 0x1bd   : > { %v7854_v47 = vpop.f32.mrb[42].mxu0 }
 0x1be   : > { %v7856_v5 = vpop.f32.mrb[43].mxu0 }
 0x1c1   : > { %v7860_v62 = vpop.f32.mrb[44].mxu0 }
 0x1c2   : > { %v7862_v63 = vpop.f32.mrb[45].mxu0 }
 0x1c5   : > { %v7876_v3 = vpop.f32.mrb[46].mxu0 }
 0x1c6   : > { %9038 = vst [vmem:[#allocation48_spill] sm:$0xff] %v7876_v3  ;;  %v7878_v20 = vpop.f32.mrb[47].mxu0 }
 0x1c7   : > { %9039 = vst [vmem:[#allocation49_spill] sm:$0xff] %v7878_v20 }
 0x1c9   : > { %v5096_v8 = vpop.f32.mrb[32].mxu1  ;;  %v5152_v60 = vpop.f32.mrb[48].mxu0 }
 0x1ca   : > { %v1654_v16 = vmul.f32 %v5096_v8, %v7883_v7  ;;  %v1570_v55 = vpop.f32.mrb[33].mxu1  ;;  %v1767_v41 = vpop.f32.mrb[49].mxu0  ;;  %v1851_v28 = vmul.f32 %v5152_v60, %v7913_v12  ;;  %v1314_v60 = vmul.f32 %v7832_v46, %v7888_v6 }
 0x1cb   : > { %v1653_v43 = vmul.f32 %v7883_v7, %v1570_v55  ;;  %v1850_v13 = vmul.f32 %v7913_v12, %v1767_v41  ;;  %v1313_v41 = vmul.f32 %v7888_v6, %v7834_v30 }
 0x1cc   : > { %v1670_v8 = vadd.f32 %v1654_v16, %v1312_v39 }
 0x1cd   : > { %v1669_v55 = vadd.f32 %v1653_v43, %v1311_v33  ;;  %v5099_v11 = vpop.f32.mrb[34].mxu1  ;;  %v5155_v14 = vpop.f32.mrb[50].mxu0 }
 0x1ce   : > { %v1867_v39 = vadd.f32 %v1851_v28, %v1670_v8  ;;  %v1656_v42 = vmul.f32 %v5099_v11, %v7883_v7  ;;  %v1580_v16 = vpop.f32.mrb[35].mxu1  ;;  %v1777_v20 = vpop.f32.mrb[51].mxu0  ;;  %v1853_v28 = vmul.f32 %v5155_v14, %v7913_v12  ;;  %v7974_v11 = vmul.f32 %v7492_v24, %v7765_v50 }
 0x1cf   : > { %v1866_v43 = vadd.f32 %v1850_v13, %v1669_v55  ;;  %v1655_v33 = vmul.f32 %v7883_v7, %v1580_v16  ;;  %v1852_v0 = vmul.f32 %v7913_v12, %v1777_v20  ;;  %v1316_v13 = vmul.f32 %v7836_v15, %v7888_v6 }
 0x1d0   : > { %v1919_v46 = vadd.f32 %v1903_v21, %v1867_v39  ;;  %v1672_v8 = vadd.f32 %v1656_v42, %v1314_v60  ;;  %v1315_v50 = vmul.f32 %v7888_v6, %v7844_v32  ;;  %v7989_v42 = vmul.f32 %v7487_v29, %v7771_v52 }
 0x1d1   : > { %v1918_v56 = vadd.f32 %v1902_v57, %v1866_v43  ;;  %v1671_v3 = vadd.f32 %v1655_v33, %v1313_v41  ;;  %v5102_v30 = vpop.f32.mrb[36].mxu1  ;;  %v5158_v55 = vpop.f32.mrb[52].mxu0  ;;  %v7994_v43 = vmul.f32 %v7492_v24, %v7775_v45  ;;  %v1317_v45 = vmul.f32 %v7888_v6, %v7848_v19 }
 0x1d2   : > { %v7979_v16 = vadd.f32 %v1955_v17, %v1919_v46  ;;  %v1869_v31 = vadd.f32 %v1853_v28, %v1672_v8  ;;  %v1658_v21 = vmul.f32 %v5102_v30, %v7883_v7  ;;  %v1590_v60 = vpop.f32.mrb[37].mxu1  ;;  %v1787_v14 = vpop.f32.mrb[53].mxu0  ;;  %v1855_v41 = vmul.f32 %v5158_v55, %v7913_v12 }
 0x1d3   : > { %v7984_v39 = vadd.f32 %v1954_v44, %v1918_v56  ;;  %v1868_v57 = vadd.f32 %v1852_v0, %v1671_v3  ;;  %v1657_v20 = vmul.f32 %v7883_v7, %v1590_v60  ;;  %v1854_v44 = vmul.f32 %v7913_v12, %v1787_v14 }
 0x1d4   : > { %v1921_v15 = vadd.f32 %v1905_v51, %v1869_v31  ;;  %v1674_v17 = vadd.f32 %v1658_v21, %v1316_v13  ;;  %v1318_v0 = vmul.f32 %v7846_v9, %v7888_v6  ;;  %v8011_v9 = vmul.f32 %v7487_v29, %v7781_v10 }
 0x1d5   : > { %v1920_v33 = vadd.f32 %v1904_v37, %v1868_v57  ;;  %v1673_v46 = vadd.f32 %v1657_v20, %v1315_v50  ;;  %v5105_v32 = vpop.f32.mrb[38].mxu1  ;;  %v5161_v3 = vpop.f32.mrb[54].mxu0  ;;  %v8017_v21 = vmul.f32 %v7492_v24, %v7785_v1  ;;  %v1320_v10 = vmul.f32 %v7850_v59, %v7888_v6 }
 0x1d6   : > { %v8000_v52 = vadd.f32 %v7902_v22, %v1921_v15  ;;  %v1871_v51 = vadd.f32 %v1855_v41, %v1674_v17  ;;  %v1660_v8 = vmul.f32 %v5105_v32, %v7883_v7  ;;  %v1600_v28 = vpop.f32.mrb[39].mxu1  ;;  %v1797_v56 = vpop.f32.mrb[55].mxu0  ;;  %v1857_v31 = vmul.f32 %v5161_v3, %v7913_v12 }
 0x1d7   : > { %v8006_v37 = vadd.f32 %v7908_v61, %v1920_v33  ;;  %v1870_v30 = vadd.f32 %v1854_v44, %v1673_v46  ;;  %v1659_v55 = vmul.f32 %v7883_v7, %v1600_v28  ;;  %v1856_v60 = vmul.f32 %v7913_v12, %v1797_v56 }
 0x1d8   : > { %v1923_v22 = vadd.f32 %v7917_v27, %v1871_v51  ;;  %v1676_v13 = vadd.f32 %v1660_v8, %v1318_v0  ;;  %v1319_v1 = vmul.f32 %v7888_v6, %v7852_v38  ;;  %v1915_v59 = vmul.f32 %v7487_v29, %v7791_v49 }
 0x1d9   : > { %v1922_v19 = vadd.f32 %v7927_v40, %v1870_v30  ;;  %v1675_v61 = vadd.f32 %v1659_v55, %v1317_v45  ;;  %v5108_v14 = vpop.f32.mrb[40].mxu1  ;;  %v5164_v50 = vpop.f32.mrb[56].mxu0  ;;  %v8039_v32 = vmul.f32 %v7492_v24, %v7795_v25  ;;  %v1322_v8 = vmul.f32 %v7854_v47, %v7888_v6 }
 0x1da   : > { %v8024_v57 = vadd.f32 %v7921_v36, %v1923_v22  ;;  %v1873_v27 = vadd.f32 %v1857_v31, %v1676_v13  ;;  %v1662_v20 = vmul.f32 %v5108_v14, %v7883_v7  ;;  %v1610_v15 = vpop.f32.mrb[41].mxu1  ;;  %v1807_v17 = vpop.f32.mrb[57].mxu0  ;;  %v1859_v44 = vmul.f32 %v5164_v50, %v7913_v12 }
 0x1db   : > { %v8030_v40 = vadd.f32 %v7931_v54, %v1922_v19  ;;  %v1872_v41 = vadd.f32 %v1856_v60, %v1675_v61  ;;  %v1661_v33 = vmul.f32 %v7883_v7, %v1610_v15  ;;  %v1858_v54 = vmul.f32 %v7913_v12, %v1807_v17 }
 0x1dc   : > { %v1925_v36 = vadd.f32 %v7937_v4, %v1873_v27  ;;  %v1678_v46 = vadd.f32 %v1662_v20, %v1320_v10  ;;  %v1321_v25 = vmul.f32 %v7888_v6, %v7856_v5  ;;  %v1914_v47 = vmul.f32 %v7487_v29, %v7801_v58 }
 0x1dd   : > { %v1924_v38 = vadd.f32 %v7946_v34, %v1872_v41  ;;  %v1677_v3 = vadd.f32 %v1661_v33, %v1319_v1  ;;  %v5111_v0 = vpop.f32.mrb[42].mxu1  ;;  %v5167_v51 = vpop.f32.mrb[58].mxu0  ;;  %v1966_v31 = vmul.f32 %v7492_v24, %v7805_v26  ;;  %v1324_v14 = vmul.f32 %v7860_v62, %v7888_v6  ;;  %v9041_v41 = vld [vmem:[#allocation38_spill] sm:$0xff] }
 0x1de   : > { %v8046_v49 = vadd.f32 %v7941_v48, %v1925_v36  ;;  %v1875_v4 = vadd.f32 %v1859_v44, %v1678_v46  ;;  %v1664_v28 = vmul.f32 %v5111_v0, %v7883_v7  ;;  %v1620_v56 = vpop.f32.mrb[43].mxu1  ;;  %v1817_v45 = vpop.f32.mrb[59].mxu0  ;;  %v1861_v13 = vmul.f32 %v5167_v51, %v7913_v12 }
 0x1df   : > { %v8052_v34 = vadd.f32 %v7950_v2, %v1924_v38  ;;  %v1874_v30 = vadd.f32 %v1858_v54, %v1677_v3  ;;  %v1663_v55 = vmul.f32 %v7883_v7, %v1620_v56  ;;  %v1860_v2 = vmul.f32 %v7913_v12, %v1817_v45  ;;  %v9042_v38 = vld [vmem:[#allocation48_spill] sm:$0xff] }
 0x1e0   : > { %v1927_v48 = vadd.f32 %v7955_v23, %v1875_v4  ;;  %v1680_v22 = vadd.f32 %v1664_v28, %v1322_v8  ;;  %v1323_v26 = vmul.f32 %v7888_v6, %v7862_v63  ;;  %v1917_v62 = vmul.f32 %v7487_v29, %v7811_v18  ;;  %v3471_v28 = vld [vmem:[%s8093_s28 + $0x10] sm:$0xff] }
 0x1e1   : > { %v1926_v19 = vadd.f32 %v7969_v35, %v1874_v30  ;;  %v1679_v5 = vadd.f32 %v1663_v55, %v1321_v25  ;;  %v5114_v61 = vpop.f32.mrb[44].mxu1  ;;  %v5170_v60 = vpop.f32.mrb[60].mxu0  ;;  %v1916_v33 = vmul.f32 %v7487_v29, %v9041_v41  ;;  %v1326_v3 = vmul.f32 %v9042_v38, %v7888_v6  ;;  %v9043_v29 = vld [vmem:[#allocation49_spill] sm:$0xff]  ;;  %v3469_v30 = vld [vmem:[%s8093_s28] sm:$0xff] }
 0x1e2   : > { %v8066_v58 = vadd.f32 %v7962_v53, %v1927_v48  ;;  %v1877_v23 = vadd.f32 %v1861_v13, %v1680_v22  ;;  %v1666_v50 = vmul.f32 %v5114_v61, %v7883_v7  ;;  %v1630_v10 = vpop.f32.mrb[45].mxu1  ;;  %v1827_v27 = vpop.f32.mrb[61].mxu0  ;;  %v1863_v1 = vmul.f32 %v5170_v60, %v7913_v12 }
 0x1e3   : > { %v8072_v35 = vadd.f32 %v7974_v11, %v1926_v19  ;;  %v1876_v20 = vadd.f32 %v1860_v2, %v1679_v5  ;;  %v1665_v15 = vmul.f32 %v7883_v7, %v1630_v10  ;;  %v1862_v11 = vmul.f32 %v7913_v12, %v1827_v27  ;;  %v3472_v10 = vld [vmem:[%s8093_s28 + $0x18] sm:$0xff] }
 0x1e4   : > { %v1929_v53 = vadd.f32 %v7989_v42, %v1877_v23  ;;  %v1682_v17 = vadd.f32 %v1666_v50, %v1324_v14  ;;  %v6336_v5 = vmov 0  }
 0x1e5   : > { %v1928_v63 = vadd.f32 %v8011_v9, %v1876_v20  ;;  %v1681_v36 = vadd.f32 %v1665_v15, %v1323_v26  ;;  %v5117_v46 = vpop.f32.mrb[46].mxu1  ;;  %v5173_v44 = vpop.f32.mrb[62].mxu0  ;;  %v1325_v9 = vmul.f32 %v7888_v6, %v9043_v29  ;;  %6071 = vset.pattern.permute.xlu1 %v6336_v5  ;;  %6070 = vset.pattern.permute.xlu0 %v6336_v5  ;;  %v3470_v15 = vld [vmem:[%s8093_s28 + $0x8] sm:$0xff] }
 0x1e6   : > { %v8086_v18 = vadd.f32 %v7994_v43, %v1929_v53  ;;  %v1879_v42 = vadd.f32 %v1863_v1, %v1682_v17  ;;  %v1668_v54 = vmul.f32 %v5117_v46, %v7883_v7  ;;  %v1640_v0 = vpop.f32.mrb[47].mxu1  ;;  %v1837_v51 = vpop.f32.mrb[63].mxu0  ;;  %v1865_v25 = vmul.f32 %v5173_v44, %v7913_v12  ;;  %3501 = vperm.xlu1 %6071, %v3471_v28   ;;  %v9045_v53 = vld [vmem:[#allocation43_spill] sm:$0xff] }
 0x1e7   : > { %v8098_v8 = vadd.f32 %v8017_v21, %v1928_v63  ;;  %v1878_v43 = vadd.f32 %v1862_v11, %v1681_v36  ;;  %v1667_v4 = vmul.f32 %v7883_v7, %v1640_v0  ;;  %v1864_v22 = vmul.f32 %v7913_v12, %v1837_v51  ;;  %3491 = vperm.xlu0 %6070, %v3469_v30  }
 0x1e8   : > { %v1931_v56 = vadd.f32 %v1915_v59, %v1879_v42  ;;  %v1684_v45 = vadd.f32 %v1668_v54, %v1326_v3  ;;  %v1968_v17 = vmul.f32 %v7492_v24, %v9045_v53  ;;  %v3473_v54 = vld [vmem:[%s8093_s28 + $0x20] sm:$0xff] }
 0x1e9   : > { %v1930_v55 = vadd.f32 %v1914_v47, %v1878_v43  ;;  %v1683_v48 = vadd.f32 %v1667_v4, %v1325_v9  ;;  %v5208_v13 = vpop.f32.mrb[64].mxu0  ;;  %v5264_v19 = vpop.f32.mrb[48].mxu1 }
 0x1ea   : > { %v8106_v21 = vadd.f32 %v8039_v32, %v1931_v56  ;;  %v1881_v7 = vadd.f32 %v1865_v25, %v1684_v45  ;;  %v2168_v59 = vmul.f32 %v5208_v13, %v7888_v6  ;;  %v2345_v2 = vmul.f32 %v5264_v19, %v7913_v12  ;;  %v2088_v61 = vpop.f32.mrb[65].mxu0  ;;  %v2265_v47 = vpop.f32.mrb[49].mxu1  ;;  %v9044_v32 = vld [vmem:[#allocation34_spill] sm:$0xff]  ;;  %3506 = vperm.xlu1 %6071, %v3472_v10  }
 0x1eb   : > { %v8110_v60 = vadd.f32 %v1966_v31, %v1930_v55  ;;  %v1880_v14 = vadd.f32 %v1864_v22, %v1683_v48  ;;  %v2167_v23 = vmul.f32 %v7888_v6, %v2088_v61  ;;  %v2344_v50 = vmul.f32 %v7913_v12, %v2265_v47  ;;  %3496 = vperm.xlu0 %6070, %v3470_v15   ;;  %v3476_v25 = vld [vmem:[%s8093_s28 + $0x38] sm:$0xff]  ;;  %v3475_v55 = vld [vmem:[%s8093_s28 + $0x30] sm:$0xff]  ;;  %v3478_v47 = vld [vmem:[%s8093_s28 + $0x48] sm:$0xff] }
 0x1ec   : > { %v1969_v27 = vmul.f32 %v7492_v24, %v9044_v32  ;;  %v1933_v26 = vadd.f32 %v1917_v62, %v1881_v7  ;;  %v8117_v20 = vadd.f32 %v2345_v2, %v2168_v59 }
 0x1ed   : > { %v1932_v31 = vadd.f32 %v1916_v33, %v1880_v14  ;;  %v8122_v1 = vadd.f32 %v2344_v50, %v2167_v23  ;;  %v5211_v41 = vpop.f32.mrb[66].mxu0  ;;  %v5267_v63 = vpop.f32.mrb[50].mxu1  ;;  %v3474_v33 = vld [vmem:[%s8093_s28 + $0x28] sm:$0xff]  ;;  %v3477_v23 = vld [vmem:[%s8093_s28 + $0x40] sm:$0xff] }
 0x1ee   : > { %v8124_v36 = vadd.f32 %v1969_v27, %v1933_v26  ;;  %v2170_v11 = vmul.f32 %v5211_v41, %v7888_v6  ;;  %v2347_v46 = vmul.f32 %v5267_v63, %v7913_v12  ;;  %v2098_v62 = vpop.f32.mrb[67].mxu0  ;;  %v2275_v44 = vpop.f32.mrb[51].mxu1  ;;  %3516 = vperm.xlu1 %6071, %v3474_v33   ;;  %v3480_v41 = vld [vmem:[%s8093_s28 + $0x58] sm:$0xff]  ;;  %v9048_v63 = vld [vmem:[#allocation47_spill] sm:$0xff] }
 0x1ef   : > { %v8128_v38 = vadd.f32 %v1968_v17, %v1932_v31  ;;  %v2169_v3 = vmul.f32 %v7888_v6, %v2098_v62  ;;  %v2346_v24 = vmul.f32 %v7913_v12, %v2275_v44  ;;  %3511 = vperm.xlu0 %6070, %v3473_v54   ;;  %v3479_v62 = vld [vmem:[%s8093_s28 + $0x50] sm:$0xff] }
 0x1f0   : > { %9046 = vst [vmem:[#allocation38_spill] sm:$0xff] %v8124_v36  ;;  %v8133_v42 = vadd.f32 %v2347_v46, %v2170_v11  ;;  %v2376_v11 = vmul.f32 2.0, %v9048_v63  ;;  %v9057_v63 = vld [vmem:[#allocation19_spill] sm:$0xff] }
 0x1f1   : > { %9047 = vst [vmem:[#allocation48_spill] sm:$0xff] %v8128_v38  ;;  %v8136_v0 = vadd.f32 %v2346_v24, %v2169_v3  ;;  %v5214_v51 = vpop.f32.mrb[68].mxu0  ;;  %v5270_v29 = vpop.f32.mrb[52].mxu1 }
 0x1f2   : > { %v2172_v9 = vmul.f32 %v5214_v51, %v7888_v6  ;;  %v2349_v43 = vmul.f32 %v5270_v29, %v7913_v12  ;;  %v2108_v4 = vpop.f32.mrb[69].mxu0  ;;  %v2285_v28 = vpop.f32.mrb[53].mxu1  ;;  %3526 = vperm.xlu1 %6071, %v3476_v25  }
 0x1f3   : > { %v2171_v56 = vmul.f32 %v7888_v6, %v2108_v4  ;;  %v2348_v45 = vmul.f32 %v7913_v12, %v2285_v28  ;;  %3521 = vperm.xlu0 %6070, %v3475_v55   ;;  %v3482_v4 = vld [vmem:[%s8093_s28 + $0x68] sm:$0xff]  ;;  %v9049_v28 = vld [vmem:[#allocation46_spill] sm:$0xff]  ;;  %v3481_v55 = vld [vmem:[%s8093_s28 + $0x60] sm:$0xff] }
 0x1f4   : > { %v8143_v30 = vadd.f32 %v2349_v43, %v2172_v9 }
 0x1f5   : > { %v8146_v48 = vadd.f32 %v2348_v45, %v2171_v56  ;;  %v5217_v22 = vpop.f32.mrb[70].mxu0  ;;  %v5273_v13 = vpop.f32.mrb[54].mxu1  ;;  %v9050_v56 = vsub.s32 0, %v9049_v28  ;;  %v3483_v28 = vld [vmem:[%s8093_s28 + $0x70] sm:$0xff] }
 0x1f6   : > { %v2174_v19 = vmul.f32 %v5217_v22, %v7888_v6  ;;  %v2351_v5 = vmul.f32 %v5273_v13, %v7913_v12  ;;  %v2118_v7 = vpop.f32.mrb[71].mxu0  ;;  %v2295_v59 = vpop.f32.mrb[55].mxu1  ;;  %3536 = vperm.xlu1 %6071, %v3478_v47   ;;  %v9051_v22 = vld [vmem:[#allocation41_spill] sm:$0xff] }
 0x1f7   : > { %v2173_v2 = vmul.f32 %v7888_v6, %v2118_v7  ;;  %v2350_v61 = vmul.f32 %v7913_v12, %v2295_v59  ;;  %3531 = vperm.xlu0 %6070, %v3477_v23   ;;  %v8176_v45 = vrot.slane %v2376_v11, %v9050_v56  ;;  %v8182_v13 = vmul.f32 2.0, %v9051_v22  ;;  %v9053_v7 = vld [vmem:[#allocation11_spill] sm:$0xff] }
 0x1f8   : > { %v8153_v14 = vadd.f32 %v2351_v5, %v2174_v19  ;;  %v9052_v19 = vld [vmem:[#allocation42_spill] sm:$0xff]  ;;  %v8188_v59 = vmul.f32 2.0, %v9053_v7  ;;  %v9054_v23 = vld [vmem:[#allocation15_spill] sm:$0xff]  ;;  %v8204_v11 = vmul.f32 2.0, %v9057_v63 }
 0x1f9   : > { %v8156_v50 = vadd.f32 %v2350_v61, %v2173_v2  ;;  %v5220_v10 = vpop.f32.mrb[72].mxu0  ;;  %v5276_v32 = vpop.f32.mrb[56].mxu1  ;;  %v8185_v5 = vmul.f32 2.0, %v9052_v19  ;;  %v9061_v56 = vld [vmem:[#allocation27_spill] sm:$0xff]  ;;  %v9062_v19 = vld [vmem:[#allocation28_spill] sm:$0xff] }
 0x1fa   : > { %v2176_v27 = vmul.f32 %v5220_v10, %v7888_v6  ;;  %v2353_v26 = vmul.f32 %v5276_v32, %v7913_v12  ;;  %v2128_v15 = vpop.f32.mrb[73].mxu0  ;;  %v2305_v53 = vpop.f32.mrb[57].mxu1  ;;  %3546 = vperm.xlu1 %6071, %v3480_v41   ;;  %v8193_v10 = vmul.f32 2.0, %v9054_v23  ;;  %v9055_v32 = vld [vmem:[#allocation13_spill] sm:$0xff]  ;;  %v8222_v22 = vmul.f32 2.0, %v9061_v56 }
 0x1fb   : > { %v2175_v17 = vmul.f32 %v7888_v6, %v2128_v15  ;;  %v2352_v31 = vmul.f32 %v7913_v12, %v2305_v53  ;;  %3541 = vperm.xlu0 %6070, %v3479_v62   ;;  %v8225_v7 = vmul.f32 2.0, %v9062_v19 }
 0x1fc   : > { %v8164_v46 = vadd.f32 %v2353_v26, %v2176_v27  ;;  %v8196_v27 = vmul.f32 2.0, %v9055_v32 }
 0x1fd   : > { %v8167_v44 = vadd.f32 %v2352_v31, %v2175_v17  ;;  %v5223_v3 = vpop.f32.mrb[74].mxu0  ;;  %v5279_v24 = vpop.f32.mrb[58].mxu1  ;;  %v9056_v31 = vld [vmem:[#allocation16_spill] sm:$0xff] }
 0x1fe   : > { %v2178_v33 = vmul.f32 %v5223_v3, %v7888_v6  ;;  %v2355_v54 = vmul.f32 %v5279_v24, %v7913_v12  ;;  %v2138_v51 = vpop.f32.mrb[75].mxu0  ;;  %v2315_v29 = vpop.f32.mrb[59].mxu1  ;;  %3556 = vperm.xlu1 %6071, %v3482_v4   ;;  %v8201_v41 = vmul.f32 2.0, %v9056_v31  ;;  %v3484_v24 = vld [vmem:[%s8093_s28 + $0x78] sm:$0xff]  ;;  %v9065_v31 = vld [vmem:[#allocation35_spill] sm:$0xff]  ;;  %s8786_s28 = scalar_lea.vmem %s9116_s21, %s6585_s14 }
 0x1ff   : > { %v2177_v9 = vmul.f32 %v7888_v6, %v2138_v51  ;;  %v2354_v43 = vmul.f32 %v7913_v12, %v2315_v29  ;;  %3551 = vperm.xlu0 %6070, %v3481_v55   ;;  %v9059_v51 = vld [vmem:[#allocation23_spill] sm:$0xff] }
 0x200   : > { %v8178_v25 = vadd.f32 %v2355_v54, %v2178_v33  ;;  %v9058_v33 = vld [vmem:[#allocation20_spill] sm:$0xff]  ;;  %v8213_v29 = vmul.f32 2.0, %v9059_v51  ;;  %v9063_v55 = vld [vmem:[#allocation31_spill] sm:$0xff] }
 0x201   : > { %v8190_v2 = vadd.f32 %v2354_v43, %v2177_v9  ;;  %v5226_v61 = vpop.f32.mrb[76].mxu0  ;;  %v5282_v47 = vpop.f32.mrb[60].mxu1  ;;  %v8210_v54 = vmul.f32 2.0, %v9058_v33  ;;  %v9060_v9 = vld [vmem:[#allocation24_spill] sm:$0xff] }
 0x202   : > { %v2180_v26 = vmul.f32 %v5226_v61, %v7888_v6  ;;  %v2357_v15 = vmul.f32 %v5282_v47, %v7913_v12  ;;  %v2148_v53 = vpop.f32.mrb[77].mxu0  ;;  %v2325_v17 = vpop.f32.mrb[61].mxu1  ;;  %v8216_v43 = vmul.f32 2.0, %v9060_v9  ;;  %v8228_v61 = vmul.f32 2.0, %v9063_v55  ;;  %3566 = vperm.xlu1 %6071, %v3484_v24   ;;  %v9067_v9 = vld [vmem:[#allocation36_spill] sm:$0xff] }
 0x203   : > { %v2179_v62 = vmul.f32 %v7888_v6, %v2148_v53  ;;  %v2356_v3 = vmul.f32 %v7913_v12, %v2325_v17  ;;  %v9064_v53 = vld [vmem:[#allocation32_spill] sm:$0xff]  ;;  %v8241_v56 = vmul.f32 2.0, %v9067_v9  ;;  %3561 = vperm.xlu0 %6070, %v3483_v28   ;;  %v9077_v9 = vld [vmem:[#allocation17_spill] sm:$0xff]  ;;  %v8271_v28 = vld [vmem:[%s8844_s6 + $0x5] ss:$0 sm:$0xff] }
 0x204   : > { %v8218_v4 = vadd.f32 %v2357_v15, %v2180_v26  ;;  %v8233_v17 = vmul.f32 2.0, %v9064_v53  ;;  %v8236_v26 = vmul.f32 2.0, %v9065_v31  ;;  %v9071_v53 = vld [vmem:[#allocation40_spill] sm:$0xff] }
 0x205   : > { %v8230_v47 = vadd.f32 %v2356_v3, %v2179_v62  ;;  %v5229_v23 = vpop.f32.mrb[78].mxu0  ;;  %v5285_v32 = vpop.f32.mrb[62].mxu1  ;;  %9068 = vst [vmem:[#allocation34_spill] sm:$0xff] %v8241_v56  ;;  %v9069_v62 = vld [vmem:[#allocation39_spill] sm:$0xff]  ;;  %v8249_v31 = vmul.f32 2.0, %v9071_v53  ;;  %v8260_v56 = vmul.f32 2.0, %v9077_v9 }
 0x206   : > { %9066 = vst [vmem:[#allocation49_spill] sm:$0xff] %v8236_v26  ;;  %v2182_v15 = vmul.f32 %v5229_v23, %v7888_v6  ;;  %v2359_v63 = vmul.f32 %v5285_v32, %v7913_v12  ;;  %v2158_v33 = vpop.f32.mrb[79].mxu0  ;;  %v2335_v51 = vpop.f32.mrb[63].mxu1  ;;  %v8244_v3 = vmul.f32 2.0, %v9069_v62  ;;  %v9073_v23 = vld [vmem:[#allocation12_spill] sm:$0xff]  ;;  %v9075_v32 = vld [vmem:[#allocation14_spill] sm:$0xff] }
 0x207   : > { %v2181_v19 = vmul.f32 %v7888_v6, %v2158_v33  ;;  %v2358_v55 = vmul.f32 %v7913_v12, %v2335_v51  ;;  %9072 = vst [vmem:[#allocation47_spill] sm:$0xff] %v8249_v31  ;;  %v8252_v36 = vmul.f32 2.0, %v9073_v23  ;;  %v8255_v38 = vmul.f32 2.0, %v9075_v32  ;;  %9078 = vst [vmem:[#allocation42_spill] sm:$0xff] %v8260_v56  ;;  %v9079_v62 = vld [vmem:[#allocation18_spill] sm:$0xff]  ;;  %v9081_v33 = vld [vmem:[#allocation21_spill] sm:$0xff] }
 0x208   : > { %9070 = vst [vmem:[#allocation43_spill] sm:$0xff] %v8244_v3  ;;  %v8257_v24 = vadd.f32 %v2359_v63, %v2182_v15  ;;  %v8263_v3 = vmul.f32 2.0, %v9079_v62  ;;  %v8266_v51 = vmul.f32 2.0, %v9081_v33  ;;  %v9083_v32 = vld [vmem:[#allocation22_spill] sm:$0xff]  ;;  %v9085_v63 = vld [vmem:[#allocation25_spill] sm:$0xff] }
 0x209   : > { %9074 = vst [vmem:[#allocation46_spill] sm:$0xff] %v8252_v36  ;;  %9076 = vst [vmem:[#allocation41_spill] sm:$0xff] %v8255_v38  ;;  %v8273_v53 = vadd.f32 %v2358_v55, %v2181_v19  ;;  %v5320_v23 = vpop.f32.mrb[80].mxu0  ;;  %v8276_v15 = vmul.f32 2.0, %v9083_v32  ;;  %v8279_v9 = vmul.f32 2.0, %v9085_v63  ;;  %v9087_v56 = vld [vmem:[#allocation26_spill] sm:$0xff] }
 0x20a   : > { %9080 = vst [vmem:[#allocation11_spill] sm:$0xff] %v8263_v3  ;;  %9082 = vst [vmem:[#allocation15_spill] sm:$0xff] %v8266_v51  ;;  %v8282_v62 = vmul.f32 2.0, %v9087_v56  ;;  %v2543_v33 = vmul.f32 %v5320_v23, %v8176_v45  ;;  %v2459_v51 = vpop.f32.mrb[81].mxu0  ;;  %v5376_v3 = vpop.f32.mrb[64].mxu1  ;;  %v9089_v38 = vld [vmem:[#allocation29_spill] sm:$0xff] }
 0x20b   : > { %9084 = vst [vmem:[#allocation13_spill] sm:$0xff] %v8276_v15  ;;  %9086 = vst [vmem:[#allocation16_spill] sm:$0xff] %v8279_v9  ;;  %v8286_v36 = vmul.f32 2.0, %v9089_v38  ;;  %v9090_v31 = vld [vmem:[#allocation30_spill] sm:$0xff]  ;;  %v9091_v55 = vld [vmem:[#allocation33_spill] sm:$0xff]  ;;  %v2542_v32 = vmul.f32 %v8176_v45, %v2459_v51  ;;  %v2752_v63 = vpop.f32.mrb[65].mxu1  ;;  %v8315_v51 = vadd.f32 %v8271_v28, %v8000_v52  ;;  %v8330_v52 = vadd.f32 %v8271_v28, %v8030_v40 }
 0x20c   : > { %9088 = vst [vmem:[#allocation19_spill] sm:$0xff] %v8282_v62  ;;  %v8289_v19 = vmul.f32 2.0, %v9090_v31  ;;  %v8292_v12 = vmul.f32 2.0, %v9091_v55  ;;  %v9092_v9 = vld [vmem:[#allocation37_spill] sm:$0xff]  ;;  %v9093_v56 = vld [vmem:[#allocation44_spill] sm:$0xff]  ;;  %v2559_v38 = vadd.f32 %v2543_v33, %v8117_v20  ;;  %v8307_v31 = vadd.f32 %v8271_v28, %v7979_v16 }
 0x20d   : > { %v8296_v15 = vmul.f32 2.0, %v9092_v9  ;;  %v8299_v62 = vmul.f32 2.0, %v9093_v56  ;;  %v9095_v23 = vld [vmem:[#allocation45_spill] sm:$0xff]  ;;  %v8311_v55 = vadd.f32 %v8271_v28, %v7984_v39  ;;  %v2558_v9 = vadd.f32 %v2542_v32, %v8122_v1  ;;  %v5323_v56 = vpop.f32.mrb[82].mxu0 }
 0x20e   : > { %v8302_v26 = vmul.f32 2.0, %v9095_v23  ;;  %v8320_v23 = vadd.f32 %v8271_v28, %v8006_v37  ;;  %v8324_v20 = vadd.f32 %v8271_v28, %v8024_v57  ;;  %v2639_v16 = vadd.f32 %v8182_v13, %v2559_v38  ;;  %v2469_v33 = vpop.f32.mrb[83].mxu0 }
 0x20f   : > { %9094 = vst [vmem:[#allocation20_spill] sm:$0xff] %v8299_v62  ;;  %v2545_v39 = vmul.f32 %v5323_v56, %v8176_v45  ;;  %v8334_v1 = vadd.f32 %v8271_v28, %v8046_v49  ;;  %v2638_v37 = vadd.f32 %v8185_v5, %v2558_v9  ;;  %v2544_v32 = vmul.f32 %v8176_v45, %v2469_v33 }
 0x210   : > { %9096 = vst [vmem:[#allocation23_spill] sm:$0xff] %v8302_v26  ;;  %v5379_v26 = vpop.f32.mrb[66].mxu1  ;;  %v8340_v13 = vadd.f32 %v8271_v28, %v8052_v34  ;;  %v8344_v38 = vadd.f32 %v8271_v28, %v8066_v58  ;;  %v2655_v40 = vadd.f32 %v8271_v28, %v2639_v16  ;;  %v8350_v49 = vadd.f32 %v8271_v28, %v8072_v35 }
 0x211   : > { %v2762_v57 = vpop.f32.mrb[67].mxu1  ;;  %v2561_v56 = vadd.f32 %v2545_v39, %v8133_v42  ;;  %v8354_v5 = vadd.f32 %v8271_v28, %v8086_v18  ;;  %v2654_v9 = vadd.f32 %v8271_v28, %v2638_v37  ;;  %v2560_v34 = vadd.f32 %v2544_v32, %v8136_v0  ;;  %v5326_v33 = vpop.f32.mrb[84].mxu0 }
 0x212   : > { %v8360_v58 = vadd.f32 %v8271_v28, %v8098_v8  ;;  %v3330_v16 = vmax.f32 %v2655_v40, 1e-16  ;;  %v2547_v39 = vmul.f32 %v5326_v33, %v8176_v45  ;;  %v2479_v35 = vpop.f32.mrb[85].mxu0  ;;  %v5382_v62 = vpop.f32.mrb[68].mxu1  ;;  %v8366_v18 = vadd.f32 %v8271_v28, %v8106_v21 }
 0x213   : > { %9097 = vst [vmem:[#allocation24_spill] sm:$0xff] %v8354_v5  ;;  %v2641_v42 = vadd.f32 %v8188_v59, %v2561_v56  ;;  %v3329_v5 = vmax.f32 %v2654_v9, 1e-16  ;;  %v2640_v37 = vadd.f32 %v8193_v10, %v2560_v34  ;;  %v2546_v0 = vmul.f32 %v8176_v45, %v2479_v35  ;;  %v2772_v32 = vpop.f32.mrb[69].mxu1 }
 0x214   : > { %v8372_v8 = vadd.f32 %v8271_v28, %v8110_v60  ;;  %6072 = vrsqrt.f32 %v3330_v16  ;;  %v2563_v40 = vadd.f32 %v2547_v39, %v8143_v30  ;;  %v8377_v56 = vmul.f32 %v5376_v3, %v7888_v6 }
 0x215   : > { %v2657_v59 = vadd.f32 %v8271_v28, %v2641_v42  ;;  %6074 = vrsqrt.f32 %v3329_v5  ;;  %v2656_v21 = vadd.f32 %v8271_v28, %v2640_v37  ;;  %v2562_v10 = vadd.f32 %v2546_v0, %v8146_v48  ;;  %v5329_v9 = vpop.f32.mrb[86].mxu0 }
 0x216   : > { %v8382_v34 = vmul.f32 %v7888_v6, %v2752_v63  ;;  %v2643_v60 = vadd.f32 %v8196_v27, %v2563_v40  ;;  %v2549_v16 = vmul.f32 %v5329_v9, %v8176_v45  ;;  %v2489_v42 = vpop.f32.mrb[87].mxu0  ;;  %v5385_v35 = vpop.f32.mrb[70].mxu1  ;;  %v8387_v5 = vmul.f32 %v5379_v26, %v7888_v6 }
 0x217   : > { %v3332_v33 = vmax.f32 %v2657_v59, 1e-16  ;;  %v3331_v30 = vmax.f32 %v2656_v21, 1e-16  ;;  %v2642_v3 = vadd.f32 %v8201_v41, %v2562_v10  ;;  %v2548_v39 = vmul.f32 %v8176_v45, %v2489_v42  ;;  %v2782_v48 = vpop.f32.mrb[71].mxu1 }
 0x218   : > { %v8392_v63 = vmul.f32 %v7888_v6, %v2762_v57  ;;  %v2659_v37 = vadd.f32 %v8271_v28, %v2643_v60  ;;  %v2565_v27 = vadd.f32 %v2549_v16, %v8153_v14  ;;  %v8398_v59 = vmul.f32 %v5382_v62, %v7888_v6 }
 0x219   : > { %6076 = vrsqrt.f32 %v3332_v33  ;;  %v2658_v0 = vadd.f32 %v8271_v28, %v2642_v3  ;;  %v2564_v26 = vadd.f32 %v2548_v39, %v8156_v50  ;;  %v5332_v41 = vpop.f32.mrb[88].mxu0  ;;  %v8402_v21 = vmul.f32 %v7888_v6, %v2772_v32 }
 0x21a   : > { %6078 = vrsqrt.f32 %v3331_v30  ;;  %v3334_v40 = vmax.f32 %v2659_v37, 1e-16  ;;  %v2645_v57 = vadd.f32 %v8204_v11, %v2565_v27  ;;  %v2551_v10 = vmul.f32 %v5332_v41, %v8176_v45  ;;  %v2499_v9 = vpop.f32.mrb[89].mxu0  ;;  %v5388_v33 = vpop.f32.mrb[72].mxu1 }
 0x21b   : > { %v3333_v14 = vmax.f32 %v2658_v0, 1e-16  ;;  %v2644_v60 = vadd.f32 %v8210_v54, %v2564_v26  ;;  %v8408_v16 = vmul.f32 %v5385_v35, %v7888_v6  ;;  %v2550_v62 = vmul.f32 %v8176_v45, %v2499_v9  ;;  %v2792_v50 = vpop.f32.mrb[73].mxu1 }
 0x21c   : > { %6080 = vrsqrt.f32 %v3334_v40  ;;  %v2661_v42 = vadd.f32 %v8271_v28, %v2645_v57  ;;  %v8413_v32 = vmul.f32 %v7888_v6, %v2782_v48  ;;  %v2567_v11 = vadd.f32 %v2551_v10, %v8164_v46 }
 0x21d   : > { %6082 = vrsqrt.f32 %v3333_v14  ;;  %v2660_v30 = vadd.f32 %v8271_v28, %v2644_v60  ;;  %v2566_v3 = vadd.f32 %v2550_v62, %v8167_v44  ;;  %v8419_v54 = vmul.f32 %v5388_v33, %v7888_v6  ;;  %v5335_v35 = vpop.f32.mrb[90].mxu0 }
 0x21e   : > { %v6073_v39 = vpop.eup %6072  ;;  %v3336_v37 = vmax.f32 %v2661_v42, 1e-16  ;;  %v2647_v27 = vadd.f32 %v8213_v29, %v2567_v11  ;;  %v8423_v0 = vmul.f32 %v7888_v6, %v2792_v50  ;;  %v2553_v48 = vmul.f32 %v5335_v35, %v8176_v45  ;;  %v2509_v26 = vpop.f32.mrb[91].mxu0 }
 0x21f   : > { %v5391_v46 = vpop.f32.mrb[74].mxu1  ;;  %v6075_v41 = vpop.eup %6074  ;;  %v8427_v40 = vmul.f32 %v6073_v39, %v8307_v31  ;;  %v3335_v44 = vmax.f32 %v2660_v30, 1e-16  ;;  %v2646_v57 = vadd.f32 %v8216_v43, %v2566_v3  ;;  %v2552_v10 = vmul.f32 %v8176_v45, %v2509_v26 }
 0x220   : > { %v2802_v9 = vpop.f32.mrb[75].mxu1  ;;  %6084 = vrsqrt.f32 %v3336_v37  ;;  %v2663_v29 = vadd.f32 %v8271_v28, %v2647_v27  ;;  %v2569_v33 = vadd.f32 %v2553_v48, %v8178_v25  ;;  %v8434_v14 = vmul.f32 %v5391_v46, %v7888_v6 }
 0x221   : > { %6086 = vrsqrt.f32 %v3335_v44  ;;  %v2662_v60 = vadd.f32 %v8271_v28, %v2646_v57  ;;  %v2568_v31 = vadd.f32 %v2552_v10, %v8190_v2  ;;  %v8439_v62 = vmul.f32 %v7888_v6, %v2802_v9  ;;  %v5338_v43 = vpop.f32.mrb[92].mxu0 }
 0x222   : > { %v3338_v42 = vmax.f32 %v2663_v29, 1e-16  ;;  %v2649_v11 = vadd.f32 %v8222_v22, %v2569_v33  ;;  %v2555_v30 = vmul.f32 %v5338_v43, %v8176_v45  ;;  %v2519_v3 = vpop.f32.mrb[93].mxu0  ;;  %v5394_v25 = vpop.f32.mrb[76].mxu1  ;;  %v8444_v35 = vmul.f32 %v6075_v41, %v8311_v55 }
 0x223   : > { %v6077_v50 = vpop.eup %6076  ;;  %v3337_v37 = vmax.f32 %v2662_v60, 1e-16  ;;  %v2648_v27 = vadd.f32 %v8225_v7, %v2568_v31  ;;  %v2554_v2 = vmul.f32 %v8176_v45, %v2519_v3  ;;  %v8449_v48 = vmul.f32 %v5394_v25, %v7888_v6  ;;  %v2812_v26 = vpop.f32.mrb[77].mxu1 }
 0x224   : > { %v6079_v39 = vpop.eup %6078  ;;  %6088 = vrsqrt.f32 %v3338_v42  ;;  %v2665_v22 = vadd.f32 %v8271_v28, %v2649_v11  ;;  %v2571_v46 = vadd.f32 %v2555_v30, %v8218_v4  ;;  %v8454_v44 = vmul.f32 %v7888_v6, %v2812_v26 }
 0x225   : > { %6090 = vrsqrt.f32 %v3337_v37  ;;  %v2664_v55 = vadd.f32 %v8271_v28, %v2648_v27  ;;  %v2570_v41 = vadd.f32 %v2554_v2, %v8230_v47  ;;  %v5341_v7 = vpop.f32.mrb[94].mxu0  ;;  %v8459_v57 = vmul.f32 %v6079_v39, %v8320_v23  ;;  %v9098_v2 = vld [vmem:[#allocation49_spill] sm:$0xff] }
 0x226   : > { %v6081_v10 = vpop.eup %6080  ;;  %v3340_v9 = vmax.f32 %v2665_v22, 1e-16  ;;  %v2651_v29 = vadd.f32 %v8228_v61, %v2571_v46  ;;  %v2557_v33 = vmul.f32 %v5341_v7, %v8176_v45  ;;  %v2529_v60 = vpop.f32.mrb[95].mxu0  ;;  %v8464_v31 = vmul.f32 %v6077_v50, %v8315_v51  ;;  %v9099_v22 = vld [vmem:[#allocation50_spill] sm:$0xff] }
 0x227   : > { %v5397_v4 = vpop.f32.mrb[78].mxu1  ;;  %v6083_v43 = vpop.eup %6082  ;;  %v3339_v42 = vmax.f32 %v2664_v55, 1e-16  ;;  %v2650_v11 = vadd.f32 %v8233_v17, %v2570_v41  ;;  %v2556_v47 = vmul.f32 %v8176_v45, %v2529_v60 }
 0x228   : > { %v8469_v23 = vmul.f32 %v5397_v4, %v7888_v6  ;;  %v2822_v30 = vpop.f32.mrb[79].mxu1  ;;  %6092 = vrsqrt.f32 %v3340_v9  ;;  %v2667_v61 = vadd.f32 %v8271_v28, %v2651_v29  ;;  %v2573_v3 = vadd.f32 %v2557_v33, %v8257_v24  ;;  %v9100_v9 = vld [vmem:[#allocation34_spill] sm:$0xff] }
 0x229   : > { %v8474_v25 = vmul.f32 %v7888_v6, %v2822_v30  ;;  %6094 = vrsqrt.f32 %v3339_v42  ;;  %v2666_v51 = vadd.f32 %v8271_v28, %v2650_v11  ;;  %v2572_v50 = vadd.f32 %v2556_v47, %v8273_v53  ;;  %v5432_v17 = vpop.f32.mrb[96].mxu0 }
 0x22a   : > { %v8479_v39 = vmul.f32 %v6083_v43, %v8330_v52  ;;  %v6085_v37 = vpop.eup %6084  ;;  %v3342_v27 = vmax.f32 %v2667_v61, 1e-16  ;;  %v2653_v26 = vadd.f32 %v9098_v2, %v2573_v3  ;;  %v3009_v46 = vmul.f32 %v5432_v17, %v9099_v22  ;;  %v2929_v55 = vpop.f32.mrb[97].mxu0 }
 0x22b   : > { %v5488_v24 = vpop.f32.mrb[80].mxu1  ;;  %v8484_v6 = vmul.f32 %v6081_v10, %v8324_v20  ;;  %v6087_v41 = vpop.eup %6086  ;;  %v3341_v7 = vmax.f32 %v2666_v51, 1e-16  ;;  %v2652_v29 = vadd.f32 %v9100_v9, %v2572_v50  ;;  %v3008_v53 = vmul.f32 %v9099_v22, %v2929_v55 }
 0x22c   : > { %v3202_v52 = vmul.f32 %v5488_v24, %v8176_v45  ;;  %v3122_v33 = vpop.f32.mrb[81].mxu1  ;;  %6096 = vrsqrt.f32 %v3342_v27  ;;  %v2669_v60 = vadd.f32 %v8271_v28, %v2653_v26  ;;  %v3025_v4 = vadd.f32 %v3009_v46, %v8377_v56  ;;  %v9101_v46 = vld [vmem:[#allocation43_spill] sm:$0xff] }
 0x22d   : > { %v3201_v43 = vmul.f32 %v3122_v33, %v8176_v45  ;;  %6098 = vrsqrt.f32 %v3341_v7  ;;  %v2668_v20 = vadd.f32 %v8271_v28, %v2652_v29  ;;  %v3024_v10 = vadd.f32 %v3008_v53, %v8382_v34  ;;  %v5435_v42 = vpop.f32.mrb[98].mxu0  ;;  %v9102_v7 = vld [vmem:[#allocation47_spill] sm:$0xff] }
 0x22e   : > { %v8495_v11 = vmul.f32 %v6087_v41, %v8340_v13  ;;  %v6089_v47 = vpop.eup %6088  ;;  %v3344_v30 = vmax.f32 %v2669_v60, 1e-16  ;;  %v3218_v61 = vadd.f32 %v3202_v52, %v3025_v4  ;;  %v3011_v3 = vmul.f32 %v5435_v42, %v9099_v22  ;;  %v2939_v51 = vpop.f32.mrb[99].mxu0  ;;  %v8517_v52 = vld [vmem:[%s8844_s6 + $0x1] ss:$0 sm:$0xff] }
 0x22f   : > { %v5491_v50 = vpop.f32.mrb[82].mxu1  ;;  %v8499_v56 = vmul.f32 %v6085_v37, %v8334_v1  ;;  %v6091_v17 = vpop.eup %6090  ;;  %v8502_v27 = vmul.f32 %v6089_v47, %v8344_v38  ;;  %v3343_v2 = vmax.f32 %v2668_v20, 1e-16  ;;  %v3217_v34 = vadd.f32 %v3201_v43, %v3024_v10 }
 0x230   : > { %v3010_v26 = vmul.f32 %v9099_v22, %v2939_v51  ;;  %v3132_v13 = vpop.f32.mrb[83].mxu1  ;;  %6100 = vrsqrt.f32 %v3344_v30  ;;  %v3298_v55 = vadd.f32 %v9101_v46, %v3218_v61  ;;  %v3027_v24 = vadd.f32 %v3011_v3, %v8387_v5  ;;  %v9103_v61 = vld [vmem:[#allocation46_spill] sm:$0xff] }
 0x231   : > { %v3204_v41 = vmul.f32 %v5491_v50, %v8176_v45  ;;  %6102 = vrsqrt.f32 %v3343_v2  ;;  %v3297_v1 = vadd.f32 %v9102_v7, %v3217_v34  ;;  %v3203_v38 = vmul.f32 %v3132_v13, %v8176_v45  ;;  %v5438_v9 = vpop.f32.mrb[100].mxu0  ;;  %v9104_v34 = vld [vmem:[#allocation41_spill] sm:$0xff] }
 0x232   : > { %v3026_v37 = vadd.f32 %v3010_v26, %v8392_v63  ;;  %v8511_v29 = vpop.eup %6092  ;;  %v3314_v22 = vadd.f32 %v8271_v28, %v3298_v55  ;;  %v3013_v5 = vmul.f32 %v8517_v52, %v5438_v9  ;;  %v2949_v33 = vpop.f32.mrb[101].mxu0  ;;  %v8521_v4 = vmul.f32 %v6091_v17, %v8350_v49 }
 0x233   : > { %v3220_v53 = vadd.f32 %v3204_v41, %v3027_v24  ;;  %v5494_v60 = vpop.f32.mrb[84].mxu1  ;;  %v6095_v63 = vpop.eup %6094  ;;  %v3313_v43 = vadd.f32 %v8271_v28, %v3297_v1  ;;  %v3012_v10 = vmul.f32 %v8517_v52, %v2949_v33 }
 0x234   : > { %v3219_v20 = vadd.f32 %v3203_v38, %v3026_v37  ;;  %v3206_v42 = vmul.f32 %v5494_v60, %v8176_v45  ;;  %v3142_v47 = vpop.f32.mrb[85].mxu1  ;;  %v3362_v30 = vmax.f32 %v3314_v22, 1e-16  ;;  %v3029_v51 = vadd.f32 %v3013_v5, %v8398_v59  ;;  %v9105_v22 = vld [vmem:[#allocation42_spill] sm:$0xff] }
 0x235   : > { %v3300_v3 = vadd.f32 %v9103_v61, %v3220_v53  ;;  %v3205_v50 = vmul.f32 %v3142_v47, %v8176_v45  ;;  %v3361_v2 = vmax.f32 %v3313_v43, 1e-16  ;;  %v3028_v17 = vadd.f32 %v3012_v10, %v8402_v21  ;;  %v5441_v26 = vpop.f32.mrb[102].mxu0 }
 0x236   : > { %v3299_v49 = vadd.f32 %v9104_v34, %v3219_v20  ;;  %v8532_v13 = vmul.f32 %v6095_v63, %v8360_v58  ;;  %v8534_v46 = vpop.eup %6096  ;;  %6104 = vrsqrt.f32 %v3362_v30  ;;  %v3222_v24 = vadd.f32 %v3206_v42, %v3029_v51  ;;  %v2959_v59 = vpop.f32.mrb[103].mxu0  ;;  %v9106_v63 = vld [vmem:[#allocation11_spill] sm:$0xff] }
 0x237   : > { %v3316_v55 = vadd.f32 %v8271_v28, %v3300_v3  ;;  %v3015_v41 = vmul.f32 %v8517_v52, %v5441_v26  ;;  %v5497_v7 = vpop.f32.mrb[86].mxu1  ;;  %v8538_v1 = vpop.eup %6098  ;;  %6106 = vrsqrt.f32 %v3361_v2  ;;  %v3221_v21 = vadd.f32 %v3205_v50, %v3028_v17  ;;  %v9107_v26 = vld [vmem:[#allocation15_spill] sm:$0xff] }
 0x238   : > { %v3315_v37 = vadd.f32 %v8271_v28, %v3299_v49  ;;  %v3014_v38 = vmul.f32 %v8517_v52, %v2959_v59  ;;  %v3152_v58 = vpop.f32.mrb[87].mxu1  ;;  %v3302_v53 = vadd.f32 %v9105_v22, %v3222_v24  ;;  %v3208_v33 = vmul.f32 %v5497_v7, %v8176_v45  ;;  %v9108_v7 = vld [vmem:[#allocation13_spill] sm:$0xff] }
 0x239   : > { %v3364_v9 = vmax.f32 %v3316_v55, 1e-16  ;;  %v3031_v5 = vadd.f32 %v3015_v41, %v8408_v16  ;;  %v3301_v43 = vadd.f32 %v9106_v63, %v3221_v21  ;;  %v3207_v10 = vmul.f32 %v3152_v58, %v8176_v45  ;;  %v5444_v42 = vpop.f32.mrb[104].mxu0 }
 0x23a   : > { %v3363_v60 = vmax.f32 %v3315_v37, 1e-16  ;;  %v3030_v20 = vadd.f32 %v3014_v38, %v8413_v32  ;;  %v8548_v47 = vpop.eup %6100  ;;  %v3318_v30 = vadd.f32 %v8271_v28, %v3302_v53  ;;  %v3017_v3 = vmul.f32 %v8517_v52, %v5444_v42  ;;  %v2969_v51 = vpop.f32.mrb[105].mxu0 }
 0x23b   : > { %6108 = vrsqrt.f32 %v3364_v9  ;;  %v3224_v61 = vadd.f32 %v3208_v33, %v3031_v5  ;;  %v5500_v16 = vpop.f32.mrb[88].mxu1  ;;  %v8552_v50 = vpop.eup %6102  ;;  %v3317_v2 = vadd.f32 %v8271_v28, %v3301_v43  ;;  %v3016_v32 = vmul.f32 %v8517_v52, %v2969_v51 }
 0x23c   : > { %6110 = vrsqrt.f32 %v3363_v60  ;;  %v3223_v34 = vadd.f32 %v3207_v10, %v3030_v20  ;;  %v3162_v49 = vpop.f32.mrb[89].mxu1  ;;  %v3366_v17 = vmax.f32 %v3318_v30, 1e-16  ;;  %v3033_v24 = vadd.f32 %v3017_v3, %v8419_v54  ;;  %v9109_v10 = vld [vmem:[#allocation16_spill] sm:$0xff] }
 0x23d   : > { %v3304_v55 = vadd.f32 %v9107_v26, %v3224_v61  ;;  %v3210_v41 = vmul.f32 %v5500_v16, %v8176_v45  ;;  %v3365_v59 = vmax.f32 %v3317_v2, 1e-16  ;;  %v3032_v21 = vadd.f32 %v3016_v32, %v8423_v0  ;;  %v5447_v58 = vpop.f32.mrb[106].mxu0  ;;  %v9110_v2 = vld [vmem:[#allocation19_spill] sm:$0xff] }
 0x23e   : > { %v3303_v37 = vadd.f32 %v9108_v7, %v3223_v34  ;;  %v3209_v38 = vmul.f32 %v3162_v49, %v8176_v45  ;;  %6112 = vrsqrt.f32 %v3366_v17  ;;  %v3019_v53 = vmul.f32 %v8517_v52, %v5447_v58  ;;  %v2979_v5 = vpop.f32.mrb[107].mxu0  ;;  %v5503_v33 = vpop.f32.mrb[90].mxu1 }
 0x23f   : > { %v3320_v9 = vadd.f32 %v8271_v28, %v3304_v55  ;;  %v3226_v22 = vadd.f32 %v3210_v41, %v3033_v24  ;;  %6114 = vrsqrt.f32 %v3365_v59  ;;  %v3018_v63 = vmul.f32 %v8517_v52, %v2979_v5  ;;  %v3172_v43 = vpop.f32.mrb[91].mxu1 }
 0x240   : > { %v3319_v54 = vadd.f32 %v8271_v28, %v3303_v37  ;;  %v3225_v60 = vadd.f32 %v3209_v38, %v3032_v21  ;;  %v6105_v20 = vpop.eup %6104  ;;  %v3035_v30 = vadd.f32 %v3019_v53, %v8434_v14  ;;  %v3212_v61 = vmul.f32 %v5503_v33, %v8176_v45 }
 0x241   : > { %v3368_v0 = vmax.f32 %v3320_v9, 1e-16  ;;  %v3306_v42 = vadd.f32 %v9109_v10, %v3226_v22  ;;  %v6107_v3 = vpop.eup %6106  ;;  %v3410_v51 = vmul.f32 %v6105_v20, %v8427_v40  ;;  %v3034_v32 = vadd.f32 %v3018_v63, %v8439_v62  ;;  %v5450_v49 = vpop.f32.mrb[108].mxu0 }
 0x242   : > { %v3367_v16 = vmax.f32 %v3319_v54, 1e-16  ;;  %v3305_v34 = vadd.f32 %v9110_v2, %v3225_v60  ;;  %v3228_v26 = vadd.f32 %v3212_v61, %v3035_v30  ;;  %v3211_v55 = vmul.f32 %v3172_v43, %v8176_v45  ;;  %v2989_v24 = vpop.f32.mrb[109].mxu0  ;;  %v5506_v41 = vpop.f32.mrb[92].mxu1 }
 0x243   : > { %6116 = vrsqrt.f32 %v3368_v0  ;;  %v3322_v17 = vadd.f32 %v8271_v28, %v3306_v42  ;;  %v3021_v59 = vmul.f32 %v8517_v52, %v5450_v49  ;;  %v3020_v40 = vmul.f32 %v8517_v52, %v2989_v24  ;;  %v3182_v7 = vpop.f32.mrb[93].mxu1 }
 0x244   : > { %6118 = vrsqrt.f32 %v3367_v16  ;;  %v3321_v14 = vadd.f32 %v8271_v28, %v3305_v34  ;;  %v3308_v62 = vadd.f32 %v8286_v36, %v3228_v26  ;;  %v3227_v38 = vadd.f32 %v3211_v55, %v3034_v32 }
 0x245   : > { %v6109_v37 = vpop.eup %6108  ;;  %v3370_v21 = vmax.f32 %v3322_v17, 1e-16  ;;  %v3214_v58 = vmul.f32 %v5506_v41, %v8176_v45  ;;  %v3037_v53 = vadd.f32 %v3021_v59, %v8449_v48  ;;  %v3036_v5 = vadd.f32 %v3020_v40, %v8454_v44  ;;  %v5453_v54 = vpop.f32.mrb[110].mxu0 }
 0x246   : > { %v6111_v9 = vpop.eup %6110  ;;  %v3369_v22 = vmax.f32 %v3321_v14, 1e-16  ;;  %v3213_v33 = vmul.f32 %v3182_v7, %v8176_v45  ;;  %v3324_v60 = vadd.f32 %v8271_v28, %v3308_v62  ;;  %v3307_v63 = vadd.f32 %v8289_v19, %v3227_v38  ;;  %v2999_v43 = vpop.f32.mrb[111].mxu0  ;;  %v8592_v19 = vld [vmem:[%s8844_s6 + $0x6] ss:$0 sm:$0xff] }
 0x247   : > { %6120 = vrsqrt.f32 %v3370_v21  ;;  %v3023_v36 = vmul.f32 %v8517_v52, %v5453_v54  ;;  %v5509_v20 = vpop.f32.mrb[94].mxu1  ;;  %v3230_v0 = vadd.f32 %v3214_v58, %v3037_v53  ;;  %v3022_v48 = vmul.f32 %v8517_v52, %v2999_v43  ;;  %v9112_v58 = vld [vmem:[#allocation23_spill] sm:$0xff] }
 0x248   : > { %6122 = vrsqrt.f32 %v3369_v22  ;;  %v3229_v10 = vadd.f32 %v3213_v33, %v3036_v5  ;;  %v3192_v42 = vpop.f32.mrb[95].mxu1  ;;  %v6113_v44 = vpop.eup %6112  ;;  %v3372_v30 = vmax.f32 %v3324_v60, 1e-16  ;;  %v3323_v61 = vadd.f32 %v8271_v28, %v3307_v63 }
 0x249   : > { %v3039_v16 = vadd.f32 %v3023_v36, %v8469_v23  ;;  %v3216_v2 = vmul.f32 %v5509_v20, %v8176_v45  ;;  %v6115_v34 = vpop.eup %6114  ;;  %v3310_v32 = vadd.f32 %v8292_v12, %v3230_v0  ;;  %v3038_v52 = vadd.f32 %v3022_v48, %v8474_v25  ;;  %v8601_v23 = vld [vmem:[%s8844_s6 + $0x7] ss:$0 sm:$0xff]  ;;  %v9113_v20 = vld [vmem:[#allocation48_spill] sm:$0xff] }
 0x24a   : > { %v3309_v49 = vadd.f32 %v8296_v15, %v3229_v10  ;;  %v3215_v17 = vmul.f32 %v3192_v42, %v8176_v45  ;;  %6124 = vrsqrt.f32 %v3372_v30  ;;  %v3371_v26 = vmax.f32 %v3323_v61, 1e-16  ;;  %v9111_v45 = vld [vmem:[#allocation20_spill] sm:$0xff]  ;;  %v9114_v61 = vld [vmem:[#allocation38_spill] sm:$0xff] }
 0x24b   : > { %v3232_v55 = vadd.f32 %v3216_v2, %v3039_v16  ;;  %v3409_v24 = vmul.f32 %v6107_v3, %v8444_v35  ;;  %v3326_v41 = vadd.f32 %v8271_v28, %v3310_v32  ;;  %v3430_v15 = vmul.f32 %v8592_v19, %v3410_v51  ;;  %v9115_v32 = vld [vmem:[#allocation24_spill] sm:$0xff] }
 0x24c   : > { %v3325_v12 = vadd.f32 %v8271_v28, %v3309_v49  ;;  %v3231_v14 = vadd.f32 %v3215_v17, %v3038_v52  ;;  %6126 = vrsqrt.f32 %v3371_v26  ;;  %v3411_v7 = vmul.f32 %v6111_v9, %v8459_v57 }
 0x24d   : > { %v6117_v25 = vpop.eup %6116  ;;  %v3312_v59 = vadd.f32 %v9111_v45, %v3232_v55  ;;  %v3429_v40 = vmul.f32 %v8592_v19, %v3409_v24  ;;  %v3374_v62 = vmax.f32 %v3326_v41, 1e-16  ;;  %v3450_v3 = vadd.f32 %v8601_v23, %v3430_v15 }
 0x24e   : > { %v6119_v21 = vpop.eup %6118  ;;  %v3373_v38 = vmax.f32 %v3325_v12, 1e-16  ;;  %v3311_v35 = vadd.f32 %v9112_v58, %v3231_v14  ;;  %v3431_v51 = vmul.f32 %v8592_v19, %v3411_v7  ;;  %v3412_v5 = vmul.f32 %v6109_v37, %v8464_v31 }
 0x24f   : > { %v3328_v22 = vadd.f32 %v8271_v28, %v3312_v59  ;;  %v3449_v53 = vadd.f32 %v8601_v23, %v3429_v40  ;;  %6128 = vrsqrt.f32 %v3374_v62  ;;  %v3413_v57 = vmul.f32 %v6115_v34, %v8479_v39 }
 0x250   : > { %v3327_v33 = vadd.f32 %v8271_v28, %v3311_v35  ;;  %v3414_v9 = vmul.f32 %v6113_v44, %v8484_v6  ;;  %6130 = vrsqrt.f32 %v3373_v38  ;;  %v3451_v63 = vadd.f32 %v8601_v23, %v3431_v51 }
 0x251   : > { %v6121_v54 = vpop.eup %6120  ;;  %v3376_v60 = vmax.f32 %v3328_v22, 1e-16  ;;  %5518 = vmatprep.mubr.msk.f32.mxu0 %vm3589_vm0, %v3449_v53  ;;  %v3432_v36 = vmul.f32 %v8592_v19, %v3412_v5  ;;  %v2004_v31 = vadd.f32 %v8271_v28, %v9113_v20  ;;  %v3433_v39 = vmul.f32 %v8592_v19, %v3413_v57 }
 0x252   : > { %v6123_v43 = vpop.eup %6122  ;;  %v3418_v37 = vmul.f32 %v6121_v54, %v8502_v27  ;;  %v3375_v0 = vmax.f32 %v3327_v33, 1e-16  ;;  %5519 = vmatmul.mubr.msk.f32.vlgmr.msra.gmra.mrb[112].mxu0 %vm3589_vm0, %v3450_v3  ;;  %v3434_v6 = vmul.f32 %v8592_v19, %v3414_v9  ;;  %v3415_v10 = vmul.f32 %v6119_v21, %v8495_v11 }
 0x253   : > { %6132 = vrsqrt.f32 %v3376_v60  ;;  %5521 = vmatprep.mubr.msk.f32.mxu0 %vm3589_vm0, %v3451_v63  ;;  %v3416_v48 = vmul.f32 %v6117_v25, %v8499_v56  ;;  %v3452_v42 = vadd.f32 %v8601_v23, %v3432_v36  ;;  %v3453_v44 = vadd.f32 %v8601_v23, %v3433_v39 }
 0x254   : > { %6134 = vrsqrt.f32 %v3375_v0  ;;  %v3417_v27 = vmul.f32 %v6123_v43, %v8521_v4  ;;  %v6125_v30 = vpop.eup %6124  ;;  %v2005_v16 = vadd.f32 %v8271_v28, %v9114_v61  ;;  %v3435_v2 = vmul.f32 %v8592_v19, %v3415_v10  ;;  %v8682_v43 = vld [vmem:[%s8846_s8] ss:$0 sm:$0xff]  ;;  %v8689_v0 = vld [vmem:[%s8846_s8 + $0x1] ss:$0 sm:$0xff] }
 0x255   : > { %v3438_v34 = vmul.f32 %v8592_v19, %v3418_v37  ;;  %v3404_v11 = vmul.f32 %v8511_v29, %v9115_v32  ;;  %v3405_v49 = vmul.f32 %v8538_v1, %v8372_v8  ;;  %v3406_v4 = vmul.f32 %v8534_v46, %v8366_v18 }
 0x256   : > { %5522 = vmatmul.mubr.msk.f32.gmra.mrb[114].mxu0 %vm3589_vm0, %v3452_v42  ;;  %v3437_v56 = vmul.f32 %v8592_v19, %v3417_v27  ;;  %v3407_v52 = vmul.f32 %v8552_v50, %v2004_v31  ;;  %v6127_v28 = vpop.eup %6126  ;;  %v3454_v17 = vadd.f32 %v8601_v23, %v3434_v6  ;;  %v3455_v26 = vadd.f32 %v8601_v23, %v3435_v2 }
 0x257   : > { %5524 = vmatprep.mubr.msk.f32.mxu0 %vm3589_vm0, %v3453_v44  ;;  %v3420_v29 = vmul.f32 %v6125_v30, %v3404_v11  ;;  %v3436_v55 = vmul.f32 %v8592_v19, %v3416_v48  ;;  %v3419_v41 = vmul.f32 %v6127_v28, %v8532_v13  ;;  %v3408_v8 = vmul.f32 %v8548_v47, %v2005_v16 }
 0x258   : > { %v3457_v24 = vadd.f32 %v8601_v23, %v3437_v56  ;;  %v3458_v18 = vadd.f32 %v8601_v23, %v3438_v34 }
 0x259   : > { %v3440_v46 = vmul.f32 %v8592_v19, %v3420_v29  ;;  %v6129_v1 = vpop.eup %6128  ;;  %v3439_v50 = vmul.f32 %v8592_v19, %v3419_v41  ;;  %v3456_v13 = vadd.f32 %v8601_v23, %v3436_v55  ;;  %v8705_v29 = vld [vmem:[%s8846_s8 + $0x2] ss:$0 sm:$0xff] }
 0x25a   : > { %5525 = vmatmul.mubr.msk.f32.gmra.mrb[116].mxu0 %vm3589_vm0, %v3454_v17  ;;  %5530 = vmatprep.mubr.msk.f32.mxu1 %vm3589_vm0, %v3457_v24  ;;  %v6131_v12 = vpop.eup %6130  ;;  %v3422_v14 = vmul.f32 %v6129_v1, %v3406_v4 }
 0x25b   : > { %5527 = vmatprep.mubr.msk.f32.mxu0 %vm3589_vm0, %v3455_v26  ;;  %5531 = vmatmul.mubr.msk.f32.vlgmr.msra.gmra.mrb[96].mxu1 %vm3589_vm0, %v3458_v18  ;;  %v3459_v47 = vadd.f32 %v8601_v23, %v3439_v50  ;;  %v3421_v15 = vmul.f32 %v6131_v12, %v3405_v49  ;;  %v3460_v45 = vadd.f32 %v8601_v23, %v3440_v46 }
 0x25c   : > { %v3442_v59 = vmul.f32 %v8592_v19, %v3422_v14 }
 0x25d   : > { %v6133_v25 = vpop.eup %6132  ;;  %5533 = vmatprep.mubr.msk.f32.mxu1 %vm3589_vm0, %v3459_v47  ;;  %v3441_v7 = vmul.f32 %v8592_v19, %v3421_v15 }
 0x25e   : > { %v6135_v40 = vpop.eup %6134  ;;  %5528 = vmatmul.mubr.msk.f32.gmra.mrb[118].mxu0 %vm3589_vm0, %v3456_v13  ;;  %v3424_v21 = vmul.f32 %v6133_v25, %v3408_v8  ;;  %v3462_v58 = vadd.f32 %v8601_v23, %v3442_v59 }
 0x25f   : > { %5534 = vmatmul.mubr.msk.f32.gmra.mrb[98].mxu1 %vm3589_vm0, %v3460_v45  ;;  %v3423_v62 = vmul.f32 %v6135_v40, %v3407_v52  ;;  %v3461_v38 = vadd.f32 %v8601_v23, %v3441_v7 }
 0x260   : > { %v3444_v3 = vmul.f32 %v8592_v19, %v3424_v21 }
 0x261   : > { %v3443_v35 = vmul.f32 %v8592_v19, %v3423_v62  ;;  %5536 = vmatprep.mubr.msk.f32.mxu1 %vm3589_vm0, %v3461_v38 }
 0x262   : > { %v3464_v53 = vadd.f32 %v8601_v23, %v3444_v3 }
 0x263   : > { %5537 = vmatmul.mubr.msk.f32.gmra.mrb[100].mxu1 %vm3589_vm0, %v3462_v58  ;;  %v3463_v22 = vadd.f32 %v8601_v23, %v3443_v35 }
 0x265   : > { %5539 = vmatprep.mubr.msk.f32.mxu1 %vm3589_vm0, %v3463_v22  ;;  %v3502_v51 = vpop.permute.xlu1 %3501 }
 0x266   : > { %v3492_v5 = vpop.permute.xlu0 %3491  ;;  %v3575_v48 = vmul.f32 %v8682_v43, %v3502_v51 }
 0x267   : > { %5540 = vmatmul.mubr.msk.f32.gmra.mrb[102].mxu1 %vm3589_vm0, %v3464_v53  ;;  %v3573_v31 = vmul.f32 %v8682_v43, %v3492_v5 }
 0x269   : > { %v3507_v33 = vpop.permute.xlu1 %3506 }
 0x26a   : > { %v3497_v57 = vpop.permute.xlu0 %3496  ;;  %v3576_v42 = vmul.f32 %v8682_v43, %v3507_v33 }
 0x26b   : > { %v3574_v23 = vmul.f32 %v8682_v43, %v3497_v57 }
 0x26d   : > { %v3517_v9 = vpop.permute.xlu1 %3516 }
 0x26e   : > { %v3512_v54 = vpop.permute.xlu0 %3511  ;;  %v3578_v30 = vmul.f32 %v8682_v43, %v3517_v9 }
 0x26f   : > { %v3577_v61 = vmul.f32 %v8682_v43, %v3512_v54 }
 0x271   : > { %v3527_v60 = vpop.permute.xlu1 %3526 }
 0x272   : > { %v3522_v19 = vpop.permute.xlu0 %3521  ;;  %v3580_v16 = vmul.f32 %v8682_v43, %v3527_v60 }
 0x273   : > { %v3579_v34 = vmul.f32 %v8682_v43, %v3522_v19 }
 0x275   : > { %v3537_v63 = vpop.permute.xlu1 %3536 }
 0x276   : > { %v3532_v36 = vpop.permute.xlu0 %3531  ;;  %v3582_v32 = vmul.f32 %v8682_v43, %v3537_v63 }
 0x277   : > { %v3581_v11 = vmul.f32 %v8682_v43, %v3532_v36 }
 0x279   : > { %v3547_v20 = vpop.permute.xlu1 %3546 }
 0x27a   : > { %v3542_v37 = vpop.permute.xlu0 %3541  ;;  %v3584_v4 = vmul.f32 %v8682_v43, %v3547_v20 }
 0x27b   : > { %v3583_v55 = vmul.f32 %v8682_v43, %v3542_v37 }
 0x27d   : > { %v3557_v44 = vpop.permute.xlu1 %3556 }
 0x27e   : > { %v3552_v52 = vpop.permute.xlu0 %3551  ;;  %v3586_v8 = vmul.f32 %v8682_v43, %v3557_v44 }
 0x27f   : > { %v8711_v1 = vmul.f32 %v8682_v43, %v3552_v52 }
 0x281   : > { %v3567_v50 = vpop.permute.xlu1 %3566 }
 0x282   : > { %v3562_v35 = vpop.permute.xlu0 %3561  ;;  %v3588_v5 = vmul.f32 %v8682_v43, %v3567_v50 }
 0x325   : > { %v5520_v39 = vpop.f32.mrb[112].mxu0 }
 0x326   : > { %v3710_v6 = vadd.f32 %v5520_v39, %v3574_v23  ;;  %v3704_v10 = vpop.f32.mrb[113].mxu0  ;;  %v3587_v23 = vmul.f32 %v8682_v43, %v3562_v35 }
 0x327   : > { %v3705_v27 = vadd.f32 %v3704_v10, %v3573_v31 }
 0x328   : > { %v3788_v2 = vadd.f32 %v8689_v0, %v3710_v6 }
 0x329   : > { %v3787_v56 = vadd.f32 %v8689_v0, %v3705_v27  ;;  %v5523_v49 = vpop.f32.mrb[114].mxu0 }
 0x32a   : > { %v3820_v28 = vmul.f32 0.1, %v3788_v2  ;;  %v3720_v17 = vadd.f32 %v5523_v49, %v3576_v42  ;;  %v3714_v26 = vpop.f32.mrb[115].mxu0  ;;  %vm3804_vm1 = vcmp.ge.f32.partialorder %v3788_v2, 0.0 }
 0x32b   : > { %v3819_v24 = vmul.f32 0.1, %v3787_v56  ;;  %v3715_v41 = vadd.f32 %v3714_v26, %v3575_v48  ;;  %vm3803_vm2 = vcmp.ge.f32.partialorder %v3787_v56, 0.0 }
 0x32c   : > { %v3790_v18 = vadd.f32 %v8689_v0, %v3720_v17  ;;  %v3836_v46 = vsel %vm3804_vm1, %v3788_v2, %v3820_v28 }
 0x32d   : > { %v3789_v12 = vadd.f32 %v8689_v0, %v3715_v41  ;;  %v5526_v14 = vpop.f32.mrb[116].mxu0  ;;  %v3856_v13 = vmul.f32 %v8705_v29, %v3836_v46  ;;  %v3835_v47 = vsel %vm3803_vm2, %v3787_v56, %v3819_v24  ;;  %vm4036_vm2 = vcmask 7168  }
 0x32e   : > { %v3822_v15 = vmul.f32 0.1, %v3790_v18  ;;  %v3730_v25 = vadd.f32 %v5526_v14, %v3578_v30  ;;  %v3724_v45 = vpop.f32.mrb[117].mxu0  ;;  %v3855_v59 = vmul.f32 %v8705_v29, %v3835_v47  ;;  %v5532_v40 = vpop.f32.mrb[96].mxu1  ;;  %vm3806_vm4 = vcmp.ge.f32.partialorder %v3790_v18, 0.0 }
 0x32f   : > { %v3821_v7 = vmul.f32 0.1, %v3789_v12  ;;  %v3725_v21 = vadd.f32 %v3724_v45, %v3577_v61  ;;  %v3875_v62 = vsel %vm3871_vm3, %v3856_v13, 0.0  ;;  %v3750_v38 = vadd.f32 %v5532_v40, %v3582_v32  ;;  %v3744_v58 = vpop.f32.mrb[97].mxu1 }
 0x330   : > { %v3792_v3 = vadd.f32 %v8689_v0, %v3730_v25  ;;  %3876 = vadd.xlane.f32.xlu1 %v3875_v62  ;;  %v3872_v22 = vsel %vm3871_vm3, %v3855_v59, 0.0  ;;  %v3838_v53 = vsel %vm3806_vm4, %v3790_v18, %v3822_v15  ;;  %v3745_v51 = vadd.f32 %v3744_v58, %v3581_v11 }
 0x331   : > { %v3791_v33 = vadd.f32 %v8689_v0, %v3725_v21  ;;  %v5529_v57 = vpop.f32.mrb[118].mxu0  ;;  %3873 = vadd.xlane.f32.xlu0 %v3872_v22  ;;  %v3858_v9 = vmul.f32 %v8705_v29, %v3838_v53  ;;  %vm3805_vm5 = vcmp.ge.f32.partialorder %v3789_v12, 0.0  ;;  %v8723_v19 = vadd.f32 %v8689_v0, %v3750_v38 }
 0x332   : > { %v3740_v54 = vadd.f32 %v5529_v57, %v3580_v16  ;;  %v3734_v60 = vpop.f32.mrb[119].mxu0  ;;  %v3795_v63 = vadd.f32 %v8689_v0, %v3745_v51  ;;  %v5535_v36 = vpop.f32.mrb[98].mxu1  ;;  %v3837_v20 = vsel %vm3805_vm5, %v3789_v12, %v3821_v7  ;;  %v3824_v10 = vmul.f32 0.1, %v3792_v3 }
 0x333   : > { %v3823_v31 = vmul.f32 0.1, %v3791_v33  ;;  %v3735_v37 = vadd.f32 %v3734_v60, %v3579_v34  ;;  %v3881_v39 = vsel %vm3871_vm3, %v3858_v9, 0.0  ;;  %v3754_v6 = vpop.f32.mrb[99].mxu1  ;;  %v3760_v42 = vadd.f32 %v5535_v36, %v3584_v4 }
 0x334   : > { %v3794_v48 = vadd.f32 %v8689_v0, %v3740_v54  ;;  %vm3807_vm6 = vcmp.ge.f32.partialorder %v3791_v33, 0.0  ;;  %v3857_v30 = vmul.f32 %v8705_v29, %v3837_v20  ;;  %v3755_v61 = vadd.f32 %v3754_v6, %v3583_v55 }
 0x335   : > { %v3793_v44 = vadd.f32 %v8689_v0, %v3735_v37  ;;  %3882 = vadd.xlane.f32.xlu0 %v3881_v39  ;;  %v3839_v27 = vsel %vm3807_vm6, %v3791_v33, %v3823_v31  ;;  %v3828_v16 = vmul.f32 0.1, %v8723_v19  ;;  %v3827_v43 = vmul.f32 0.1, %v3795_v63 }
 0x336   : > { %v3859_v2 = vmul.f32 %v8705_v29, %v3839_v27  ;;  %v5538_v34 = vpop.f32.mrb[100].mxu1  ;;  %vm3808_vm7 = vcmp.ge.f32.partialorder %v3792_v3, 0.0  ;;  %v3826_v32 = vmul.f32 0.1, %v3794_v48  ;;  %v3797_v56 = vadd.f32 %v8689_v0, %v3755_v61  ;;  %v8769_v27 = vld [vmem:[%s8846_s8 + $0x3] ss:$0 sm:$0xff] }
 0x337   : > { %v3825_v11 = vmul.f32 0.1, %v3793_v44  ;;  %v3770_v49 = vadd.f32 %v5538_v34, %v3586_v8  ;;  %v3764_v4 = vpop.f32.mrb[101].mxu1  ;;  %v3878_v28 = vsel %vm3871_vm3, %v3857_v30, 0.0  ;;  %vm3809_vm8 = vcmp.ge.f32.partialorder %v3793_v44, 0.0 }
 0x338   : > { %v3884_v52 = vsel %vm3871_vm3, %v3859_v2, 0.0  ;;  %v3840_v17 = vsel %vm3808_vm7, %v3792_v3, %v3824_v10  ;;  %v3798_v26 = vadd.f32 %v8689_v0, %v3760_v42  ;;  %v3829_v55 = vmul.f32 0.1, %v3797_v56 }
 0x339   : > { %3885 = vadd.xlane.f32.xlu1 %v3884_v52  ;;  %3879 = vadd.xlane.f32.xlu0 %v3878_v28  ;;  %v3841_v24 = vsel %vm3809_vm8, %v3793_v44, %v3825_v11  ;;  %v3860_v41 = vmul.f32 %v8705_v29, %v3840_v17  ;;  %v3765_v46 = vadd.f32 %v3764_v4, %v8711_v1  ;;  %vm3811_vm9 = vcmp.ge.f32.partialorder %v3795_v63, 0.0 }
 0x33a   : > { %v3861_v18 = vmul.f32 %v8705_v29, %v3841_v24  ;;  %vm3810_vm10 = vcmp.ge.f32.partialorder %v3794_v48, 0.0  ;;  %v5541_v8 = vpop.f32.mrb[102].mxu1  ;;  %v3800_v50 = vadd.f32 %v8689_v0, %v3770_v49  ;;  %v3843_v14 = vsel %vm3811_vm9, %v3795_v63, %v3827_v43 }
 0x33b   : > { %v3887_v12 = vsel %vm3871_vm3, %v3860_v41, 0.0  ;;  %v3842_v13 = vsel %vm3810_vm10, %v3794_v48, %v3826_v32  ;;  %v3774_v47 = vpop.f32.mrb[103].mxu1  ;;  %v3799_v25 = vadd.f32 %v8689_v0, %v3765_v46  ;;  %v3863_v45 = vmul.f32 %v8705_v29, %v3843_v14 }
 0x33c   : > { %v3890_v15 = vsel %vm3871_vm3, %v3861_v18, 0.0  ;;  %v3862_v59 = vmul.f32 %v8705_v29, %v3842_v13  ;;  %v3780_v1 = vadd.f32 %v5541_v8, %v3588_v5  ;;  %v3775_v40 = vadd.f32 %v3774_v47, %v3587_v23 }
 0x33d   : > { %3891 = vadd.xlane.f32.xlu1 %v3890_v15  ;;  %3888 = vadd.xlane.f32.xlu0 %v3887_v12  ;;  %vm3813_vm11 = vcmp.ge.f32.partialorder %v3797_v56, 0.0  ;;  %vm3812_vm12 = vcmp.ge.f32.partialorder %v8723_v19, 0.0  ;;  %v3830_v7 = vmul.f32 0.1, %v3798_v26  ;;  %v3831_v21 = vmul.f32 0.1, %v3799_v25 }
 0x33e   : > { %v3896_v62 = vsel %vm3871_vm3, %v3863_v45, 0.0  ;;  %v3845_v38 = vsel %vm3813_vm11, %v3797_v56, %v3829_v55  ;;  %v3801_v58 = vadd.f32 %v8689_v0, %v3775_v40  ;;  %v3844_v3 = vsel %vm3812_vm12, %v8723_v19, %v3828_v16 }
 0x33f   : > { %v3865_v35 = vmul.f32 %v8705_v29, %v3845_v38  ;;  %v3893_v22 = vsel %vm3871_vm3, %v3862_v59, 0.0  ;;  %v3864_v53 = vmul.f32 %v8705_v29, %v3844_v3  ;;  %vm3815_vm13 = vcmp.ge.f32.partialorder %v3799_v25, 0.0 }
 0x340   : > { %vm3814_vm14 = vcmp.ge.f32.partialorder %v3798_v26, 0.0  ;;  %v3832_v51 = vmul.f32 0.1, %v3800_v50  ;;  %v3802_v5 = vadd.f32 %v8689_v0, %v3780_v1  ;;  %v3833_v33 = vmul.f32 0.1, %v3801_v58 }
 0x341   : > { %3897 = vadd.xlane.f32.xlu1 %v3896_v62  ;;  %3894 = vadd.xlane.f32.xlu0 %v3893_v22  ;;  %v3847_v57 = vsel %vm3815_vm13, %v3799_v25, %v3831_v21  ;;  %v3902_v9 = vsel %vm3871_vm3, %v3865_v35, 0.0  ;;  %v3846_v60 = vsel %vm3814_vm14, %v3798_v26, %v3830_v7  ;;  %vm3816_vm15 = vcmp.ge.f32.partialorder %v3800_v50, 0.0 }
 0x342   : > { %v3867_v54 = vmul.f32 %v8705_v29, %v3847_v57  ;;  %vm3817_vm0 = vcmp.ge.f32.partialorder %v3801_v58, 0.0  ;;  %v3899_v19 = vsel %vm3871_vm3, %v3864_v53, 0.0  ;;  %v3866_v63 = vmul.f32 %v8705_v29, %v3846_v60 }
 0x343   : > { %v3849_v36 = vsel %vm3817_vm0, %v3801_v58, %v3833_v33  ;;  %v3834_v20 = vmul.f32 0.1, %v3802_v5  ;;  %v3848_v23 = vsel %vm3816_vm15, %v3800_v50, %v3832_v51  ;;  %vm3818_vm1 = vcmp.ge.f32.partialorder %v3802_v5, 0.0 }
 0x344   : > { %v3908_v0 = vsel %vm3871_vm3, %v3867_v54, 0.0  ;;  %v3869_v31 = vmul.f32 %v8705_v29, %v3849_v36  ;;  %v3905_v37 = vsel %vm3871_vm3, %v3866_v63, 0.0  ;;  %v3868_v39 = vmul.f32 %v8705_v29, %v3848_v23 }
 0x345   : > { %3903 = vadd.xlane.f32.xlu1 %v3902_v9  ;;  %3900 = vadd.xlane.f32.xlu0 %v3899_v19  ;;  %v3850_v6 = vsel %vm3818_vm1, %v3802_v5, %v3834_v20 }
 0x346   : > { %v3914_v10 = vsel %vm3871_vm3, %v3869_v31, 0.0  ;;  %v3911_v48 = vsel %vm3871_vm3, %v3868_v39, 0.0  ;;  %v3870_v42 = vmul.f32 %v8705_v29, %v3850_v6 }
 0x348   : > { %v3917_v44 = vsel %vm3871_vm3, %v3870_v42, 0.0 }
 0x349   : > { %3909 = vadd.xlane.f32.xlu1 %v3908_v0  ;;  %3906 = vadd.xlane.f32.xlu0 %v3905_v37 }
 0x34d   : > { %3912 = vadd.xlane.f32.xlu0 %v3911_v48  ;;  %3915 = vadd.xlane.f32.xlu1 %v3914_v10 }
 0x351   : > { %3918 = vadd.xlane.f32.xlu0 %v3917_v44 }
 0x3bd   : > { %v3877_v30 = vpop.xlane.xlu1 %3876 }
 0x3be   : > { %v3925_v61 = vadd.f32 %v8769_v27, %v3877_v30  ;;  %v3874_v16 = vpop.xlane.xlu0 %3873 }
 0x3bf   : > { %v3924_v43 = vadd.f32 %v8769_v27, %v3874_v16 }
 0x3c0   : > { %v4238_v2 = vmul.f32 -1.442695, %v3925_v61 }
 0x3c1   : > { %v4237_v34 = vmul.f32 -1.442695, %v3924_v43 }
 0x3c2   : > { %6136 = vpow2.f32 %v4238_v2  ;;  %v3883_v29 = vpop.xlane.xlu0 %3882 }
 0x3c3   : > { %6138 = vpow2.f32 %v4237_v34  ;;  %v3927_v32 = vadd.f32 %v8769_v27, %v3883_v29 }
 0x3c5   : > { %v4240_v11 = vmul.f32 -1.442695, %v3927_v32 }
 0x3c6   : > { %v3886_v56 = vpop.xlane.xlu1 %3885  ;;  %v3880_v49 = vpop.xlane.xlu0 %3879 }
 0x3c7   : > { %6140 = vpow2.f32 %v4240_v11  ;;  %v3928_v4 = vadd.f32 %v8769_v27, %v3886_v56  ;;  %v3926_v52 = vadd.f32 %v8769_v27, %v3880_v49 }
 0x3c9   : > { %v4241_v28 = vmul.f32 -1.442695, %v3928_v4  ;;  %v4239_v17 = vmul.f32 -1.442695, %v3926_v52 }
 0x3ca   : > { %v3892_v26 = vpop.xlane.xlu1 %3891  ;;  %v3889_v55 = vpop.xlane.xlu0 %3888 }
 0x3cb   : > { %6142 = vpow2.f32 %v4241_v28  ;;  %v3930_v24 = vadd.f32 %v8769_v27, %v3892_v26  ;;  %v3929_v41 = vadd.f32 %v8769_v27, %v3889_v55 }
 0x3cc   : > { %v6137_v18 = vpop.eup %6136  ;;  %6144 = vpow2.f32 %v4239_v17 }
 0x3cd   : > { %v6139_v46 = vpop.eup %6138  ;;  %v3989_v8 = vadd.f32 1.0, %v6137_v18  ;;  %v4243_v50 = vmul.f32 -1.442695, %v3930_v24  ;;  %v4242_v14 = vmul.f32 -1.442695, %v3929_v41 }
 0x3ce   : > { %v3988_v12 = vadd.f32 1.0, %v6139_v46  ;;  %v3898_v13 = vpop.xlane.xlu1 %3897  ;;  %v3895_v47 = vpop.xlane.xlu0 %3894 }
 0x3cf   : > { %6146 = vrcp.f32 %v3989_v8  ;;  %v3932_v15 = vadd.f32 %v8769_v27, %v3898_v13  ;;  %v3931_v25 = vadd.f32 %v8769_v27, %v3895_v47 }
 0x3d0   : > { %6148 = vrcp.f32 %v3988_v12 }
 0x3d1   : > { %v6141_v45 = vpop.eup %6140  ;;  %6150 = vpow2.f32 %v4243_v50  ;;  %v4245_v59 = vmul.f32 -1.442695, %v3932_v15  ;;  %v4244_v1 = vmul.f32 -1.442695, %v3931_v25 }
 0x3d2   : > { %v3991_v40 = vadd.f32 1.0, %v6141_v45  ;;  %6152 = vpow2.f32 %v4242_v14  ;;  %v3904_v7 = vpop.xlane.xlu1 %3903  ;;  %v3901_v21 = vpop.xlane.xlu0 %3900 }
 0x3d3   : > { %6154 = vpow2.f32 %v4245_v59  ;;  %v3934_v62 = vadd.f32 %v8769_v27, %v3904_v7  ;;  %v3933_v38 = vadd.f32 %v8769_v27, %v3901_v21 }
 0x3d4   : > { %6156 = vrcp.f32 %v3991_v40 }
 0x3d5   : > { %v6143_v58 = vpop.eup %6142  ;;  %6158 = vpow2.f32 %v4244_v1  ;;  %v4247_v35 = vmul.f32 -1.442695, %v3934_v62  ;;  %v4246_v53 = vmul.f32 -1.442695, %v3933_v38 }
 0x3d6   : > { %v6145_v3 = vpop.eup %6144  ;;  %v3992_v22 = vadd.f32 1.0, %v6143_v58  ;;  %v3910_v51 = vpop.xlane.xlu1 %3909 }
 0x3d7   : > { %v3907_v5 = vpop.xlane.xlu0 %3906  ;;  %v3990_v33 = vadd.f32 1.0, %v6145_v3  ;;  %6160 = vpow2.f32 %v4247_v35  ;;  %v3936_v57 = vadd.f32 %v8769_v27, %v3910_v51 }
 0x3d8   : > { %v3935_v9 = vadd.f32 %v8769_v27, %v3907_v5  ;;  %6162 = vrcp.f32 %v3992_v22 }
 0x3d9   : > { %v6147_v54 = vpop.eup %6146  ;;  %6164 = vrcp.f32 %v3990_v33  ;;  %v4249_v60 = vmul.f32 -1.442695, %v3936_v57 }
 0x3da   : > { %v4248_v19 = vmul.f32 -1.442695, %v3935_v9  ;;  %v6149_v63 = vpop.eup %6148  ;;  %4038 = vst.msk [vmem:[%s8786_s28 + $0x8] sm:$0xff] %vm4036_vm2, %v6147_v54  ;;  %6166 = vpow2.f32 %v4246_v53  ;;  %v3916_v20 = vpop.xlane.xlu1 %3915 }
 0x3db   : > { %v3913_v36 = vpop.xlane.xlu0 %3912  ;;  %v6151_v23 = vpop.eup %6150  ;;  %4037 = vst.msk [vmem:[%s8786_s28] sm:$0xff] %vm4036_vm2, %v6149_v63  ;;  %6168 = vpow2.f32 %v4249_v60  ;;  %v3938_v31 = vadd.f32 %v8769_v27, %v3916_v20 }
 0x3dc   : > { %v3937_v0 = vadd.f32 %v8769_v27, %v3913_v36  ;;  %v6153_v37 = vpop.eup %6152  ;;  %v3994_v39 = vadd.f32 1.0, %v6151_v23  ;;  %6170 = vpow2.f32 %v4248_v19 }
 0x3dd   : > { %v6155_v6 = vpop.eup %6154  ;;  %v3993_v10 = vadd.f32 1.0, %v6153_v37  ;;  %v4251_v16 = vmul.f32 -1.442695, %v3938_v31 }
 0x3de   : > { %v4250_v48 = vmul.f32 -1.442695, %v3937_v0  ;;  %v6157_v42 = vpop.eup %6156  ;;  %6172 = vrcp.f32 %v3994_v39  ;;  %v3996_v44 = vadd.f32 1.0, %v6155_v6 }
 0x3df   : > { %v3919_v30 = vpop.xlane.xlu0 %3918  ;;  %v6159_v61 = vpop.eup %6158  ;;  %4040 = vst.msk [vmem:[%s8786_s28 + $0x18] sm:$0xff] %vm4036_vm2, %v6157_v42  ;;  %6174 = vrcp.f32 %v3993_v10 }
 0x3e0   : > { %v3939_v43 = vadd.f32 %v8769_v27, %v3919_v30  ;;  %6176 = vrcp.f32 %v3996_v44  ;;  %v3995_v2 = vadd.f32 1.0, %v6159_v61 }
 0x3e1   : > { %v6161_v34 = vpop.eup %6160  ;;  %6178 = vpow2.f32 %v4250_v48 }
 0x3e2   : > { %v4252_v29 = vmul.f32 -1.442695, %v3939_v43  ;;  %v6163_v32 = vpop.eup %6162  ;;  %6180 = vrcp.f32 %v3995_v2  ;;  %v3998_v11 = vadd.f32 1.0, %v6161_v34 }
 0x3e3   : > { %v6165_v56 = vpop.eup %6164  ;;  %4041 = vst.msk [vmem:[%s8786_s28 + $0x20] sm:$0xff] %vm4036_vm2, %v6163_v32  ;;  %6182 = vpow2.f32 %v4251_v16 }
 0x3e4   : > { %v6167_v49 = vpop.eup %6166  ;;  %4039 = vst.msk [vmem:[%s8786_s28 + $0x10] sm:$0xff] %vm4036_vm2, %v6165_v56  ;;  %6184 = vrcp.f32 %v3998_v11 }
 0x3e5   : > { %v6169_v27 = vpop.eup %6168  ;;  %v3997_v4 = vadd.f32 1.0, %v6167_v49  ;;  %6186 = vpow2.f32 %v4252_v29 }
 0x3e6   : > { %v6171_v52 = vpop.eup %6170  ;;  %v4000_v28 = vadd.f32 1.0, %v6169_v27 }
 0x3e7   : > { %6188 = vrcp.f32 %v3997_v4  ;;  %v3999_v17 = vadd.f32 1.0, %v6171_v52 }
 0x3e8   : > { %v6173_v26 = vpop.eup %6172  ;;  %6190 = vrcp.f32 %v4000_v28 }
 0x3e9   : > { %v6175_v55 = vpop.eup %6174  ;;  %4043 = vst.msk [vmem:[%s8786_s28 + $0x30] sm:$0xff] %vm4036_vm2, %v6173_v26  ;;  %6192 = vrcp.f32 %v3999_v17 }
 0x3ea   : > { %v6177_v24 = vpop.eup %6176  ;;  %4042 = vst.msk [vmem:[%s8786_s28 + $0x28] sm:$0xff] %vm4036_vm2, %v6175_v55 }
 0x3eb   : > { %v6179_v41 = vpop.eup %6178  ;;  %4045 = vst.msk [vmem:[%s8786_s28 + $0x40] sm:$0xff] %vm4036_vm2, %v6177_v24 }
 0x3ec   : > { %v6181_v18 = vpop.eup %6180  ;;  %v4001_v46 = vadd.f32 1.0, %v6179_v41 }
 0x3ed   : > { %v6183_v8 = vpop.eup %6182  ;;  %4044 = vst.msk [vmem:[%s8786_s28 + $0x38] sm:$0xff] %vm4036_vm2, %v6181_v18 }
 0x3ee   : > { %v6185_v50 = vpop.eup %6184  ;;  %6194 = vrcp.f32 %v4001_v46  ;;  %v4002_v12 = vadd.f32 1.0, %v6183_v8 }
 0x3ef   : > { %v6187_v14 = vpop.eup %6186  ;;  %4047 = vst.msk [vmem:[%s8786_s28 + $0x50] sm:$0xff] %vm4036_vm2, %v6185_v50 }
 0x3f0   : > { %6196 = vrcp.f32 %v4002_v12  ;;  %v4003_v13 = vadd.f32 1.0, %v6187_v14 }
 0x3f1   : > { %v6189_v47 = vpop.eup %6188 }
 0x3f2   : > { %v6191_v15 = vpop.eup %6190  ;;  %4046 = vst.msk [vmem:[%s8786_s28 + $0x48] sm:$0xff] %vm4036_vm2, %v6189_v47  ;;  %6198 = vrcp.f32 %v4003_v13 }
 0x3f3   : > { %v6193_v25 = vpop.eup %6192  ;;  %4049 = vst.msk [vmem:[%s8786_s28 + $0x60] sm:$0xff] %vm4036_vm2, %v6191_v15 }
 0x3f4   : > { %4048 = vst.msk [vmem:[%s8786_s28 + $0x58] sm:$0xff] %vm4036_vm2, %v6193_v25 }
 0x3f8   : > { %v6195_v45 = vpop.eup %6194 }
 0x3f9   : > { %4050 = vst.msk [vmem:[%s8786_s28 + $0x68] sm:$0xff] %vm4036_vm2, %v6195_v45 }
 0x3fa   : > { %v6197_v59 = vpop.eup %6196 }
 0x3fb   : > { %4051 = vst.msk [vmem:[%s8786_s28 + $0x70] sm:$0xff] %vm4036_vm2, %v6197_v59 }
 0x3fc   : > { %v6199_v1 = vpop.eup %6198 }
 0x3fd   : > { %4052 = vst.msk [vmem:[%s8786_s28 + $0x78] sm:$0xff] %vm4036_vm2, %v6199_v1 }
 0x3fe PF: > { %s9117_s12 = sld [smem:[#allocation9_spill]]  ;;  %s9118_s14 = sld [smem:[#allocation10_spill]] }
 0x3ff   : > { %s9119_s30 = smov %s6321_s10  ;;  %s9120_s10 = smov %s6325_s11 }
 0x404   : > { %p22_p2 = scmp.ge.s32.totalorder %s9117_s12, 4   ;;  %s9121_s11 = smov %s9118_s14 }
 0x406   :  { %24 = sbr.rel (!%p22_p2) target bundleno = 8 (0x8), region = 126 }
 0x40d   :  { %4075 = vsyncpa [#allocation3], 1 }
 0x40e   :  { %4077 = vsyncpa [#allocation3 + $0x1], 1 }
 0x40f   :  { %4078 = vsyncpa [#allocation5], 1 }
 0x410   :  { %4080 = vsyncpa [#allocation5 + $0x1], 1 }

</bundles_post_ra>
